<compile_context>
chip_gen: v5e
topology: v5e:2x2
jax: 0.10.0
libtpu: 0.0.40
codegen_flags: <defaults>
</compile_context>

<pallas_src>
import functools

import jax
import jax.numpy as jnp
from jax import lax
from jax.experimental import pallas as pl
from jax.experimental.pallas import tpu as pltpu

EPS = 1e-5


# ----------------------------------------------------------------------------
# VMEM budgeting
# ----------------------------------------------------------------------------
def _vmem_limits():
    """(compiler vmem limit, per-step planning budget) for the local TPU gen."""
    cap = 64 * 1024 * 1024                      # conservative fallback (v7x/TC)
    try:
        info = pltpu.get_tpu_info()
        cap = int(getattr(info, "vmem_capacity_bytes", cap))
    except Exception:
        pass
    limit = min(int(cap * 0.85), 112 * 1024 * 1024)   # ~54 MiB v7x, ~108 MiB v5e/v6e
    budget = int(limit * 0.80)
    return limit, budget


def _divisor_tiles(n, step=8):
    cands = [t for t in range(step, n + 1, step) if n % t == 0]
    return cands if cands else [n]


def _pick_row_tile(H, W, Cin, Cout, budget, *, in_bytes=4, slab_bytes=4,
                   mxu_bytes=4):
    """Largest row tile whose per-step VMEM footprint fits the budget."""
    def need(th):
        main = 2 * th * (W + 2) * Cin * in_bytes          # double-buffered input tile
        halo = 4 * (W + 2) * Cin * in_bytes                # 2 halo rows, double-buffered
        wts = 2 * 3 * (3 * Cin) * Cout * mxu_bytes         # resident weights (x2 buffers)
        outb = 2 * th * (W + 2) * Cout * slab_bytes        # double-buffered output tile
        acc = th * W * Cout * 4                            # f32 accumulator scratch
        fold = th * W * 3 * Cin * mxu_bytes                # kx-folded matmul operand
        temps = th * (W + 2) * Cin * 4 + 2 * th * W * Cout * 4
        return main + halo + wts + outb + acc + fold + temps

    best = None
    for t in _divisor_tiles(H):
        if need(t) <= budget:
            best = t
    return best if best is not None else _divisor_tiles(H)[0]


def _pick_stream_tile(rows, wp2, c, budget):
    per_row = (2 * wp2 * c + 2 * (wp2 - 2) * c + 2 * wp2 * c) * 4
    best = None
    for t in _divisor_tiles(rows):
        if t * per_row <= budget:
            best = t
    return best if best is not None else _divisor_tiles(rows)[0]


# ----------------------------------------------------------------------------
# Kernels
# ----------------------------------------------------------------------------
def _conv_block_kernel(main_ref, top_ref, bot_ref, w_ref, *rest,
                       TH, W, Cin, Cout, HT, apply_affine, mxu_dtype):
    """3x3 conv (stride 1, pad 1) of one row tile + partial BN statistics.

    main_ref : (1, TH, W+2, Cin)  W-padded input rows [i*TH, (i+1)*TH)
    top_ref  : (1, 1,  W+2, Cin)  row i*TH-1 (clamped; masked at image top)
    bot_ref  : (1, 1,  W+2, Cin)  row (i+1)*TH (clamped; masked at image bottom)
    w_ref    : (3, 3*Cin, Cout)   per-ky kx-folded weights
    optional scale/shift (1, Cin): previous block's fused BN affine
    outs: conv slab (1, TH, W+2, Cout) W-padded raw conv; stats (1,1,2,Cout)
    scratch: acc_ref (TH*W, Cout) f32
    """
    if apply_affine:
        scale_ref, shift_ref, out_ref, stats_ref, acc_ref = rest
    else:
        out_ref, stats_ref, acc_ref = rest

    i = pl.program_id(1)

    x_main = main_ref[0].astype(jnp.float32)      # (TH, W+2, Cin)
    x_top = top_ref[0].astype(jnp.float32)        # (1,  W+2, Cin)
    x_bot = bot_ref[0].astype(jnp.float32)

    if apply_affine:
        # Fused epilogue of the previous block: y = relu(x*scale + shift).
        # The stored W-pad columns hold raw zeros, so re-zero them after the
        # affine (the true padding of the previous activation is 0).
        sc = scale_ref[...].astype(jnp.float32)   # (1, Cin)
        sh = shift_ref[...].astype(jnp.float32)
        col = lax.broadcasted_iota(jnp.int32, (1, W + 2, 1), 1)
        col_ok = jnp.logical_and(col >= 1, col <= W)

        def act(t):
            return jnp.where(col_ok, jnp.maximum(t * sc + sh, 0.0), 0.0)

        x_main, x_top, x_bot = act(x_main), act(x_top), act(x_bot)

    # Zero the H-halo rows where the tile touches the image border.
    x_top = jnp.where(i > 0, x_top, 0.0)
    x_bot = jnp.where(i < HT - 1, x_bot, 0.0)

    xm = x_main.astype(mxu_dtype)
    xt = x_top.astype(mxu_dtype)
    xb = x_bot.astype(mxu_dtype)

    def kxfold(t, rows):
        # (rows, W+2, Cin) -> (rows*W, 3*Cin): fold the 3 kx taps into K.
        return jnp.concatenate(
            [t[:, 0:W, :], t[:, 1:W + 1, :], t[:, 2:W + 2, :]],
            axis=-1).reshape(rows * W, 3 * Cin)

    f_main = kxfold(xm, TH)        # (TH*W, 3Cin)
    f_top = kxfold(xt, 1)          # (W,    3Cin)
    f_bot = kxfold(xb, 1)

    w_up = w_ref[0]                # ky = 0 (tap one row up)
    w_mid = w_ref[1]               # ky = 1 (center row)
    w_dn = w_ref[2]                # ky = 2 (tap one row down)

    dot = functools.partial(jnp.dot, preferred_element_type=jnp.float32)
    nmid = (TH - 1) * W

    acc_ref[...] = dot(f_main, w_mid)
    acc_ref[W:, :] += dot(f_main[:nmid], w_up)
    acc_ref[:W, :] += dot(f_top, w_up)
    acc_ref[:nmid, :] += dot(f_main[W:], w_dn)
    acc_ref[nmid:, :] += dot(f_bot, w_dn)

    acc = acc_ref[...]                                       # (TH*W, Cout) f32

    # Per-tile BN partials: [sum, sum of squared deviations from the tile
    # mean]; combined across tiles with Chan's formula outside the kernel.
    s = jnp.sum(acc, axis=0, keepdims=True)                  # (1, Cout)
    mu = s * (1.0 / (TH * W))
    d = acc - mu
    m2 = jnp.sum(d * d, axis=0, keepdims=True)
    stats_ref[...] = jnp.concatenate([s, m2], axis=0).reshape(1, 1, 2, Cout)

    # Store the raw conv tile W-padded (zero side columns) so the next block
    # can window it directly — no XLA pad pass for the inter-block activation.
    out_ref[:, :, 1:W + 1, :] = acc.reshape(1, TH, W, Cout).astype(out_ref.dtype)
    zc = jnp.zeros((1, TH, 1, Cout), out_ref.dtype)
    out_ref[:, :, 0:1, :] = zc
    out_ref[:, :, W + 1:, :] = zc


def _affine_relu_kernel(x_ref, scale_ref, shift_ref, o_ref, *, W):
    """Final BN epilogue + ReLU, dropping the W-pad columns."""
    x = x_ref[:, 1:W + 1, :].astype(jnp.float32)
    y = jnp.maximum(x * scale_ref[...] + shift_ref[...], 0.0)
    o_ref[...] = y.astype(o_ref.dtype)


# ----------------------------------------------------------------------------
# Wrappers
# ----------------------------------------------------------------------------
def _conv_bn_block(x_pad, w_hwio, gamma, beta, prev_scale, prev_shift, *,
                   th, vmem_limit, mxu_dtype, slab_dtype):
    """One Conv3x3(pad=1) block; returns (W-padded raw conv slab, scale, shift)."""
    N, H, Wp2, Cin = x_pad.shape
    W = Wp2 - 2
    Cout = w_hwio.shape[-1]
    assert H % th == 0 and th >= 2, (H, th)
    HT = H // th
    apply_affine = prev_scale is not None

    cparams = pltpu.CompilerParams(
        dimension_semantics=("parallel", "parallel"),
        vmem_limit_bytes=vmem_limit)

    kernel = functools.partial(
        _conv_block_kernel, TH=th, W=W, Cin=Cin, Cout=Cout, HT=HT,
        apply_affine=apply_affine, mxu_dtype=mxu_dtype)

    in_specs = [
        pl.BlockSpec((1, th, Wp2, Cin), lambda n, i: (n, i, 0, 0)),
        # 1-row halo windows (block size 1 => element-granular row index).
        pl.BlockSpec((1, 1, Wp2, Cin),
                     lambda n, i: (n, jnp.maximum(i * th - 1, 0), 0, 0)),
        pl.BlockSpec((1, 1, Wp2, Cin),
                     lambda n, i: (n, jnp.minimum((i + 1) * th, H - 1), 0, 0)),
        # Resident folded weights (budget accounts for its 2x buffering).
        pl.BlockSpec((3, 3 * Cin, Cout), lambda n, i: (0, 0, 0)),
    ]
    args = [x_pad, x_pad, x_pad,
            w_hwio.reshape(3, 3 * Cin, Cout).astype(mxu_dtype)]
    if apply_affine:
        in_specs += [pl.BlockSpec((1, Cin), lambda n, i: (0, 0)),
                     pl.BlockSpec((1, Cin), lambda n, i: (0, 0))]
        args += [prev_scale.reshape(1, Cin).astype(jnp.float32),
                 prev_shift.reshape(1, Cin).astype(jnp.float32)]

    conv_pad, stats = pl.pallas_call(
        kernel,
        grid=(N, HT),
        in_specs=in_specs,
        out_specs=(
            pl.BlockSpec((1, th, Wp2, Cout), lambda n, i: (n, i, 0, 0)),
            pl.BlockSpec((1, 1, 2, Cout), lambda n, i: (n, i, 0, 0)),
        ),
        out_shape=(
            jax.ShapeDtypeStruct((N, H, Wp2, Cout), slab_dtype),
            jax.ShapeDtypeStruct((N, HT, 2, Cout), jnp.float32),
        ),
        scratch_shapes=[pltpu.VMEM((th * W, Cout), jnp.float32)],
        compiler_params=cparams,
    )(*args)

    # Tiny per-channel reduction (Chan's parallel variance) + affine folding.
    cnt_tile = jnp.float32(th * W)
    count = jnp.float32(N * H * W)
    sums = stats[:, :, 0, :]
    m2s = stats[:, :, 1, :]
    mean = jnp.sum(sums, axis=(0, 1)) / count
    tile_mean = sums / cnt_tile
    m2_tot = jnp.sum(m2s, axis=(0, 1)) + jnp.sum(
        cnt_tile * (tile_mean - mean) ** 2, axis=(0, 1))
    var = m2_tot / count                      # biased variance (train-mode BN)
    scale = gamma * lax.rsqrt(var + EPS)
    shift = beta - mean * scale
    return conv_pad, scale, shift


def _final_affine_relu(conv_pad, scale, shift, *, vmem_limit, budget):
    """Standalone streaming epilogue for the last block (flat 1-D grid)."""
    N, H, Wp2, C = conv_pad.shape
    W = Wp2 - 2
    rows = N * H
    tb = _pick_stream_tile(rows, Wp2, C, budget)
    xr = conv_pad.reshape(rows, Wp2, C)

    y = pl.pallas_call(
        functools.partial(_affine_relu_kernel, W=W),
        grid=(rows // tb,),
        in_specs=[pl.BlockSpec((tb, Wp2, C), lambda g: (g, 0, 0)),
                  pl.BlockSpec((1, C), lambda g: (0, 0)),
                  pl.BlockSpec((1, C), lambda g: (0, 0))],
        out_specs=pl.BlockSpec((tb, W, C), lambda g: (g, 0, 0)),
        out_shape=jax.ShapeDtypeStruct((rows, W, C), jnp.float32),
        compiler_params=pltpu.CompilerParams(
            dimension_semantics=("parallel",), vmem_limit_bytes=vmem_limit),
    )(xr, scale.reshape(1, C), shift.reshape(1, C))
    return y.reshape(N, H, W, C)


def double_convolution(x_nchw, params, *, tile_h=None,
                       mxu_dtype=jnp.float32, slab_dtype=jnp.float32):
    """PyTorch-semantics forward.  x_nchw: (N, Cin, H, W) float32.

    mxu_dtype / slab_dtype may be set to jnp.bfloat16 for MXU / HBM throughput
    at reduced accuracy; defaults stay float32 to preserve 1e-4 parity.
    NOTE: conv biases cancel exactly only under training-mode BN over (N,H,W).
    """
    vmem_limit, budget = _vmem_limits()
    x = jnp.transpose(x_nchw, (0, 2, 3, 1))                 # NCHW -> NHWC
    N, H, W, Cin = x.shape
    Cout1 = params["w1"].shape[-1]
    Cout2 = params["w2"].shape[-1]
    slab_bytes = jnp.dtype(slab_dtype).itemsize
    mxu_bytes = jnp.dtype(mxu_dtype).itemsize

    # One small W-only pad of the network input.  The inter-block activation is
    # produced W-padded directly by the conv kernel (no HBM pad round trip);
    # H halos are fetched as 1-row windows.
    x_pad = jnp.pad(x, ((0, 0), (0, 0), (1, 1), (0, 0)))

    th1 = tile_h or _pick_row_tile(H, W, Cin, Cout1, budget,
                                   in_bytes=4, slab_bytes=slab_bytes,
                                   mxu_bytes=mxu_bytes)
    conv1, s1, b1 = _conv_bn_block(
        x_pad, params["w1"], params["g1"], params["be1"], None, None,
        th=th1, vmem_limit=vmem_limit, mxu_dtype=mxu_dtype, slab_dtype=slab_dtype)

    th2 = tile_h or _pick_row_tile(H, W, Cout1, Cout2, budget,
                                   in_bytes=slab_bytes, slab_bytes=slab_bytes,
                                   mxu_bytes=mxu_bytes)
    conv2, s2, b2 = _conv_bn_block(
        conv1, params["w2"], params["g2"], params["be2"], s1, b1,
        th=th2, vmem_limit=vmem_limit, mxu_dtype=mxu_dtype, slab_dtype=slab_dtype)

    y = _final_affine_relu(conv2, s2, b2, vmem_limit=vmem_limit, budget=budget)
    return jnp.transpose(y, (0, 3, 1, 2))                   # NHWC -> NCHW


# ----------------------------------------------------------------------------
# Params / reference / demo
# ----------------------------------------------------------------------------
def init_params(key, in_channels, out_channels):
    k = jax.random.split(key, 4)
    fan1 = in_channels * 9
    fan2 = out_channels * 9
    w1 = jax.random.normal(k[0], (3, 3, in_channels, out_channels), jnp.float32) / jnp.sqrt(fan1)
    b1 = jax.random.normal(k[1], (out_channels,), jnp.float32) * 0.1
    w2 = jax.random.normal(k[2], (3, 3, out_channels, out_channels), jnp.float32) / jnp.sqrt(fan2)
    b2 = jax.random.normal(k[3], (out_channels,), jnp.float32) * 0.1
    return {
        "w1": w1, "b1": b1,
        "g1": jnp.ones((out_channels,), jnp.float32),
        "be1": jnp.zeros((out_channels,), jnp.float32),
        "w2": w2, "b2": b2,
        "g2": jnp.ones((out_channels,), jnp.float32),
        "be2": jnp.zeros((out_channels,), jnp.float32),
    }
    # TODO(synk): BatchNorm running-stat buffer updates (a training side effect)
    # are not materialized; only the forward output is produced.


def _reference(x_nchw, params):
    """Pure-JAX reference (lax conv + bias + training-mode BN + ReLU)."""
    def block(x, w, b, g, be):
        y = lax.conv_general_dilated(
            x, w, window_strides=(1, 1), padding=((1, 1), (1, 1)),
            dimension_numbers=("NHWC", "HWIO", "NHWC"),
            precision=lax.Precision.HIGHEST)
        y = y + b
        mean = jnp.mean(y, axis=(0, 1, 2), keepdims=True)
        var = jnp.mean((y - mean) ** 2, axis=(0, 1, 2), keepdims=True)
        y = (y - mean) * lax.rsqrt(var + EPS) * g + be
        return jnp.maximum(y, 0.0)

    x = jnp.transpose(x_nchw, (0, 2, 3, 1))
    y = block(x, params["w1"], params["b1"], params["g1"], params["be1"])
    y = block(y, params["w2"], params["b2"], params["g2"], params["be2"])
    return jnp.transpose(y, (0, 3, 1, 2))


if __name__ == "__main__":
    N, Cin, Cout, H, Wd = 2, 4, 8, 16, 16
    key = jax.random.PRNGKey(0)
    kx, kp = jax.random.split(key)
    x = jax.random.normal(kx, (N, Cin, H, Wd), jnp.float32)   # NCHW like PyTorch
    params = init_params(kp, Cin, Cout)

    ref = jax.block_until_ready(_reference(x, params))

    # Default path: VMEM-budgeted tile (full H here -> single row tile).
    out_auto = jax.block_until_ready(jax.jit(double_convolution)(x, params))
    # Forced 8-row tiles: exercises the 1-row halo windows + boundary masks.
    fwd8 = jax.jit(functools.partial(double_convolution, tile_h=8))
    out_t8 = jax.block_until_ready(fwd8(x, params))

    for out in (out_auto, out_t8):
        assert out.shape == (N, Cout, H, Wd), out.shape
        max_err = float(jnp.abs(out - ref).max())
        assert jnp.allclose(out, ref, atol=1e-4, rtol=1e-4), max_err
    print("KERNEL_OK")
</pallas_src>

<mosaic_0001>
module attributes {stable_mosaic.version = 11 : i64} {
  func.func @_conv_block_kernel(%arg0: i32, %arg1: i32, %arg2: memref<1x16x18x4xf32, #tpu.memory_space<vmem>>, %arg3: memref<1x1x18x4xf32, #tpu.memory_space<vmem>>, %arg4: memref<1x1x18x4xf32, #tpu.memory_space<vmem>>, %arg5: memref<3x12x8xf32, #tpu.memory_space<vmem>>, %arg6: memref<1x16x18x8xf32, #tpu.memory_space<vmem>>, %arg7: memref<1x1x2x8xf32, #tpu.memory_space<vmem>>, %arg8: memref<256x8xf32, #tpu.memory_space<vmem>>) attributes {dimension_semantics = [#tpu.dimension_semantics<parallel>, #tpu.dimension_semantics<parallel>], iteration_bounds = array<i64: 2, 1>, scalar_prefetch = 0 : i64, scratch_operands = 1 : i64, tpu.core_type = #tpu.core_type<tc>, window_params = [{transform_indices = @transform_0, window_bounds = array<i64: 1, 16, 18, 4>}, {transform_indices = @transform_1, window_bounds = array<i64: 1, 1, 18, 4>}, {transform_indices = @transform_2, window_bounds = array<i64: 1, 1, 18, 4>}, {pipeline_mode = #tpu.pipeline_mode<synchronous>, transform_indices = @transform_3, window_bounds = array<i64: 3, 12, 8>}, {transform_indices = @transform_4, window_bounds = array<i64: 1, 16, 18, 8>}, {transform_indices = @transform_5, window_bounds = array<i64: 1, 1, 2, 8>}]} {
    %c0 = arith.constant 0 : index
    %c0_0 = arith.constant 0 : index
    %c0_1 = arith.constant 0 : index
    %c0_2 = arith.constant 0 : index
    %0 = vector.load %arg2[%c0, %c0_0, %c0_1, %c0_2] : memref<1x16x18x4xf32, #tpu.memory_space<vmem>>, vector<1x16x18x4xf32>
    %1 = vector.shape_cast %0 : vector<1x16x18x4xf32> to vector<16x18x4xf32>
    %c0_3 = arith.constant 0 : index
    %c0_4 = arith.constant 0 : index
    %c0_5 = arith.constant 0 : index
    %c0_6 = arith.constant 0 : index
    %2 = vector.load %arg3[%c0_3, %c0_4, %c0_5, %c0_6] : memref<1x1x18x4xf32, #tpu.memory_space<vmem>>, vector<1x1x18x4xf32>
    %3 = vector.shape_cast %2 : vector<1x1x18x4xf32> to vector<1x18x4xf32>
    %c0_7 = arith.constant 0 : index
    %c0_8 = arith.constant 0 : index
    %c0_9 = arith.constant 0 : index
    %c0_10 = arith.constant 0 : index
    %4 = vector.load %arg4[%c0_7, %c0_8, %c0_9, %c0_10] : memref<1x1x18x4xf32, #tpu.memory_space<vmem>>, vector<1x1x18x4xf32>
    %5 = vector.shape_cast %4 : vector<1x1x18x4xf32> to vector<1x18x4xf32>
    %c0_i32 = arith.constant 0 : i32
    %6 = arith.cmpi sgt, %arg1, %c0_i32 : i32
    %cst = arith.constant 0.000000e+00 : f32
    %7 = vector.broadcast %cst : f32 to vector<1x18x4xf32>
    %8 = arith.select %6, %3, %7 : vector<1x18x4xf32>
    %c0_i32_11 = arith.constant 0 : i32
    %9 = arith.cmpi slt, %arg1, %c0_i32_11 : i32
    %cst_12 = arith.constant 0.000000e+00 : f32
    %10 = vector.broadcast %cst_12 : f32 to vector<1x18x4xf32>
    %11 = arith.select %9, %5, %10 : vector<1x18x4xf32>
    %12 = vector.extract_strided_slice %1 {offsets = [0, 0, 0], sizes = [16, 16, 4], strides = [1, 1, 1]} : vector<16x18x4xf32> to vector<16x16x4xf32>
    %13 = vector.extract_strided_slice %1 {offsets = [0, 1, 0], sizes = [16, 16, 4], strides = [1, 1, 1]} : vector<16x18x4xf32> to vector<16x16x4xf32>
    %14 = vector.extract_strided_slice %1 {offsets = [0, 2, 0], sizes = [16, 16, 4], strides = [1, 1, 1]} : vector<16x18x4xf32> to vector<16x16x4xf32>
    %15 = tpu.concatenate %12, %13, %14 in 2 : vector<16x16x4xf32>, vector<16x16x4xf32>, vector<16x16x4xf32> -> vector<16x16x12xf32>
    %16 = vector.shape_cast %15 : vector<16x16x12xf32> to vector<256x12xf32>
    %17 = vector.extract_strided_slice %8 {offsets = [0, 0, 0], sizes = [1, 16, 4], strides = [1, 1, 1]} : vector<1x18x4xf32> to vector<1x16x4xf32>
    %18 = vector.extract_strided_slice %8 {offsets = [0, 1, 0], sizes = [1, 16, 4], strides = [1, 1, 1]} : vector<1x18x4xf32> to vector<1x16x4xf32>
    %19 = vector.extract_strided_slice %8 {offsets = [0, 2, 0], sizes = [1, 16, 4], strides = [1, 1, 1]} : vector<1x18x4xf32> to vector<1x16x4xf32>
    %20 = tpu.concatenate %17, %18, %19 in 2 : vector<1x16x4xf32>, vector<1x16x4xf32>, vector<1x16x4xf32> -> vector<1x16x12xf32>
    %21 = vector.shape_cast %20 : vector<1x16x12xf32> to vector<16x12xf32>
    %22 = vector.extract_strided_slice %11 {offsets = [0, 0, 0], sizes = [1, 16, 4], strides = [1, 1, 1]} : vector<1x18x4xf32> to vector<1x16x4xf32>
    %23 = vector.extract_strided_slice %11 {offsets = [0, 1, 0], sizes = [1, 16, 4], strides = [1, 1, 1]} : vector<1x18x4xf32> to vector<1x16x4xf32>
    %24 = vector.extract_strided_slice %11 {offsets = [0, 2, 0], sizes = [1, 16, 4], strides = [1, 1, 1]} : vector<1x18x4xf32> to vector<1x16x4xf32>
    %25 = tpu.concatenate %22, %23, %24 in 2 : vector<1x16x4xf32>, vector<1x16x4xf32>, vector<1x16x4xf32> -> vector<1x16x12xf32>
    %26 = vector.shape_cast %25 : vector<1x16x12xf32> to vector<16x12xf32>
    %c0_13 = arith.constant 0 : index
    %c0_14 = arith.constant 0 : index
    %c0_15 = arith.constant 0 : index
    %27 = vector.load %arg5[%c0_13, %c0_14, %c0_15] : memref<3x12x8xf32, #tpu.memory_space<vmem>>, vector<1x12x8xf32>
    %28 = vector.shape_cast %27 : vector<1x12x8xf32> to vector<12x8xf32>
    %c1 = arith.constant 1 : index
    %c0_16 = arith.constant 0 : index
    %c0_17 = arith.constant 0 : index
    %29 = vector.load %arg5[%c1, %c0_16, %c0_17] : memref<3x12x8xf32, #tpu.memory_space<vmem>>, vector<1x12x8xf32>
    %30 = vector.shape_cast %29 : vector<1x12x8xf32> to vector<12x8xf32>
    %c2 = arith.constant 2 : index
    %c0_18 = arith.constant 0 : index
    %c0_19 = arith.constant 0 : index
    %31 = vector.load %arg5[%c2, %c0_18, %c0_19] : memref<3x12x8xf32, #tpu.memory_space<vmem>>, vector<1x12x8xf32>
    %32 = vector.shape_cast %31 : vector<1x12x8xf32> to vector<12x8xf32>
    %cst_20 = arith.constant dense<0.000000e+00> : vector<256x8xf32>
    %33 = tpu.matmul %16, %30, %cst_20 {dimension_numbers = #tpu.dot_dimension_numbers<[1], [0], [0], [1], [0, 0, 1, 1], [], []>} : vector<256x12xf32>, vector<12x8xf32>, vector<256x8xf32> -> vector<256x8xf32>
    %c0_21 = arith.constant 0 : index
    %c0_22 = arith.constant 0 : index
    %34 = vector.load %arg8[%c0_21, %c0_22] : memref<256x8xf32, #tpu.memory_space<vmem>>, vector<256x8xf32>
    tpu.vector_store %arg8[%c0_21, %c0_22], %33 {strides = array<i32>} : memref<256x8xf32, #tpu.memory_space<vmem>>, vector<256x8xf32>,
    %c16 = arith.constant 16 : index
    %c0_23 = arith.constant 0 : index
    %35 = vector.load %arg8[%c16, %c0_23] : memref<256x8xf32, #tpu.memory_space<vmem>>, vector<240x8xf32>
    %36 = vector.extract_strided_slice %16 {offsets = [0, 0], sizes = [240, 12], strides = [1, 1]} : vector<256x12xf32> to vector<240x12xf32>
    %cst_24 = arith.constant dense<0.000000e+00> : vector<240x8xf32>
    %37 = tpu.matmul %36, %28, %cst_24 {dimension_numbers = #tpu.dot_dimension_numbers<[1], [0], [0], [1], [0, 0, 1, 1], [], []>} : vector<240x12xf32>, vector<12x8xf32>, vector<240x8xf32> -> vector<240x8xf32>
    %38 = arith.addf %35, %37 : vector<240x8xf32>
    %c16_25 = arith.constant 16 : index
    %c0_26 = arith.constant 0 : index
    %39 = vector.load %arg8[%c16_25, %c0_26] : memref<256x8xf32, #tpu.memory_space<vmem>>, vector<240x8xf32>
    tpu.vector_store %arg8[%c16_25, %c0_26], %38 {strides = array<i32>} : memref<256x8xf32, #tpu.memory_space<vmem>>, vector<240x8xf32>,
    %c0_27 = arith.constant 0 : index
    %c0_28 = arith.constant 0 : index
    %40 = vector.load %arg8[%c0_27, %c0_28] : memref<256x8xf32, #tpu.memory_space<vmem>>, vector<16x8xf32>
    %cst_29 = arith.constant dense<0.000000e+00> : vector<16x8xf32>
    %41 = tpu.matmul %21, %28, %cst_29 {dimension_numbers = #tpu.dot_dimension_numbers<[1], [0], [0], [1], [0, 0, 1, 1], [], []>} : vector<16x12xf32>, vector<12x8xf32>, vector<16x8xf32> -> vector<16x8xf32>
    %42 = arith.addf %40, %41 : vector<16x8xf32>
    %c0_30 = arith.constant 0 : index
    %c0_31 = arith.constant 0 : index
    %43 = vector.load %arg8[%c0_30, %c0_31] : memref<256x8xf32, #tpu.memory_space<vmem>>, vector<16x8xf32>
    tpu.vector_store %arg8[%c0_30, %c0_31], %42 {strides = array<i32>} : memref<256x8xf32, #tpu.memory_space<vmem>>, vector<16x8xf32>,
    %c0_32 = arith.constant 0 : index
    %c0_33 = arith.constant 0 : index
    %44 = vector.load %arg8[%c0_32, %c0_33] : memref<256x8xf32, #tpu.memory_space<vmem>>, vector<240x8xf32>
    %45 = vector.extract_strided_slice %16 {offsets = [16, 0], sizes = [240, 12], strides = [1, 1]} : vector<256x12xf32> to vector<240x12xf32>
    %cst_34 = arith.constant dense<0.000000e+00> : vector<240x8xf32>
    %46 = tpu.matmul %45, %32, %cst_34 {dimension_numbers = #tpu.dot_dimension_numbers<[1], [0], [0], [1], [0, 0, 1, 1], [], []>} : vector<240x12xf32>, vector<12x8xf32>, vector<240x8xf32> -> vector<240x8xf32>
    %47 = arith.addf %44, %46 : vector<240x8xf32>
    %c0_35 = arith.constant 0 : index
    %c0_36 = arith.constant 0 : index
    %48 = vector.load %arg8[%c0_35, %c0_36] : memref<256x8xf32, #tpu.memory_space<vmem>>, vector<240x8xf32>
    tpu.vector_store %arg8[%c0_35, %c0_36], %47 {strides = array<i32>} : memref<256x8xf32, #tpu.memory_space<vmem>>, vector<240x8xf32>,
    %c240 = arith.constant 240 : index
    %c0_37 = arith.constant 0 : index
    %49 = vector.load %arg8[%c240, %c0_37] : memref<256x8xf32, #tpu.memory_space<vmem>>, vector<16x8xf32>
    %cst_38 = arith.constant dense<0.000000e+00> : vector<16x8xf32>
    %50 = tpu.matmul %26, %32, %cst_38 {dimension_numbers = #tpu.dot_dimension_numbers<[1], [0], [0], [1], [0, 0, 1, 1], [], []>} : vector<16x12xf32>, vector<12x8xf32>, vector<16x8xf32> -> vector<16x8xf32>
    %51 = arith.addf %49, %50 : vector<16x8xf32>
    %c240_39 = arith.constant 240 : index
    %c0_40 = arith.constant 0 : index
    %52 = vector.load %arg8[%c240_39, %c0_40] : memref<256x8xf32, #tpu.memory_space<vmem>>, vector<16x8xf32>
    tpu.vector_store %arg8[%c240_39, %c0_40], %51 {strides = array<i32>} : memref<256x8xf32, #tpu.memory_space<vmem>>, vector<16x8xf32>,
    %c0_41 = arith.constant 0 : index
    %c0_42 = arith.constant 0 : index
    %53 = vector.load %arg8[%c0_41, %c0_42] : memref<256x8xf32, #tpu.memory_space<vmem>>, vector<256x8xf32>
    %cst_43 = arith.constant dense<0.000000e+00> : vector<8xf32>
    %54 = vector.multi_reduction <add>, %53, %cst_43 [0] : vector<256x8xf32> to vector<8xf32>
    %55 = vector.shape_cast %54 : vector<8xf32> to vector<1x8xf32>
    %cst_44 = arith.constant 3.906250e-03 : f32
    %56 = vector.broadcast %cst_44 : f32 to vector<1x8xf32>
    %57 = arith.mulf %55, %56 : vector<1x8xf32>
    %58 = vector.broadcast %57 : vector<1x8xf32> to vector<256x8xf32>
    %59 = arith.subf %53, %58 : vector<256x8xf32>
    %60 = arith.mulf %59, %59 : vector<256x8xf32>
    %cst_45 = arith.constant dense<0.000000e+00> : vector<8xf32>
    %61 = vector.multi_reduction <add>, %60, %cst_45 [0] : vector<256x8xf32> to vector<8xf32>
    %62 = vector.shape_cast %61 : vector<8xf32> to vector<1x8xf32>
    %63 = tpu.concatenate %55, %62 in 0 : vector<1x8xf32>, vector<1x8xf32> -> vector<2x8xf32>
    %64 = vector.shape_cast %63 : vector<2x8xf32> to vector<1x1x2x8xf32>
    %c0_46 = arith.constant 0 : index
    %c0_47 = arith.constant 0 : index
    %c0_48 = arith.constant 0 : index
    %c0_49 = arith.constant 0 : index
    %65 = vector.load %arg7[%c0_46, %c0_47, %c0_48, %c0_49] : memref<1x1x2x8xf32, #tpu.memory_space<vmem>>, vector<1x1x2x8xf32>
    tpu.vector_store %arg7[%c0_46, %c0_47, %c0_48, %c0_49], %64 {strides = array<i32>} : memref<1x1x2x8xf32, #tpu.memory_space<vmem>>, vector<1x1x2x8xf32>,
    %66 = vector.shape_cast %53 : vector<256x8xf32> to vector<1x16x16x8xf32>
    %c0_50 = arith.constant 0 : index
    %c0_51 = arith.constant 0 : index
    %c1_52 = arith.constant 1 : index
    %c0_53 = arith.constant 0 : index
    %67 = vector.load %arg6[%c0_50, %c0_51, %c1_52, %c0_53] : memref<1x16x18x8xf32, #tpu.memory_space<vmem>>, vector<1x16x16x8xf32>
    tpu.vector_store %arg6[%c0_50, %c0_51, %c1_52, %c0_53], %66 {strides = array<i32>} : memref<1x16x18x8xf32, #tpu.memory_space<vmem>>, vector<1x16x16x8xf32>,
    %cst_54 = arith.constant 0.000000e+00 : f32
    %68 = vector.broadcast %cst_54 : f32 to vector<1x16x1x8xf32>
    %c0_55 = arith.constant 0 : index
    %c0_56 = arith.constant 0 : index
    %c0_57 = arith.constant 0 : index
    %c0_58 = arith.constant 0 : index
    %69 = vector.load %arg6[%c0_55, %c0_56, %c0_57, %c0_58] : memref<1x16x18x8xf32, #tpu.memory_space<vmem>>, vector<1x16x1x8xf32>
    tpu.vector_store %arg6[%c0_55, %c0_56, %c0_57, %c0_58], %68 {strides = array<i32>} : memref<1x16x18x8xf32, #tpu.memory_space<vmem>>, vector<1x16x1x8xf32>,
    %c0_59 = arith.constant 0 : index
    %c0_60 = arith.constant 0 : index
    %c17 = arith.constant 17 : index
    %c0_61 = arith.constant 0 : index
    %70 = vector.load %arg6[%c0_59, %c0_60, %c17, %c0_61] : memref<1x16x18x8xf32, #tpu.memory_space<vmem>>, vector<1x16x1x8xf32>
    tpu.vector_store %arg6[%c0_59, %c0_60, %c17, %c0_61], %68 {strides = array<i32>} : memref<1x16x18x8xf32, #tpu.memory_space<vmem>>, vector<1x16x1x8xf32>,
    return
  }
  func.func @transform_0(%arg0: i32, %arg1: i32) -> (i32, i32, i32, i32) {
    %c0_i32 = arith.constant 0 : i32
    %c0_i32_0 = arith.constant 0 : i32
    %c0_i32_1 = arith.constant 0 : i32
    return %arg0, %arg1, %c0_i32, %c0_i32_0 : i32, i32, i32, i32
  }
  func.func @transform_1(%arg0: i32, %arg1: i32) -> (i32, i32, i32, i32) {
    %c16_i32 = arith.constant 16 : i32
    %0 = arith.muli %arg1, %c16_i32 : i32
    %c1_i32 = arith.constant 1 : i32
    %1 = arith.subi %0, %c1_i32 : i32
    %c0_i32 = arith.constant 0 : i32
    %2 = arith.maxsi %1, %c0_i32 : i32
    %c0_i32_0 = arith.constant 0 : i32
    %c0_i32_1 = arith.constant 0 : i32
    %c0_i32_2 = arith.constant 0 : i32
    return %arg0, %2, %c0_i32_0, %c0_i32_1 : i32, i32, i32, i32
  }
  func.func @transform_2(%arg0: i32, %arg1: i32) -> (i32, i32, i32, i32) {
    %c1_i32 = arith.constant 1 : i32
    %0 = arith.addi %arg1, %c1_i32 : i32
    %c16_i32 = arith.constant 16 : i32
    %1 = arith.muli %0, %c16_i32 : i32
    %c15_i32 = arith.constant 15 : i32
    %2 = arith.minsi %1, %c15_i32 : i32
    %c0_i32 = arith.constant 0 : i32
    %c0_i32_0 = arith.constant 0 : i32
    %c0_i32_1 = arith.constant 0 : i32
    return %arg0, %2, %c0_i32, %c0_i32_0 : i32, i32, i32, i32
  }
  func.func @transform_3(%arg0: i32, %arg1: i32) -> (i32, i32, i32) {
    %c0_i32 = arith.constant 0 : i32
    %c0_i32_0 = arith.constant 0 : i32
    %c0_i32_1 = arith.constant 0 : i32
    %c0_i32_2 = arith.constant 0 : i32
    return %c0_i32, %c0_i32_0, %c0_i32_1 : i32, i32, i32
  }
  func.func @transform_4(%arg0: i32, %arg1: i32) -> (i32, i32, i32, i32) {
    %c0_i32 = arith.constant 0 : i32
    %c0_i32_0 = arith.constant 0 : i32
    %c0_i32_1 = arith.constant 0 : i32
    return %arg0, %arg1, %c0_i32, %c0_i32_0 : i32, i32, i32, i32
  }
  func.func @transform_5(%arg0: i32, %arg1: i32) -> (i32, i32, i32, i32) {
    %c0_i32 = arith.constant 0 : i32
    %c0_i32_0 = arith.constant 0 : i32
    %c0_i32_1 = arith.constant 0 : i32
    return %arg0, %arg1, %c0_i32, %c0_i32_0 : i32, i32, i32, i32
  }
}

module attributes {stable_mosaic.version = 11 : i64} {
  func.func @_conv_block_kernel(%arg0: i32, %arg1: i32, %arg2: memref<1x16x18x8xf32, #tpu.memory_space<vmem>>, %arg3: memref<1x1x18x8xf32, #tpu.memory_space<vmem>>, %arg4: memref<1x1x18x8xf32, #tpu.memory_space<vmem>>, %arg5: memref<3x24x8xf32, #tpu.memory_space<vmem>>, %arg6: memref<1x8xf32, #tpu.memory_space<vmem>>, %arg7: memref<1x8xf32, #tpu.memory_space<vmem>>, %arg8: memref<1x16x18x8xf32, #tpu.memory_space<vmem>>, %arg9: memref<1x1x2x8xf32, #tpu.memory_space<vmem>>, %arg10: memref<256x8xf32, #tpu.memory_space<vmem>>) attributes {dimension_semantics = [#tpu.dimension_semantics<parallel>, #tpu.dimension_semantics<parallel>], iteration_bounds = array<i64: 2, 1>, scalar_prefetch = 0 : i64, scratch_operands = 1 : i64, tpu.core_type = #tpu.core_type<tc>, window_params = [{transform_indices = @transform_0, window_bounds = array<i64: 1, 16, 18, 8>}, {transform_indices = @transform_1, window_bounds = array<i64: 1, 1, 18, 8>}, {transform_indices = @transform_2, window_bounds = array<i64: 1, 1, 18, 8>}, {pipeline_mode = #tpu.pipeline_mode<synchronous>, transform_indices = @transform_3, window_bounds = array<i64: 3, 24, 8>}, {pipeline_mode = #tpu.pipeline_mode<synchronous>, transform_indices = @transform_4, window_bounds = array<i64: 1, 8>}, {pipeline_mode = #tpu.pipeline_mode<synchronous>, transform_indices = @transform_5, window_bounds = array<i64: 1, 8>}, {transform_indices = @transform_6, window_bounds = array<i64: 1, 16, 18, 8>}, {transform_indices = @transform_7, window_bounds = array<i64: 1, 1, 2, 8>}]} {
    %c0 = arith.constant 0 : index
    %c0_0 = arith.constant 0 : index
    %c0_1 = arith.constant 0 : index
    %c0_2 = arith.constant 0 : index
    %0 = vector.load %arg2[%c0, %c0_0, %c0_1, %c0_2] : memref<1x16x18x8xf32, #tpu.memory_space<vmem>>, vector<1x16x18x8xf32>
    %1 = vector.shape_cast %0 : vector<1x16x18x8xf32> to vector<16x18x8xf32>
    %c0_3 = arith.constant 0 : index
    %c0_4 = arith.constant 0 : index
    %c0_5 = arith.constant 0 : index
    %c0_6 = arith.constant 0 : index
    %2 = vector.load %arg3[%c0_3, %c0_4, %c0_5, %c0_6] : memref<1x1x18x8xf32, #tpu.memory_space<vmem>>, vector<1x1x18x8xf32>
    %3 = vector.shape_cast %2 : vector<1x1x18x8xf32> to vector<1x18x8xf32>
    %c0_7 = arith.constant 0 : index
    %c0_8 = arith.constant 0 : index
    %c0_9 = arith.constant 0 : index
    %c0_10 = arith.constant 0 : index
    %4 = vector.load %arg4[%c0_7, %c0_8, %c0_9, %c0_10] : memref<1x1x18x8xf32, #tpu.memory_space<vmem>>, vector<1x1x18x8xf32>
    %5 = vector.shape_cast %4 : vector<1x1x18x8xf32> to vector<1x18x8xf32>
    %c0_11 = arith.constant 0 : index
    %c0_12 = arith.constant 0 : index
    %6 = vector.load %arg6[%c0_11, %c0_12] : memref<1x8xf32, #tpu.memory_space<vmem>>, vector<1x8xf32>
    %c0_13 = arith.constant 0 : index
    %c0_14 = arith.constant 0 : index
    %7 = vector.load %arg7[%c0_13, %c0_14] : memref<1x8xf32, #tpu.memory_space<vmem>>, vector<1x8xf32>
    %8 = tpu.iota {dimensions = array<i32: 1>} : vector<1x18x1xi32>
    %c1_i32 = arith.constant 1 : i32
    %9 = vector.broadcast %c1_i32 : i32 to vector<1x18x1xi32>
    %10 = arith.cmpi sge, %8, %9 : vector<1x18x1xi32>
    %c16_i32 = arith.constant 16 : i32
    %11 = vector.broadcast %c16_i32 : i32 to vector<1x18x1xi32>
    %12 = arith.cmpi sle, %8, %11 : vector<1x18x1xi32>
    %13 = arith.andi %10, %12 : vector<1x18x1xi1>
    %14 = vector.shape_cast %6 : vector<1x8xf32> to vector<1x1x8xf32>
    %15 = vector.broadcast %14 : vector<1x1x8xf32> to vector<16x18x8xf32>
    %16 = arith.mulf %1, %15 : vector<16x18x8xf32>
    %17 = vector.shape_cast %7 : vector<1x8xf32> to vector<1x1x8xf32>
    %18 = vector.broadcast %17 : vector<1x1x8xf32> to vector<16x18x8xf32>
    %19 = arith.addf %16, %18 : vector<16x18x8xf32>
    %cst = arith.constant 0.000000e+00 : f32
    %20 = vector.broadcast %cst : f32 to vector<16x18x8xf32>
    %21 = arith.maximumf %19, %20 : vector<16x18x8xf32>
    %cst_15 = arith.constant 0.000000e+00 : f32
    %22 = vector.shape_cast %13 : vector<1x18x1xi1> to vector<1x18x1xi1>
    %23 = vector.broadcast %22 : vector<1x18x1xi1> to vector<16x18x8xi1>
    %24 = vector.broadcast %cst_15 : f32 to vector<16x18x8xf32>
    %25 = arith.select %23, %21, %24 : vector<16x18x8xi1>, vector<16x18x8xf32>
    %26 = vector.shape_cast %6 : vector<1x8xf32> to vector<1x1x8xf32>
    %27 = vector.broadcast %26 : vector<1x1x8xf32> to vector<1x18x8xf32>
    %28 = arith.mulf %3, %27 : vector<1x18x8xf32>
    %29 = vector.shape_cast %7 : vector<1x8xf32> to vector<1x1x8xf32>
    %30 = vector.broadcast %29 : vector<1x1x8xf32> to vector<1x18x8xf32>
    %31 = arith.addf %28, %30 : vector<1x18x8xf32>
    %cst_16 = arith.constant 0.000000e+00 : f32
    %32 = vector.broadcast %cst_16 : f32 to vector<1x18x8xf32>
    %33 = arith.maximumf %31, %32 : vector<1x18x8xf32>
    %cst_17 = arith.constant 0.000000e+00 : f32
    %34 = vector.shape_cast %13 : vector<1x18x1xi1> to vector<1x18x1xi1>
    %35 = vector.broadcast %34 : vector<1x18x1xi1> to vector<1x18x8xi1>
    %36 = vector.broadcast %cst_17 : f32 to vector<1x18x8xf32>
    %37 = arith.select %35, %33, %36 : vector<1x18x8xi1>, vector<1x18x8xf32>
    %38 = vector.shape_cast %6 : vector<1x8xf32> to vector<1x1x8xf32>
    %39 = vector.broadcast %38 : vector<1x1x8xf32> to vector<1x18x8xf32>
    %40 = arith.mulf %5, %39 : vector<1x18x8xf32>
    %41 = vector.shape_cast %7 : vector<1x8xf32> to vector<1x1x8xf32>
    %42 = vector.broadcast %41 : vector<1x1x8xf32> to vector<1x18x8xf32>
    %43 = arith.addf %40, %42 : vector<1x18x8xf32>
    %cst_18 = arith.constant 0.000000e+00 : f32
    %44 = vector.broadcast %cst_18 : f32 to vector<1x18x8xf32>
    %45 = arith.maximumf %43, %44 : vector<1x18x8xf32>
    %cst_19 = arith.constant 0.000000e+00 : f32
    %46 = vector.shape_cast %13 : vector<1x18x1xi1> to vector<1x18x1xi1>
    %47 = vector.broadcast %46 : vector<1x18x1xi1> to vector<1x18x8xi1>
    %48 = vector.broadcast %cst_19 : f32 to vector<1x18x8xf32>
    %49 = arith.select %47, %45, %48 : vector<1x18x8xi1>, vector<1x18x8xf32>
    %c0_i32 = arith.constant 0 : i32
    %50 = arith.cmpi sgt, %arg1, %c0_i32 : i32
    %cst_20 = arith.constant 0.000000e+00 : f32
    %51 = vector.broadcast %cst_20 : f32 to vector<1x18x8xf32>
    %52 = arith.select %50, %37, %51 : vector<1x18x8xf32>
    %c0_i32_21 = arith.constant 0 : i32
    %53 = arith.cmpi slt, %arg1, %c0_i32_21 : i32
    %cst_22 = arith.constant 0.000000e+00 : f32
    %54 = vector.broadcast %cst_22 : f32 to vector<1x18x8xf32>
    %55 = arith.select %53, %49, %54 : vector<1x18x8xf32>
    %56 = vector.extract_strided_slice %25 {offsets = [0, 0, 0], sizes = [16, 16, 8], strides = [1, 1, 1]} : vector<16x18x8xf32> to vector<16x16x8xf32>
    %57 = vector.extract_strided_slice %25 {offsets = [0, 1, 0], sizes = [16, 16, 8], strides = [1, 1, 1]} : vector<16x18x8xf32> to vector<16x16x8xf32>
    %58 = vector.extract_strided_slice %25 {offsets = [0, 2, 0], sizes = [16, 16, 8], strides = [1, 1, 1]} : vector<16x18x8xf32> to vector<16x16x8xf32>
    %59 = tpu.concatenate %56, %57, %58 in 2 : vector<16x16x8xf32>, vector<16x16x8xf32>, vector<16x16x8xf32> -> vector<16x16x24xf32>
    %60 = vector.shape_cast %59 : vector<16x16x24xf32> to vector<256x24xf32>
    %61 = vector.extract_strided_slice %52 {offsets = [0, 0, 0], sizes = [1, 16, 8], strides = [1, 1, 1]} : vector<1x18x8xf32> to vector<1x16x8xf32>
    %62 = vector.extract_strided_slice %52 {offsets = [0, 1, 0], sizes = [1, 16, 8], strides = [1, 1, 1]} : vector<1x18x8xf32> to vector<1x16x8xf32>
    %63 = vector.extract_strided_slice %52 {offsets = [0, 2, 0], sizes = [1, 16, 8], strides = [1, 1, 1]} : vector<1x18x8xf32> to vector<1x16x8xf32>
    %64 = tpu.concatenate %61, %62, %63 in 2 : vector<1x16x8xf32>, vector<1x16x8xf32>, vector<1x16x8xf32> -> vector<1x16x24xf32>
    %65 = vector.shape_cast %64 : vector<1x16x24xf32> to vector<16x24xf32>
    %66 = vector.extract_strided_slice %55 {offsets = [0, 0, 0], sizes = [1, 16, 8], strides = [1, 1, 1]} : vector<1x18x8xf32> to vector<1x16x8xf32>
    %67 = vector.extract_strided_slice %55 {offsets = [0, 1, 0], sizes = [1, 16, 8], strides = [1, 1, 1]} : vector<1x18x8xf32> to vector<1x16x8xf32>
    %68 = vector.extract_strided_slice %55 {offsets = [0, 2, 0], sizes = [1, 16, 8], strides = [1, 1, 1]} : vector<1x18x8xf32> to vector<1x16x8xf32>
    %69 = tpu.concatenate %66, %67, %68 in 2 : vector<1x16x8xf32>, vector<1x16x8xf32>, vector<1x16x8xf32> -> vector<1x16x24xf32>
    %70 = vector.shape_cast %69 : vector<1x16x24xf32> to vector<16x24xf32>
    %c0_23 = arith.constant 0 : index
    %c0_24 = arith.constant 0 : index
    %c0_25 = arith.constant 0 : index
    %71 = vector.load %arg5[%c0_23, %c0_24, %c0_25] : memref<3x24x8xf32, #tpu.memory_space<vmem>>, vector<1x24x8xf32>
    %72 = vector.shape_cast %71 : vector<1x24x8xf32> to vector<24x8xf32>
    %c1 = arith.constant 1 : index
    %c0_26 = arith.constant 0 : index
    %c0_27 = arith.constant 0 : index
    %73 = vector.load %arg5[%c1, %c0_26, %c0_27] : memref<3x24x8xf32, #tpu.memory_space<vmem>>, vector<1x24x8xf32>
    %74 = vector.shape_cast %73 : vector<1x24x8xf32> to vector<24x8xf32>
    %c2 = arith.constant 2 : index
    %c0_28 = arith.constant 0 : index
    %c0_29 = arith.constant 0 : index
    %75 = vector.load %arg5[%c2, %c0_28, %c0_29] : memref<3x24x8xf32, #tpu.memory_space<vmem>>, vector<1x24x8xf32>
    %76 = vector.shape_cast %75 : vector<1x24x8xf32> to vector<24x8xf32>
    %cst_30 = arith.constant dense<0.000000e+00> : vector<256x8xf32>
    %77 = tpu.matmul %60, %74, %cst_30 {dimension_numbers = #tpu.dot_dimension_numbers<[1], [0], [0], [1], [0, 0, 1, 1], [], []>} : vector<256x24xf32>, vector<24x8xf32>, vector<256x8xf32> -> vector<256x8xf32>
    %c0_31 = arith.constant 0 : index
    %c0_32 = arith.constant 0 : index
    %78 = vector.load %arg10[%c0_31, %c0_32] : memref<256x8xf32, #tpu.memory_space<vmem>>, vector<256x8xf32>
    tpu.vector_store %arg10[%c0_31, %c0_32], %77 {strides = array<i32>} : memref<256x8xf32, #tpu.memory_space<vmem>>, vector<256x8xf32>,
    %c16 = arith.constant 16 : index
    %c0_33 = arith.constant 0 : index
    %79 = vector.load %arg10[%c16, %c0_33] : memref<256x8xf32, #tpu.memory_space<vmem>>, vector<240x8xf32>
    %80 = vector.extract_strided_slice %60 {offsets = [0, 0], sizes = [240, 24], strides = [1, 1]} : vector<256x24xf32> to vector<240x24xf32>
    %cst_34 = arith.constant dense<0.000000e+00> : vector<240x8xf32>
    %81 = tpu.matmul %80, %72, %cst_34 {dimension_numbers = #tpu.dot_dimension_numbers<[1], [0], [0], [1], [0, 0, 1, 1], [], []>} : vector<240x24xf32>, vector<24x8xf32>, vector<240x8xf32> -> vector<240x8xf32>
    %82 = arith.addf %79, %81 : vector<240x8xf32>
    %c16_35 = arith.constant 16 : index
    %c0_36 = arith.constant 0 : index
    %83 = vector.load %arg10[%c16_35, %c0_36] : memref<256x8xf32, #tpu.memory_space<vmem>>, vector<240x8xf32>
    tpu.vector_store %arg10[%c16_35, %c0_36], %82 {strides = array<i32>} : memref<256x8xf32, #tpu.memory_space<vmem>>, vector<240x8xf32>,
    %c0_37 = arith.constant 0 : index
    %c0_38 = arith.constant 0 : index
    %84 = vector.load %arg10[%c0_37, %c0_38] : memref<256x8xf32, #tpu.memory_space<vmem>>, vector<16x8xf32>
    %cst_39 = arith.constant dense<0.000000e+00> : vector<16x8xf32>
    %85 = tpu.matmul %65, %72, %cst_39 {dimension_numbers = #tpu.dot_dimension_numbers<[1], [0], [0], [1], [0, 0, 1, 1], [], []>} : vector<16x24xf32>, vector<24x8xf32>, vector<16x8xf32> -> vector<16x8xf32>
    %86 = arith.addf %84, %85 : vector<16x8xf32>
    %c0_40 = arith.constant 0 : index
    %c0_41 = arith.constant 0 : index
    %87 = vector.load %arg10[%c0_40, %c0_41] : memref<256x8xf32, #tpu.memory_space<vmem>>, vector<16x8xf32>
    tpu.vector_store %arg10[%c0_40, %c0_41], %86 {strides = array<i32>} : memref<256x8xf32, #tpu.memory_space<vmem>>, vector<16x8xf32>,
    %c0_42 = arith.constant 0 : index
    %c0_43 = arith.constant 0 : index
    %88 = vector.load %arg10[%c0_42, %c0_43] : memref<256x8xf32, #tpu.memory_space<vmem>>, vector<240x8xf32>
    %89 = vector.extract_strided_slice %60 {offsets = [16, 0], sizes = [240, 24], strides = [1, 1]} : vector<256x24xf32> to vector<240x24xf32>
    %cst_44 = arith.constant dense<0.000000e+00> : vector<240x8xf32>
    %90 = tpu.matmul %89, %76, %cst_44 {dimension_numbers = #tpu.dot_dimension_numbers<[1], [0], [0], [1], [0, 0, 1, 1], [], []>} : vector<240x24xf32>, vector<24x8xf32>, vector<240x8xf32> -> vector<240x8xf32>
    %91 = arith.addf %88, %90 : vector<240x8xf32>
    %c0_45 = arith.constant 0 : index
    %c0_46 = arith.constant 0 : index
    %92 = vector.load %arg10[%c0_45, %c0_46] : memref<256x8xf32, #tpu.memory_space<vmem>>, vector<240x8xf32>
    tpu.vector_store %arg10[%c0_45, %c0_46], %91 {strides = array<i32>} : memref<256x8xf32, #tpu.memory_space<vmem>>, vector<240x8xf32>,
    %c240 = arith.constant 240 : index
    %c0_47 = arith.constant 0 : index
    %93 = vector.load %arg10[%c240, %c0_47] : memref<256x8xf32, #tpu.memory_space<vmem>>, vector<16x8xf32>
    %cst_48 = arith.constant dense<0.000000e+00> : vector<16x8xf32>
    %94 = tpu.matmul %70, %76, %cst_48 {dimension_numbers = #tpu.dot_dimension_numbers<[1], [0], [0], [1], [0, 0, 1, 1], [], []>} : vector<16x24xf32>, vector<24x8xf32>, vector<16x8xf32> -> vector<16x8xf32>
    %95 = arith.addf %93, %94 : vector<16x8xf32>
    %c240_49 = arith.constant 240 : index
    %c0_50 = arith.constant 0 : index
    %96 = vector.load %arg10[%c240_49, %c0_50] : memref<256x8xf32, #tpu.memory_space<vmem>>, vector<16x8xf32>
    tpu.vector_store %arg10[%c240_49, %c0_50], %95 {strides = array<i32>} : memref<256x8xf32, #tpu.memory_space<vmem>>, vector<16x8xf32>,
    %c0_51 = arith.constant 0 : index
    %c0_52 = arith.constant 0 : index
    %97 = vector.load %arg10[%c0_51, %c0_52] : memref<256x8xf32, #tpu.memory_space<vmem>>, vector<256x8xf32>
    %cst_53 = arith.constant dense<0.000000e+00> : vector<8xf32>
    %98 = vector.multi_reduction <add>, %97, %cst_53 [0] : vector<256x8xf32> to vector<8xf32>
    %99 = vector.shape_cast %98 : vector<8xf32> to vector<1x8xf32>
    %cst_54 = arith.constant 3.906250e-03 : f32
    %100 = vector.broadcast %cst_54 : f32 to vector<1x8xf32>
    %101 = arith.mulf %99, %100 : vector<1x8xf32>
    %102 = vector.broadcast %101 : vector<1x8xf32> to vector<256x8xf32>
    %103 = arith.subf %97, %102 : vector<256x8xf32>
    %104 = arith.mulf %103, %103 : vector<256x8xf32>
    %cst_55 = arith.constant dense<0.000000e+00> : vector<8xf32>
    %105 = vector.multi_reduction <add>, %104, %cst_55 [0] : vector<256x8xf32> to vector<8xf32>
    %106 = vector.shape_cast %105 : vector<8xf32> to vector<1x8xf32>
    %107 = tpu.concatenate %99, %106 in 0 : vector<1x8xf32>, vector<1x8xf32> -> vector<2x8xf32>
    %108 = vector.shape_cast %107 : vector<2x8xf32> to vector<1x1x2x8xf32>
    %c0_56 = arith.constant 0 : index
    %c0_57 = arith.constant 0 : index
    %c0_58 = arith.constant 0 : index
    %c0_59 = arith.constant 0 : index
    %109 = vector.load %arg9[%c0_56, %c0_57, %c0_58, %c0_59] : memref<1x1x2x8xf32, #tpu.memory_space<vmem>>, vector<1x1x2x8xf32>
    tpu.vector_store %arg9[%c0_56, %c0_57, %c0_58, %c0_59], %108 {strides = array<i32>} : memref<1x1x2x8xf32, #tpu.memory_space<vmem>>, vector<1x1x2x8xf32>,
    %110 = vector.shape_cast %97 : vector<256x8xf32> to vector<1x16x16x8xf32>
    %c0_60 = arith.constant 0 : index
    %c0_61 = arith.constant 0 : index
    %c1_62 = arith.constant 1 : index
    %c0_63 = arith.constant 0 : index
    %111 = vector.load %arg8[%c0_60, %c0_61, %c1_62, %c0_63] : memref<1x16x18x8xf32, #tpu.memory_space<vmem>>, vector<1x16x16x8xf32>
    tpu.vector_store %arg8[%c0_60, %c0_61, %c1_62, %c0_63], %110 {strides = array<i32>} : memref<1x16x18x8xf32, #tpu.memory_space<vmem>>, vector<1x16x16x8xf32>,
    %cst_64 = arith.constant 0.000000e+00 : f32
    %112 = vector.broadcast %cst_64 : f32 to vector<1x16x1x8xf32>
    %c0_65 = arith.constant 0 : index
    %c0_66 = arith.constant 0 : index
    %c0_67 = arith.constant 0 : index
    %c0_68 = arith.constant 0 : index
    %113 = vector.load %arg8[%c0_65, %c0_66, %c0_67, %c0_68] : memref<1x16x18x8xf32, #tpu.memory_space<vmem>>, vector<1x16x1x8xf32>
    tpu.vector_store %arg8[%c0_65, %c0_66, %c0_67, %c0_68], %112 {strides = array<i32>} : memref<1x16x18x8xf32, #tpu.memory_space<vmem>>, vector<1x16x1x8xf32>,
    %c0_69 = arith.constant 0 : index
    %c0_70 = arith.constant 0 : index
    %c17 = arith.constant 17 : index
    %c0_71 = arith.constant 0 : index
    %114 = vector.load %arg8[%c0_69, %c0_70, %c17, %c0_71] : memref<1x16x18x8xf32, #tpu.memory_space<vmem>>, vector<1x16x1x8xf32>
    tpu.vector_store %arg8[%c0_69, %c0_70, %c17, %c0_71], %112 {strides = array<i32>} : memref<1x16x18x8xf32, #tpu.memory_space<vmem>>, vector<1x16x1x8xf32>,
    return
  }
  func.func @transform_0(%arg0: i32, %arg1: i32) -> (i32, i32, i32, i32) {
    %c0_i32 = arith.constant 0 : i32
    %c0_i32_0 = arith.constant 0 : i32
    %c0_i32_1 = arith.constant 0 : i32
    return %arg0, %arg1, %c0_i32, %c0_i32_0 : i32, i32, i32, i32
  }
  func.func @transform_1(%arg0: i32, %arg1: i32) -> (i32, i32, i32, i32) {
    %c16_i32 = arith.constant 16 : i32
    %0 = arith.muli %arg1, %c16_i32 : i32
    %c1_i32 = arith.constant 1 : i32
    %1 = arith.subi %0, %c1_i32 : i32
    %c0_i32 = arith.constant 0 : i32
    %2 = arith.maxsi %1, %c0_i32 : i32
    %c0_i32_0 = arith.constant 0 : i32
    %c0_i32_1 = arith.constant 0 : i32
    %c0_i32_2 = arith.constant 0 : i32
    return %arg0, %2, %c0_i32_0, %c0_i32_1 : i32, i32, i32, i32
  }
  func.func @transform_2(%arg0: i32, %arg1: i32) -> (i32, i32, i32, i32) {
    %c1_i32 = arith.constant 1 : i32
    %0 = arith.addi %arg1, %c1_i32 : i32
    %c16_i32 = arith.constant 16 : i32
    %1 = arith.muli %0, %c16_i32 : i32
    %c15_i32 = arith.constant 15 : i32
    %2 = arith.minsi %1, %c15_i32 : i32
    %c0_i32 = arith.constant 0 : i32
    %c0_i32_0 = arith.constant 0 : i32
    %c0_i32_1 = arith.constant 0 : i32
    return %arg0, %2, %c0_i32, %c0_i32_0 : i32, i32, i32, i32
  }
  func.func @transform_3(%arg0: i32, %arg1: i32) -> (i32, i32, i32) {
    %c0_i32 = arith.constant 0 : i32
    %c0_i32_0 = arith.constant 0 : i32
    %c0_i32_1 = arith.constant 0 : i32
    %c0_i32_2 = arith.constant 0 : i32
    return %c0_i32, %c0_i32_0, %c0_i32_1 : i32, i32, i32
  }
  func.func @transform_4(%arg0: i32, %arg1: i32) -> (i32, i32) {
    %c0_i32 = arith.constant 0 : i32
    %c0_i32_0 = arith.constant 0 : i32
    %c0_i32_1 = arith.constant 0 : i32
    return %c0_i32, %c0_i32_0 : i32, i32
  }
  func.func @transform_5(%arg0: i32, %arg1: i32) -> (i32, i32) {
    %c0_i32 = arith.constant 0 : i32
    %c0_i32_0 = arith.constant 0 : i32
    %c0_i32_1 = arith.constant 0 : i32
    return %c0_i32, %c0_i32_0 : i32, i32
  }
  func.func @transform_6(%arg0: i32, %arg1: i32) -> (i32, i32, i32, i32) {
    %c0_i32 = arith.constant 0 : i32
    %c0_i32_0 = arith.constant 0 : i32
    %c0_i32_1 = arith.constant 0 : i32
    return %arg0, %arg1, %c0_i32, %c0_i32_0 : i32, i32, i32, i32
  }
  func.func @transform_7(%arg0: i32, %arg1: i32) -> (i32, i32, i32, i32) {
    %c0_i32 = arith.constant 0 : i32
    %c0_i32_0 = arith.constant 0 : i32
    %c0_i32_1 = arith.constant 0 : i32
    return %arg0, %arg1, %c0_i32, %c0_i32_0 : i32, i32, i32, i32
  }
}

module attributes {stable_mosaic.version = 11 : i64} {
  func.func @_affine_relu_kernel(%arg0: i32, %arg1: memref<32x18x8xf32, #tpu.memory_space<vmem>>, %arg2: memref<1x8xf32, #tpu.memory_space<vmem>>, %arg3: memref<1x8xf32, #tpu.memory_space<vmem>>, %arg4: memref<32x16x8xf32, #tpu.memory_space<vmem>>) attributes {dimension_semantics = [#tpu.dimension_semantics<parallel>], iteration_bounds = array<i64: 1>, scalar_prefetch = 0 : i64, scratch_operands = 0 : i64, tpu.core_type = #tpu.core_type<tc>, window_params = [{transform_indices = @transform_0, window_bounds = array<i64: 32, 18, 8>}, {pipeline_mode = #tpu.pipeline_mode<synchronous>, transform_indices = @transform_1, window_bounds = array<i64: 1, 8>}, {pipeline_mode = #tpu.pipeline_mode<synchronous>, transform_indices = @transform_2, window_bounds = array<i64: 1, 8>}, {transform_indices = @transform_3, window_bounds = array<i64: 32, 16, 8>}]} {
    %c0 = arith.constant 0 : index
    %c1 = arith.constant 1 : index
    %c0_0 = arith.constant 0 : index
    %0 = vector.load %arg1[%c0, %c1, %c0_0] : memref<32x18x8xf32, #tpu.memory_space<vmem>>, vector<32x16x8xf32>
    %c0_1 = arith.constant 0 : index
    %c0_2 = arith.constant 0 : index
    %1 = vector.load %arg2[%c0_1, %c0_2] : memref<1x8xf32, #tpu.memory_space<vmem>>, vector<1x8xf32>
    %2 = vector.shape_cast %1 : vector<1x8xf32> to vector<1x1x8xf32>
    %3 = vector.broadcast %2 : vector<1x1x8xf32> to vector<32x16x8xf32>
    %4 = arith.mulf %0, %3 : vector<32x16x8xf32>
    %c0_3 = arith.constant 0 : index
    %c0_4 = arith.constant 0 : index
    %5 = vector.load %arg3[%c0_3, %c0_4] : memref<1x8xf32, #tpu.memory_space<vmem>>, vector<1x8xf32>
    %6 = vector.shape_cast %5 : vector<1x8xf32> to vector<1x1x8xf32>
    %7 = vector.broadcast %6 : vector<1x1x8xf32> to vector<32x16x8xf32>
    %8 = arith.addf %4, %7 : vector<32x16x8xf32>
    %cst = arith.constant 0.000000e+00 : f32
    %9 = vector.broadcast %cst : f32 to vector<32x16x8xf32>
    %10 = arith.maximumf %8, %9 : vector<32x16x8xf32>
    %c0_5 = arith.constant 0 : index
    %c0_6 = arith.constant 0 : index
    %c0_7 = arith.constant 0 : index
    %11 = vector.load %arg4[%c0_5, %c0_6, %c0_7] : memref<32x16x8xf32, #tpu.memory_space<vmem>>, vector<32x16x8xf32>
    tpu.vector_store %arg4[%c0_5, %c0_6, %c0_7], %10 {strides = array<i32>} : memref<32x16x8xf32, #tpu.memory_space<vmem>>, vector<32x16x8xf32>,
    return
  }
  func.func @transform_0(%arg0: i32) -> (i32, i32, i32) {
    %c0_i32 = arith.constant 0 : i32
    %c0_i32_0 = arith.constant 0 : i32
    %c0_i32_1 = arith.constant 0 : i32
    return %arg0, %c0_i32, %c0_i32_0 : i32, i32, i32
  }
  func.func @transform_1(%arg0: i32) -> (i32, i32) {
    %c0_i32 = arith.constant 0 : i32
    %c0_i32_0 = arith.constant 0 : i32
    %c0_i32_1 = arith.constant 0 : i32
    return %c0_i32, %c0_i32_0 : i32, i32
  }
  func.func @transform_2(%arg0: i32) -> (i32, i32) {
    %c0_i32 = arith.constant 0 : i32
    %c0_i32_0 = arith.constant 0 : i32
    %c0_i32_1 = arith.constant 0 : i32
    return %c0_i32, %c0_i32_0 : i32, i32
  }
  func.func @transform_3(%arg0: i32) -> (i32, i32, i32) {
    %c0_i32 = arith.constant 0 : i32
    %c0_i32_0 = arith.constant 0 : i32
    %c0_i32_1 = arith.constant 0 : i32
    return %arg0, %c0_i32, %c0_i32_0 : i32, i32, i32
  }
}

</mosaic_0001>

<bundles_post_ra>
// kernel: double_convolution.5
= control target key start
LH: loop header
LB: loop body
LE: loop exit
PB: predicated region body
PF: predicated region fallthrough
CT: control target
= control target key end

     0   :  { %vm278_vm0 = vcmask 64512   ;;  %s958_s0 = inlined_call_operand.vmem [shape: f32[32,18,8], index: 0, kind: input, shape index: {}]   ;;  %s959_s1 = inlined_call_operand.vmem [shape: f32[1,8], index: 1, kind: input, shape index: {}]   ;;  %s960_s2 = inlined_call_operand.vmem [shape: f32[1,8], index: 2, kind: input, shape index: {}]   ;;  %s961_s3 = inlined_call_operand.vmem [shape: f32[32,16,8], index: 3, kind: output, shape index: {}]  }
   0x1   :  { %v14_v0 = vld [vmem:[%s958_s0 + $0x1] sm:$0xff]  ;;  %v375_v1 = vld [vmem:[%s959_s1] ss:$0 sm:$0xff]  ;;  %v15_v3 = vld [vmem:[%s958_s0 + $0x9] sm:$0xff] }
   0x2   :  { %v380_v2 = vld [vmem:[%s960_s2] ss:$0 sm:$0xff]  ;;  %v82_v4 = vmul.f32 %v375_v1, %v14_v0  ;;  %v83_v5 = vmul.f32 %v375_v1, %v15_v3  ;;  %v17_v7 = vld [vmem:[%s958_s0 + $0x21] sm:$0xff]  ;;  %v18_v8 = vld [vmem:[%s958_s0 + $0x31] sm:$0xff] }
   0x3   :  { %v16_v6 = vld [vmem:[%s958_s0 + $0x19] sm:$0xff]  ;;  %v85_v10 = vmul.f32 %v375_v1, %v17_v7  ;;  %v86_v11 = vmul.f32 %v375_v1, %v18_v8  ;;  %v20_v13 = vld [vmem:[%s958_s0 + $0x49] sm:$0xff]  ;;  %v21_v14 = vld [vmem:[%s958_s0 + $0x51] sm:$0xff] }
   0x4   :  { %v84_v9 = vmul.f32 %v375_v1, %v16_v6  ;;  %v19_v12 = vld [vmem:[%s958_s0 + $0x39] sm:$0xff]  ;;  %v150_v15 = vadd.f32 %v380_v2, %v82_v4  ;;  %v151_v16 = vadd.f32 %v380_v2, %v83_v5  ;;  %v88_v18 = vmul.f32 %v375_v1, %v20_v13  ;;  %v22_v23 = vld [vmem:[%s958_s0 + $0x61] sm:$0xff]  ;;  %v23_v24 = vld [vmem:[%s958_s0 + $0x69] sm:$0xff] }
   0x5   :  { %v87_v17 = vmul.f32 %v375_v1, %v19_v12  ;;  %v153_v20 = vadd.f32 %v380_v2, %v85_v10  ;;  %v154_v21 = vadd.f32 %v380_v2, %v86_v11  ;;  %v89_v22 = vmul.f32 %v375_v1, %v21_v14  ;;  %v24_v29 = vld [vmem:[%s958_s0 + $0x79] sm:$0xff]  ;;  %v25_v30 = vld [vmem:[%s958_s0 + $0x81] sm:$0xff]  ;;  %v26_v31 = vld [vmem:[%s958_s0 + $0x91] sm:$0xff] }
   0x6   :  { %v152_v19 = vadd.f32 %v380_v2, %v84_v9  ;;  %v214_v25 = vmax.f32 %v150_v15, 0.0  ;;  %v215_v26 = vmax.f32 %v151_v16, 0.0  ;;  %v156_v28 = vadd.f32 %v380_v2, %v88_v18  ;;  %v27_v35 = vld [vmem:[%s958_s0 + $0x99] sm:$0xff]  ;;  %v28_v36 = vld [vmem:[%s958_s0 + $0xa9] sm:$0xff]  ;;  %v29_v41 = vld [vmem:[%s958_s0 + $0xb1] sm:$0xff] }
   0x7   :  { %v155_v27 = vadd.f32 %v380_v2, %v87_v17  ;;  %v217_v33 = vmax.f32 %v153_v20, 0.0  ;;  %v157_v34 = vadd.f32 %v380_v2, %v89_v22  ;;  %v218_v37 = vmax.f32 %v154_v21, 0.0  ;;  %v30_v54 = vld [vmem:[%s958_s0 + $0xc1] sm:$0xff]  ;;  %v31_v55 = vld [vmem:[%s958_s0 + $0xc9] sm:$0xff]  ;;  %v32_v58 = vld [vmem:[%s958_s0 + $0xd9] sm:$0xff] }
   0x8   :  { %v216_v32 = vmax.f32 %v152_v19, 0.0  ;;  %279 = vst.msk [vmem:[%s961_s3] sm:$0xff] %vm278_vm0, %v214_v25  ;;  %v90_v39 = vmul.f32 %v375_v1, %v22_v23  ;;  %v91_v40 = vmul.f32 %v375_v1, %v23_v24  ;;  %v220_v42 = vmax.f32 %v156_v28, 0.0  ;;  %v33_v59 = vld [vmem:[%s958_s0 + $0xe1] sm:$0xff]  ;;  %v34_v62 = vld [vmem:[%s958_s0 + $0xf1] sm:$0xff]  ;;  %v35_v5 = vld [vmem:[%s958_s0 + $0xf9] sm:$0xff] }
   0x9   :  { %v219_v38 = vmax.f32 %v155_v27, 0.0  ;;  %280 = vst.msk [vmem:[%s961_s3 + $0x8] sm:$0xff] %vm278_vm0, %v215_v26  ;;  %v92_v43 = vmul.f32 %v375_v1, %v24_v29  ;;  %v93_v44 = vmul.f32 %v375_v1, %v25_v30  ;;  %v94_v45 = vmul.f32 %v375_v1, %v26_v31  ;;  %v36_v10 = vld [vmem:[%s958_s0 + $0x109] sm:$0xff]  ;;  %v37_v14 = vld [vmem:[%s958_s0 + $0x111] sm:$0xff]  ;;  %v38_v18 = vld [vmem:[%s958_s0 + $0x121] sm:$0xff] }
   0xa   :  { %281 = vst.msk [vmem:[%s961_s3 + $0x10] sm:$0xff] %vm278_vm0, %v216_v32  ;;  %v158_v46 = vadd.f32 %v380_v2, %v90_v39  ;;  %v159_v47 = vadd.f32 %v380_v2, %v91_v40  ;;  %v95_v48 = vmul.f32 %v375_v1, %v27_v35  ;;  %v96_v49 = vmul.f32 %v375_v1, %v28_v36  ;;  %v39_v22 = vld [vmem:[%s958_s0 + $0x129] sm:$0xff]  ;;  %v40_v26 = vld [vmem:[%s958_s0 + $0x139] sm:$0xff]  ;;  %v41_v30 = vld [vmem:[%s958_s0 + $0x141] sm:$0xff] }
   0xb   :  { %282 = vst.msk [vmem:[%s961_s3 + $0x18] sm:$0xff] %vm278_vm0, %v217_v33  ;;  %v221_v50 = vmax.f32 %v157_v34, 0.0  ;;  %v160_v51 = vadd.f32 %v380_v2, %v92_v43  ;;  %v161_v52 = vadd.f32 %v380_v2, %v93_v44  ;;  %v97_v53 = vmul.f32 %v375_v1, %v29_v41  ;;  %v42_v34 = vld [vmem:[%s958_s0 + $0x151] sm:$0xff] }
   0xc   :  { %283 = vst.msk [vmem:[%s961_s3 + $0x20] sm:$0xff] %vm278_vm0, %v218_v37  ;;  %v222_v56 = vmax.f32 %v158_v46, 0.0  ;;  %v162_v57 = vadd.f32 %v380_v2, %v94_v45  ;;  %v223_v60 = vmax.f32 %v159_v47, 0.0  ;;  %v163_v61 = vadd.f32 %v380_v2, %v95_v48  ;;  %v45_v46 = vld [vmem:[%s958_s0 + $0x171] sm:$0xff] }
   0xd   :  { %284 = vst.msk [vmem:[%s961_s3 + $0x28] sm:$0xff] %vm278_vm0, %v219_v38  ;;  %v224_v63 = vmax.f32 %v160_v51, 0.0  ;;  %v164_v0 = vadd.f32 %v380_v2, %v96_v49  ;;  %v98_v3 = vmul.f32 %v375_v1, %v30_v54  ;;  %v99_v4 = vmul.f32 %v375_v1, %v31_v55  ;;  %v43_v38 = vld [vmem:[%s958_s0 + $0x159] sm:$0xff]  ;;  %v47_v54 = vld [vmem:[%s958_s0 + $0x189] sm:$0xff] }
   0xe   :  { %285 = vst.msk [vmem:[%s961_s3 + $0x30] sm:$0xff] %vm278_vm0, %v220_v42  ;;  %v225_v6 = vmax.f32 %v161_v52, 0.0  ;;  %v165_v7 = vadd.f32 %v380_v2, %v97_v53  ;;  %v100_v8 = vmul.f32 %v375_v1, %v32_v58  ;;  %v101_v9 = vmul.f32 %v375_v1, %v33_v59  ;;  %v44_v42 = vld [vmem:[%s958_s0 + $0x169] sm:$0xff]  ;;  %v48_v58 = vld [vmem:[%s958_s0 + $0x199] sm:$0xff] }
   0xf   :  { %286 = vst.msk [vmem:[%s961_s3 + $0x38] sm:$0xff] %vm278_vm0, %v221_v50  ;;  %v226_v11 = vmax.f32 %v162_v57, 0.0  ;;  %v166_v12 = vadd.f32 %v380_v2, %v98_v3  ;;  %v102_v13 = vmul.f32 %v375_v1, %v34_v62  ;;  %v227_v15 = vmax.f32 %v163_v61, 0.0  ;;  %v46_v50 = vld [vmem:[%s958_s0 + $0x181] sm:$0xff] }
  0x10   :  { %287 = vst.msk [vmem:[%s961_s3 + $0x40] sm:$0xff] %vm278_vm0, %v222_v56  ;;  %v167_v16 = vadd.f32 %v380_v2, %v99_v4  ;;  %v103_v17 = vmul.f32 %v375_v1, %v35_v5  ;;  %v228_v19 = vmax.f32 %v164_v0, 0.0  ;;  %v168_v20 = vadd.f32 %v380_v2, %v100_v8  ;;  %v49_v62 = vld [vmem:[%s958_s0 + $0x1a1] sm:$0xff]  ;;  %v50_v4 = vld [vmem:[%s958_s0 + $0x1b1] sm:$0xff]  ;;  %v51_v8 = vld [vmem:[%s958_s0 + $0x1b9] sm:$0xff] }
  0x11   :  { %288 = vst.msk [vmem:[%s961_s3 + $0x48] sm:$0xff] %vm278_vm0, %v223_v60  ;;  %v104_v21 = vmul.f32 %v375_v1, %v36_v10  ;;  %v229_v23 = vmax.f32 %v165_v7, 0.0  ;;  %v169_v24 = vadd.f32 %v380_v2, %v101_v9  ;;  %v105_v25 = vmul.f32 %v375_v1, %v37_v14 }
  0x12   :  { %289 = vst.msk [vmem:[%s961_s3 + $0x50] sm:$0xff] %vm278_vm0, %v224_v63  ;;  %v230_v27 = vmax.f32 %v166_v12, 0.0  ;;  %v170_v28 = vadd.f32 %v380_v2, %v102_v13  ;;  %v106_v29 = vmul.f32 %v375_v1, %v38_v18  ;;  %v231_v31 = vmax.f32 %v167_v16, 0.0  ;;  %v52_v12 = vld [vmem:[%s958_s0 + $0x1c9] sm:$0xff]  ;;  %v53_v16 = vld [vmem:[%s958_s0 + $0x1d1] sm:$0xff] }
  0x13   :  { %290 = vst.msk [vmem:[%s961_s3 + $0x58] sm:$0xff] %vm278_vm0, %v225_v6  ;;  %v171_v32 = vadd.f32 %v380_v2, %v103_v17  ;;  %v107_v33 = vmul.f32 %v375_v1, %v39_v22  ;;  %v232_v35 = vmax.f32 %v168_v20, 0.0  ;;  %v172_v36 = vadd.f32 %v380_v2, %v104_v21  ;;  %v54_v20 = vld [vmem:[%s958_s0 + $0x1e1] sm:$0xff] }
  0x14   :  { %291 = vst.msk [vmem:[%s961_s3 + $0x60] sm:$0xff] %vm278_vm0, %v226_v11  ;;  %v108_v37 = vmul.f32 %v375_v1, %v40_v26  ;;  %v233_v39 = vmax.f32 %v169_v24, 0.0  ;;  %v173_v40 = vadd.f32 %v380_v2, %v105_v25  ;;  %v109_v41 = vmul.f32 %v375_v1, %v41_v30  ;;  %v55_v24 = vld [vmem:[%s958_s0 + $0x1e9] sm:$0xff] }
  0x15   :  { %292 = vst.msk [vmem:[%s961_s3 + $0x68] sm:$0xff] %vm278_vm0, %v227_v15  ;;  %v234_v43 = vmax.f32 %v170_v28, 0.0  ;;  %v174_v44 = vadd.f32 %v380_v2, %v106_v29  ;;  %v110_v45 = vmul.f32 %v375_v1, %v42_v34  ;;  %v235_v47 = vmax.f32 %v171_v32, 0.0  ;;  %v56_v28 = vld [vmem:[%s958_s0 + $0x1f9] sm:$0xff]  ;;  %v57_v32 = vld [vmem:[%s958_s0 + $0x201] sm:$0xff] }
  0x16   :  { %293 = vst.msk [vmem:[%s961_s3 + $0x70] sm:$0xff] %vm278_vm0, %v228_v19  ;;  %v175_v48 = vadd.f32 %v380_v2, %v107_v33  ;;  %v111_v49 = vmul.f32 %v375_v1, %v43_v38  ;;  %v236_v51 = vmax.f32 %v172_v36, 0.0  ;;  %v176_v52 = vadd.f32 %v380_v2, %v108_v37  ;;  %v58_v36 = vld [vmem:[%s958_s0 + $0x211] sm:$0xff] }
  0x17   :  { %294 = vst.msk [vmem:[%s961_s3 + $0x78] sm:$0xff] %vm278_vm0, %v229_v23  ;;  %v112_v53 = vmul.f32 %v375_v1, %v44_v42  ;;  %v237_v55 = vmax.f32 %v173_v40, 0.0  ;;  %v177_v56 = vadd.f32 %v380_v2, %v109_v41  ;;  %v113_v57 = vmul.f32 %v375_v1, %v45_v46  ;;  %v59_v40 = vld [vmem:[%s958_s0 + $0x219] sm:$0xff] }
  0x18   :  { %295 = vst.msk [vmem:[%s961_s3 + $0x80] sm:$0xff] %vm278_vm0, %v230_v27  ;;  %v238_v59 = vmax.f32 %v174_v44, 0.0  ;;  %v178_v60 = vadd.f32 %v380_v2, %v110_v45  ;;  %v114_v61 = vmul.f32 %v375_v1, %v46_v50  ;;  %v239_v63 = vmax.f32 %v175_v48, 0.0  ;;  %v60_v44 = vld [vmem:[%s958_s0 + $0x229] sm:$0xff]  ;;  %v61_v48 = vld [vmem:[%s958_s0 + $0x231] sm:$0xff] }
  0x19   :  { %296 = vst.msk [vmem:[%s961_s3 + $0x88] sm:$0xff] %vm278_vm0, %v231_v31  ;;  %v179_v0 = vadd.f32 %v380_v2, %v111_v49  ;;  %v115_v3 = vmul.f32 %v375_v1, %v47_v54  ;;  %v240_v5 = vmax.f32 %v176_v52, 0.0  ;;  %v180_v6 = vadd.f32 %v380_v2, %v112_v53  ;;  %v62_v52 = vld [vmem:[%s958_s0 + $0x241] sm:$0xff] }
  0x1a   :  { %297 = vst.msk [vmem:[%s961_s3 + $0x90] sm:$0xff] %vm278_vm0, %v232_v35  ;;  %v116_v7 = vmul.f32 %v375_v1, %v48_v58  ;;  %v241_v9 = vmax.f32 %v177_v56, 0.0  ;;  %v181_v10 = vadd.f32 %v380_v2, %v113_v57  ;;  %v117_v11 = vmul.f32 %v375_v1, %v49_v62  ;;  %v63_v56 = vld [vmem:[%s958_s0 + $0x249] sm:$0xff] }
  0x1b   :  { %298 = vst.msk [vmem:[%s961_s3 + $0x98] sm:$0xff] %vm278_vm0, %v233_v39  ;;  %v242_v13 = vmax.f32 %v178_v60, 0.0  ;;  %v182_v14 = vadd.f32 %v380_v2, %v114_v61  ;;  %v118_v15 = vmul.f32 %v375_v1, %v50_v4  ;;  %v243_v17 = vmax.f32 %v179_v0, 0.0  ;;  %v64_v60 = vld [vmem:[%s958_s0 + $0x259] sm:$0xff]  ;;  %v65_v0 = vld [vmem:[%s958_s0 + $0x261] sm:$0xff] }
  0x1c   :  { %299 = vst.msk [vmem:[%s961_s3 + $0xa0] sm:$0xff] %vm278_vm0, %v234_v43  ;;  %v183_v18 = vadd.f32 %v380_v2, %v115_v3  ;;  %v119_v19 = vmul.f32 %v375_v1, %v51_v8  ;;  %v244_v21 = vmax.f32 %v180_v6, 0.0  ;;  %v184_v22 = vadd.f32 %v380_v2, %v116_v7  ;;  %v77_v3 = vld [vmem:[%s958_s0 + $0x2f1] sm:$0xff] }
  0x1d   :  { %300 = vst.msk [vmem:[%s961_s3 + $0xa8] sm:$0xff] %vm278_vm0, %v235_v47  ;;  %v120_v23 = vmul.f32 %v375_v1, %v52_v12  ;;  %v245_v25 = vmax.f32 %v181_v10, 0.0  ;;  %v185_v26 = vadd.f32 %v380_v2, %v117_v11  ;;  %v121_v27 = vmul.f32 %v375_v1, %v53_v16  ;;  %v66_v7 = vld [vmem:[%s958_s0 + $0x271] sm:$0xff]  ;;  %v67_v11 = vld [vmem:[%s958_s0 + $0x279] sm:$0xff] }
  0x1e   :  { %301 = vst.msk [vmem:[%s961_s3 + $0xb0] sm:$0xff] %vm278_vm0, %v236_v51  ;;  %v246_v29 = vmax.f32 %v182_v14, 0.0  ;;  %v186_v30 = vadd.f32 %v380_v2, %v118_v15  ;;  %v122_v31 = vmul.f32 %v375_v1, %v54_v20  ;;  %v247_v33 = vmax.f32 %v183_v18, 0.0  ;;  %v68_v15 = vld [vmem:[%s958_s0 + $0x289] sm:$0xff]  ;;  %v69_v20 = vld [vmem:[%s958_s0 + $0x291] sm:$0xff] }
  0x1f   :  { %302 = vst.msk [vmem:[%s961_s3 + $0xb8] sm:$0xff] %vm278_vm0, %v237_v55  ;;  %v187_v34 = vadd.f32 %v380_v2, %v119_v19  ;;  %v123_v35 = vmul.f32 %v375_v1, %v55_v24  ;;  %v248_v37 = vmax.f32 %v184_v22, 0.0  ;;  %v188_v38 = vadd.f32 %v380_v2, %v120_v23  ;;  %v70_v24 = vld [vmem:[%s958_s0 + $0x2a1] sm:$0xff] }
  0x20   :  { %303 = vst.msk [vmem:[%s961_s3 + $0xc0] sm:$0xff] %vm278_vm0, %v238_v59  ;;  %v124_v39 = vmul.f32 %v375_v1, %v56_v28  ;;  %v249_v41 = vmax.f32 %v185_v26, 0.0  ;;  %v189_v42 = vadd.f32 %v380_v2, %v121_v27  ;;  %v125_v43 = vmul.f32 %v375_v1, %v57_v32 }
  0x21   :  { %304 = vst.msk [vmem:[%s961_s3 + $0xc8] sm:$0xff] %vm278_vm0, %v239_v63  ;;  %v250_v45 = vmax.f32 %v186_v30, 0.0  ;;  %v190_v46 = vadd.f32 %v380_v2, %v122_v31  ;;  %v126_v47 = vmul.f32 %v375_v1, %v58_v36  ;;  %v251_v49 = vmax.f32 %v187_v34, 0.0 }
  0x22   :  { %305 = vst.msk [vmem:[%s961_s3 + $0xd0] sm:$0xff] %vm278_vm0, %v240_v5  ;;  %v191_v50 = vadd.f32 %v380_v2, %v123_v35  ;;  %v127_v51 = vmul.f32 %v375_v1, %v59_v40  ;;  %v252_v53 = vmax.f32 %v188_v38, 0.0  ;;  %v192_v54 = vadd.f32 %v380_v2, %v124_v39 }
  0x23   :  { %306 = vst.msk [vmem:[%s961_s3 + $0xd8] sm:$0xff] %vm278_vm0, %v241_v9  ;;  %v128_v55 = vmul.f32 %v375_v1, %v60_v44  ;;  %v253_v57 = vmax.f32 %v189_v42, 0.0  ;;  %v193_v58 = vadd.f32 %v380_v2, %v125_v43  ;;  %v129_v59 = vmul.f32 %v375_v1, %v61_v48 }
  0x24   :  { %307 = vst.msk [vmem:[%s961_s3 + $0xe0] sm:$0xff] %vm278_vm0, %v242_v13  ;;  %v254_v61 = vmax.f32 %v190_v46, 0.0  ;;  %v194_v62 = vadd.f32 %v380_v2, %v126_v47  ;;  %v130_v63 = vmul.f32 %v375_v1, %v62_v52  ;;  %v255_v4 = vmax.f32 %v191_v50, 0.0 }
  0x25   :  { %308 = vst.msk [vmem:[%s961_s3 + $0xe8] sm:$0xff] %vm278_vm0, %v243_v17  ;;  %v195_v5 = vadd.f32 %v380_v2, %v127_v51  ;;  %v131_v6 = vmul.f32 %v375_v1, %v63_v56  ;;  %v256_v8 = vmax.f32 %v192_v54, 0.0  ;;  %v196_v9 = vadd.f32 %v380_v2, %v128_v55 }
  0x26   :  { %309 = vst.msk [vmem:[%s961_s3 + $0xf0] sm:$0xff] %vm278_vm0, %v244_v21  ;;  %v132_v10 = vmul.f32 %v375_v1, %v64_v60  ;;  %v257_v12 = vmax.f32 %v193_v58, 0.0  ;;  %v197_v13 = vadd.f32 %v380_v2, %v129_v59  ;;  %v133_v14 = vmul.f32 %v375_v1, %v65_v0 }
  0x27   :  { %310 = vst.msk [vmem:[%s961_s3 + $0xf8] sm:$0xff] %vm278_vm0, %v245_v25  ;;  %v145_v16 = vmul.f32 %v375_v1, %v77_v3  ;;  %v258_v17 = vmax.f32 %v194_v62, 0.0  ;;  %v198_v18 = vadd.f32 %v380_v2, %v130_v63  ;;  %v134_v19 = vmul.f32 %v375_v1, %v66_v7 }
  0x28   :  { %311 = vst.msk [vmem:[%s961_s3 + $0x100] sm:$0xff] %vm278_vm0, %v246_v29  ;;  %v259_v21 = vmax.f32 %v195_v5, 0.0  ;;  %v199_v22 = vadd.f32 %v380_v2, %v131_v6  ;;  %v135_v23 = vmul.f32 %v375_v1, %v67_v11  ;;  %v260_v26 = vmax.f32 %v196_v9, 0.0  ;;  %v71_v29 = vld [vmem:[%s958_s0 + $0x2a9] sm:$0xff] }
  0x29   :  { %312 = vst.msk [vmem:[%s961_s3 + $0x108] sm:$0xff] %vm278_vm0, %v247_v33  ;;  %v827_v25 = vadd.f32 %v380_v2, %v145_v16  ;;  %v200_v27 = vadd.f32 %v380_v2, %v132_v10  ;;  %v136_v28 = vmul.f32 %v375_v1, %v68_v15  ;;  %v261_v30 = vmax.f32 %v197_v13, 0.0  ;;  %v72_v33 = vld [vmem:[%s958_s0 + $0x2b9] sm:$0xff] }
  0x2a   :  { %313 = vst.msk [vmem:[%s961_s3 + $0x110] sm:$0xff] %vm278_vm0, %v248_v37  ;;  %v201_v31 = vadd.f32 %v380_v2, %v133_v14  ;;  %v137_v32 = vmul.f32 %v375_v1, %v69_v20  ;;  %v262_v34 = vmax.f32 %v198_v18, 0.0  ;;  %v202_v35 = vadd.f32 %v380_v2, %v134_v19  ;;  %v73_v37 = vld [vmem:[%s958_s0 + $0x2c1] sm:$0xff] }
  0x2b   :  { %314 = vst.msk [vmem:[%s961_s3 + $0x118] sm:$0xff] %vm278_vm0, %v249_v41  ;;  %v138_v36 = vmul.f32 %v375_v1, %v70_v24  ;;  %v263_v38 = vmax.f32 %v199_v22, 0.0  ;;  %v203_v39 = vadd.f32 %v380_v2, %v135_v23  ;;  %v139_v40 = vmul.f32 %v375_v1, %v71_v29  ;;  %v74_v41 = vld [vmem:[%s958_s0 + $0x2d1] sm:$0xff] }
  0x2c   :  { %315 = vst.msk [vmem:[%s961_s3 + $0x120] sm:$0xff] %vm278_vm0, %v250_v45  ;;  %v264_v42 = vmax.f32 %v200_v27, 0.0  ;;  %v204_v43 = vadd.f32 %v380_v2, %v136_v28  ;;  %v140_v44 = vmul.f32 %v375_v1, %v72_v33  ;;  %v75_v45 = vld [vmem:[%s958_s0 + $0x2d9] sm:$0xff]  ;;  %v265_v46 = vmax.f32 %v201_v31, 0.0 }
  0x2d   :  { %316 = vst.msk [vmem:[%s961_s3 + $0x128] sm:$0xff] %vm278_vm0, %v251_v49  ;;  %v205_v47 = vadd.f32 %v380_v2, %v137_v32  ;;  %v141_v48 = vmul.f32 %v375_v1, %v73_v37  ;;  %v76_v49 = vld [vmem:[%s958_s0 + $0x2e9] sm:$0xff]  ;;  %v266_v50 = vmax.f32 %v202_v35, 0.0  ;;  %v206_v51 = vadd.f32 %v380_v2, %v138_v36 }
  0x2e   :  { %317 = vst.msk [vmem:[%s961_s3 + $0x130] sm:$0xff] %vm278_vm0, %v252_v53  ;;  %v142_v52 = vmul.f32 %v375_v1, %v74_v41  ;;  %v267_v53 = vmax.f32 %v203_v39, 0.0  ;;  %v207_v54 = vadd.f32 %v380_v2, %v139_v40  ;;  %v143_v55 = vmul.f32 %v375_v1, %v75_v45 }
  0x2f   :  { %318 = vst.msk [vmem:[%s961_s3 + $0x138] sm:$0xff] %vm278_vm0, %v253_v57  ;;  %v268_v56 = vmax.f32 %v204_v43, 0.0  ;;  %v208_v57 = vadd.f32 %v380_v2, %v140_v44  ;;  %v144_v58 = vmul.f32 %v375_v1, %v76_v49  ;;  %v269_v59 = vmax.f32 %v205_v47, 0.0 }
  0x30   :  { %319 = vst.msk [vmem:[%s961_s3 + $0x140] sm:$0xff] %vm278_vm0, %v254_v61  ;;  %v209_v60 = vadd.f32 %v380_v2, %v141_v48  ;;  %v270_v61 = vmax.f32 %v206_v51, 0.0  ;;  %v210_v62 = vadd.f32 %v380_v2, %v142_v52  ;;  %v271_v1 = vmax.f32 %v207_v54, 0.0 }
  0x31   :  { %320 = vst.msk [vmem:[%s961_s3 + $0x148] sm:$0xff] %vm278_vm0, %v255_v4  ;;  %v211_v63 = vadd.f32 %v380_v2, %v143_v55  ;;  %v272_v0 = vmax.f32 %v208_v57, 0.0  ;;  %v212_v3 = vadd.f32 %v380_v2, %v144_v58  ;;  %v277_v7 = vmax.f32 %v827_v25, 0.0 }
  0x32   :  { %321 = vst.msk [vmem:[%s961_s3 + $0x150] sm:$0xff] %vm278_vm0, %v256_v8  ;;  %v273_v4 = vmax.f32 %v209_v60, 0.0  ;;  %v274_v5 = vmax.f32 %v210_v62, 0.0 }
  0x33   :  { %322 = vst.msk [vmem:[%s961_s3 + $0x158] sm:$0xff] %vm278_vm0, %v257_v12  ;;  %v275_v6 = vmax.f32 %v211_v63, 0.0  ;;  %v276_v2 = vmax.f32 %v212_v3, 0.0 }
  0x34   :  { %323 = vst.msk [vmem:[%s961_s3 + $0x160] sm:$0xff] %vm278_vm0, %v258_v17 }
  0x35   :  { %324 = vst.msk [vmem:[%s961_s3 + $0x168] sm:$0xff] %vm278_vm0, %v259_v21 }
  0x36   :  { %325 = vst.msk [vmem:[%s961_s3 + $0x170] sm:$0xff] %vm278_vm0, %v260_v26 }
  0x37   :  { %326 = vst.msk [vmem:[%s961_s3 + $0x178] sm:$0xff] %vm278_vm0, %v261_v30 }
  0x38   :  { %327 = vst.msk [vmem:[%s961_s3 + $0x180] sm:$0xff] %vm278_vm0, %v262_v34 }
  0x39   :  { %328 = vst.msk [vmem:[%s961_s3 + $0x188] sm:$0xff] %vm278_vm0, %v263_v38 }
  0x3a   :  { %329 = vst.msk [vmem:[%s961_s3 + $0x190] sm:$0xff] %vm278_vm0, %v264_v42 }
  0x3b   :  { %330 = vst.msk [vmem:[%s961_s3 + $0x198] sm:$0xff] %vm278_vm0, %v265_v46 }
  0x3c   :  { %331 = vst.msk [vmem:[%s961_s3 + $0x1a0] sm:$0xff] %vm278_vm0, %v266_v50 }
  0x3d   :  { %332 = vst.msk [vmem:[%s961_s3 + $0x1a8] sm:$0xff] %vm278_vm0, %v267_v53 }
  0x3e   :  { %333 = vst.msk [vmem:[%s961_s3 + $0x1b0] sm:$0xff] %vm278_vm0, %v268_v56 }
  0x3f   :  { %334 = vst.msk [vmem:[%s961_s3 + $0x1b8] sm:$0xff] %vm278_vm0, %v269_v59 }
  0x40   :  { %335 = vst.msk [vmem:[%s961_s3 + $0x1c0] sm:$0xff] %vm278_vm0, %v270_v61 }
  0x41   :  { %336 = vst.msk [vmem:[%s961_s3 + $0x1c8] sm:$0xff] %vm278_vm0, %v271_v1 }
  0x42   :  { %337 = vst.msk [vmem:[%s961_s3 + $0x1d0] sm:$0xff] %vm278_vm0, %v272_v0 }
  0x43   :  { %338 = vst.msk [vmem:[%s961_s3 + $0x1d8] sm:$0xff] %vm278_vm0, %v273_v4 }
  0x44   :  { %339 = vst.msk [vmem:[%s961_s3 + $0x1e0] sm:$0xff] %vm278_vm0, %v274_v5 }
  0x45   :  { %340 = vst.msk [vmem:[%s961_s3 + $0x1e8] sm:$0xff] %vm278_vm0, %v275_v6 }
  0x46   :  { %341 = vst.msk [vmem:[%s961_s3 + $0x1f0] sm:$0xff] %vm278_vm0, %v276_v2 }
  0x47   :  { %342 = vst.msk [vmem:[%s961_s3 + $0x1f8] sm:$0xff] %vm278_vm0, %v277_v7 }

// kernel: double_convolution.3
= control target key start
LH: loop header
LB: loop body
LE: loop exit
PB: predicated region body
PF: predicated region fallthrough
CT: control target
= control target key end

     0   :  { %s2423_s18 = smov 0   ;;  %s2425_s19 = smov 0   ;;  %s3738_s0 = inlined_call_operand.vmem [shape: f32[2,16,18,4], index: 0, kind: input, shape index: {}, may-alias: {0,1,2}]   ;;  %s3739_s1 = inlined_call_operand.vmem [shape: f32[2,16,18,4], index: 1, kind: input, shape index: {}, may-alias: {0,1,2}]   ;;  %s3740_s2 = inlined_call_operand.vmem [shape: f32[2,16,18,4], index: 2, kind: input, shape index: {}, may-alias: {0,1,2}]   ;;  %s3741_s3 = inlined_call_operand.vmem [shape: f32[3,12,8], index: 3, kind: input, shape index: {}]   ;;  %s3742_s4 = inlined_call_operand.vmem [shape: f32[2,16,18,8], index: 4, kind: output, shape index: {0}]   ;;  %s3743_s5 = inlined_call_operand.vmem [shape: f32[2,1,2,8], index: 5, kind: output, shape index: {1}]  }
   0x1   :  { %s2427_s20 = smov 0  }
   0x2 LB: > { %s28_s1 = sadd.s32 1, %s2384_s19  ;;  %p2217_p0 = scmp.ge.s32.totalorder %s2388_s20, 1  ;;  %s2388_s20 = sphi %s2427_s20, %s16_s20   ;;  %s2384_s19 = sphi %s2425_s19, %s3745_s19   ;;  %s2380_s18 = sphi %s2423_s18, %s3744_s18  }
   0x3   : > { %p30_p1 = scmp.ge.s32.totalorder %s28_s1, 2  ;;  %p278_p2 = scmp.lt.s32.totalorder %s2388_s20, 3 }
   0x5   : > { %s3747_s1 = smov (%p30_p1, %s28_s1), 0  ;;  %p279_p3 = pnand %p2217_p0, %p278_p2 }
   0x6   : > { %p350_p4 = scmp.lt.s32.totalorder (!%p279_p3), %s2380_s18, 1  ;;  %s2390_s24 = smov (!%p279_p3), 4  }
   0x7   : > { %282 = sbr.rel (%p279_p3) target bundleno = 640 (0x280), region = 36  ;;  %s2391_s25 = smov (!%p279_p3), 8  }
   0xc   : > { %s3749_s18 = smov (!%p350_p4, %s2380_s18), 1  ;;  %vm528_vm0 = vcmask 1046528   ;;  %vm705_vm1 = vcmask 1045504   ;;  %vm1111_vm2 = vcmask 1043456   ;;  %vm882_vm3 = vcmask 31744  }
   0xd   : > { %s2338_s2 = smul.u32 384, %s3749_s18  ;;  %vm915_vm4 = vcmask 64512   ;;  %vm1014_vm5 = vcmask 97280   ;;  %vm2001_vm6 = vcmask 57344   ;;  %s2222_s16 = sshll.u32 %s3749_s18, 1  ;;  %vm1965_vm7 = vcmask 1040384  }
   0xe   : > { %s411_s21 = scalar_lea.vmem %s3743_s5, %s2222_s16  ;;  %vm1967_vm8 = vcmask 58368  }
   0xf   : > { %s2449_s23 = scalar_lea.vmem %s3738_s0, %s2338_s2  ;;  %s2706_s11 = scalar_lea.vmem %s3742_s4, %s2338_s2 }
  0x10   : > { %v2452_v0 = vld [vmem:[%s2449_s23 + $0x120] sm:$0xff]  ;;  %v2455_v1 = vld [vmem:[%s2449_s23 + $0x128] sm:$0xff]  ;;  %v450_v11 = vld [vmem:[%s2449_s23 + $0x130] sm:$0x3] }
  0x11   : > { %v2458_v2 = vld [vmem:[%s2449_s23] sm:$0xff]  ;;  %v589_v3 = vrot.slane %v2452_v0, 1  ;;  %v590_v4 = vrot.slane %v2455_v1, 1  ;;  %v2463_v5 = vld [vmem:[%s2449_s23 + $0x8] sm:$0xff]  ;;  %v766_v14 = vrot.slane %v2452_v0, 2  ;;  %v767_v15 = vrot.slane %v2455_v1, 2 }
  0x12   : > { %v706_v6 = vrot.slane %v2458_v2, 2  ;;  %v529_v7 = vrot.slane %v2458_v2, 1  ;;  %v707_v8 = vrot.slane %v2463_v5, 2  ;;  %v530_v9 = vrot.slane %v2463_v5, 1  ;;  %v414_v21 = vld [vmem:[%s2449_s23 + $0x10] sm:$0x3] }
  0x13   : > { %v591_v10 = vsel %vm528_vm0, %v589_v3, %v590_v4  ;;  %v769_v16 = vrot.slane %v450_v11, 2  ;;  %v592_v17 = vrot.slane %v450_v11, 1  ;;  %v768_v18 = vsel %vm705_vm1, %v766_v14, %v767_v15  ;;  %v2483_v22 = vld [vmem:[%s2449_s23 + $0x138] sm:$0xff]  ;;  %v2486_v23 = vld [vmem:[%s2449_s23 + $0x140] sm:$0xff]  ;;  %v453_v31 = vld [vmem:[%s2449_s23 + $0x148] sm:$0x3] }
  0x14   : > { %657 = vrot.lane.b32.xlu0 %v591_v10, %s2390_s24  ;;  %v708_v12 = vsel %vm705_vm1, %v706_v6, %v707_v8  ;;  %v531_v13 = vsel %vm528_vm0, %v529_v7, %v530_v9  ;;  %v532_v24 = vrot.slane %v414_v21, 1  ;;  %v709_v25 = vrot.slane %v414_v21, 2  ;;  %v2498_v32 = vld [vmem:[%s2449_s23 + $0x18] sm:$0xff]  ;;  %v2501_v33 = vld [vmem:[%s2449_s23 + $0x20] sm:$0xff]  ;;  %v417_v42 = vld [vmem:[%s2449_s23 + $0x28] sm:$0x3] }
  0x15   : > { %786 = vrot.lane.b32.xlu2 %v708_v12, %s2391_s25  ;;  %609 = vrot.lane.b32.xlu1 %v531_v13, %s2390_s24  ;;  %v770_v19 = vsel %vm705_vm1, %v767_v15, %v769_v16  ;;  %v593_v20 = vsel %vm528_vm0, %v590_v4, %v592_v17  ;;  %v594_v26 = vrot.slane %v2483_v22, 1  ;;  %v595_v27 = vrot.slane %v2486_v23, 1  ;;  %v2523_v50 = vld [vmem:[%s2449_s23 + $0x60] sm:$0xff]  ;;  %v2526_v51 = vld [vmem:[%s2449_s23 + $0x68] sm:$0xff] }
  0x16   : > { %v533_v28 = vsel %vm528_vm0, %v530_v9, %v532_v24  ;;  %v710_v29 = vsel %vm705_vm1, %v707_v8, %v709_v25  ;;  %v771_v34 = vrot.slane %v2483_v22, 2  ;;  %v772_v35 = vrot.slane %v2486_v23, 2  ;;  %v2529_v52 = vld [vmem:[%s2449_s23 + $0x150] sm:$0xff]  ;;  %v2532_v53 = vld [vmem:[%s2449_s23 + $0x158] sm:$0xff]  ;;  %v456_v14 = vld [vmem:[%s2449_s23 + $0x160] sm:$0x3] }
  0x17   : > { %v596_v30 = vsel %vm528_vm0, %v594_v26, %v595_v27  ;;  %v597_v36 = vrot.slane %v453_v31, 1  ;;  %v534_v37 = vrot.slane %v2498_v32, 1  ;;  %v535_v38 = vrot.slane %v2501_v33, 1  ;;  %v2545_v62 = vld [vmem:[%s2449_s23 + $0x30] sm:$0xff]  ;;  %v2548_v63 = vld [vmem:[%s2449_s23 + $0x38] sm:$0xff] }
  0x18   : > { %v773_v39 = vsel %vm705_vm1, %v771_v34, %v772_v35  ;;  %v711_v43 = vrot.slane %v2498_v32, 2  ;;  %v712_v44 = vrot.slane %v2501_v33, 2  ;;  %v537_v45 = vrot.slane %v417_v42, 1  ;;  %v426_v13 = vld [vmem:[%s2449_s23 + $0x70] sm:$0x3]  ;;  %v2583_v34 = vld [vmem:[%s2449_s23 + $0x80] sm:$0xff] }
  0x19   : > { %v598_v40 = vsel %vm528_vm0, %v595_v27, %v597_v36  ;;  %v536_v41 = vsel %vm528_vm0, %v534_v37, %v535_v38  ;;  %v774_v46 = vrot.slane %v453_v31, 2  ;;  %v549_v54 = vrot.slane %v2523_v50, 1  ;;  %v420_v24 = vld [vmem:[%s2449_s23 + $0x40] sm:$0x3]  ;;  %v2580_v31 = vld [vmem:[%s2449_s23 + $0x78] sm:$0xff]  ;;  %v2589_v36 = vld [vmem:[%s2449_s23 + $0x170] sm:$0xff] }
  0x1a   : > { %v713_v47 = vsel %vm705_vm1, %v711_v43, %v712_v44  ;;  %v538_v48 = vsel %vm528_vm0, %v535_v38, %v537_v45  ;;  %v550_v55 = vrot.slane %v2526_v51, 1  ;;  %v714_v56 = vrot.slane %v417_v42, 2  ;;  %v2602_v45 = vld [vmem:[%s2449_s23 + $0x48] sm:$0xff] }
  0x1b   : > { %v775_v49 = vsel %vm705_vm1, %v772_v35, %v774_v46  ;;  %v599_v57 = vrot.slane %v2529_v52, 1  ;;  %v600_v58 = vrot.slane %v2532_v53, 1  ;;  %v726_v3 = vrot.slane %v2523_v50, 2  ;;  %v2586_v35 = vld [vmem:[%s2449_s23 + $0x168] sm:$0xff]  ;;  %v2605_v46 = vld [vmem:[%s2449_s23 + $0x50] sm:$0xff] }
  0x1c   : > { %834 = vrot.lane.b32.xlu0 %v768_v18, %s2391_s25  ;;  %v551_v59 = vsel %vm528_vm0, %v549_v54, %v550_v55  ;;  %v715_v60 = vsel %vm705_vm1, %v712_v44, %v714_v56  ;;  %v727_v4 = vrot.slane %v2526_v51, 2  ;;  %v539_v6 = vrot.slane %v2545_v62, 1 }
  0x1d   : > { %836 = vrot.lane.b32.xlu2 %v770_v19, %s2391_s25  ;;  %659 = vrot.lane.b32.xlu1 %v593_v20, %s2390_s24  ;;  %v601_v61 = vsel %vm528_vm0, %v599_v57, %v600_v58  ;;  %v540_v7 = vrot.slane %v2548_v63, 1  ;;  %v776_v8 = vrot.slane %v2529_v52, 2  ;;  %v777_v9 = vrot.slane %v2532_v53, 2 }
  0x1e   : > { %v728_v10 = vsel %vm705_vm1, %v726_v3, %v727_v4  ;;  %v552_v15 = vrot.slane %v426_v13, 1  ;;  %v716_v16 = vrot.slane %v2545_v62, 2  ;;  %v717_v17 = vrot.slane %v2548_v63, 2 }
  0x1f   : > { %v541_v11 = vsel %vm528_vm0, %v539_v6, %v540_v7  ;;  %v778_v12 = vsel %vm705_vm1, %v776_v8, %v777_v9  ;;  %v602_v18 = vrot.slane %v456_v14, 1  ;;  %v729_v25 = vrot.slane %v426_v13, 2  ;;  %v2630_v6 = vld [vmem:[%s3741_s3 + $0x8] sm:$0xf] }
  0x20   : > { %v553_v19 = vsel %vm528_vm0, %v550_v55, %v552_v15  ;;  %v718_v20 = vsel %vm705_vm1, %v716_v16, %v717_v17  ;;  %v542_v26 = vrot.slane %v420_v24, 1  ;;  %v779_v27 = vrot.slane %v456_v14, 2  ;;  %2260 = vmatpush.msk.msra.mxu1 %vm1111_vm2, %v2630_v6  ;;  %v423_v16 = vld [vmem:[%s2449_s23 + $0x58] sm:$0x3] }
  0x21   : > { %v603_v21 = vsel %vm528_vm0, %v600_v58, %v602_v18  ;;  %v554_v37 = vrot.slane %v2580_v31, 1  ;;  %v555_v38 = vrot.slane %v2583_v34, 1  ;;  %v545_v54 = vrot.slane %v2605_v46, 1 }
  0x22   : > { %v781_v55 = vrot.slane %v2586_v35, 2  ;;  %v782_v56 = vrot.slane %v2589_v36, 2  ;;  %v722_v8 = vrot.slane %v2605_v46, 2  ;;  %v547_v18 = vrot.slane %v423_v16, 1 }
  0x23   : > { %v556_v42 = vsel %vm528_vm0, %v554_v37, %v555_v38 }
  0x24   : > { %611 = vrot.lane.b32.xlu0 %v533_v28, %s2390_s24  ;;  %v730_v28 = vsel %vm705_vm1, %v727_v4, %v729_v25  ;;  %v2224_v4 = vld [vmem:[%s3741_s3 + $0x18] sm:$0xf] }
  0x25   : > { %788 = vrot.lane.b32.xlu2 %v710_v29, %s2391_s25  ;;  %661 = vrot.lane.b32.xlu1 %v596_v30, %s2390_s24  ;;  %v543_v29 = vsel %vm528_vm0, %v540_v7, %v542_v26  ;;  %v780_v30 = vsel %vm705_vm1, %v777_v9, %v779_v27  ;;  %v721_v7 = vrot.slane %v2602_v45, 2  ;;  %v2663_v25 = vld [vmem:[%s2449_s23 + $0x98] sm:$0xff]  ;;  %v548_v26 = vsel %vm528_vm0, %v545_v54, %v547_v18 }
  0x26   : > { %2227 = vmatpush.msk.msra.mxu0 %vm1111_vm2, %v2224_v4  ;;  %2332 = vmatpush.msk.msra.mxu2 %vm1111_vm2, %v2224_v4 }
  0x27   : > { %v723_v13 = vsel %vm705_vm1, %v721_v7, %v722_v8 }
  0x2c   : > { %838 = vrot.lane.b32.xlu0 %v773_v39, %s2391_s25  ;;  %v719_v39 = vrot.slane %v420_v24, 2  ;;  %v2660_v24 = vld [vmem:[%s2449_s23 + $0x90] sm:$0xff] }
  0x2d   : > { %663 = vrot.lane.b32.xlu2 %v598_v40, %s2390_s24  ;;  %613 = vrot.lane.b32.xlu1 %v536_v41, %s2390_s24  ;;  %v604_v40 = vrot.slane %v2586_v35, 1  ;;  %v605_v41 = vrot.slane %v2589_v36, 1  ;;  %v559_v27 = vrot.slane %v2660_v24, 1 }
  0x2e   : > { %v720_v43 = vsel %vm705_vm1, %v717_v17, %v719_v39 }
  0x2f   : > { %v606_v44 = vsel %vm528_vm0, %v604_v40, %v605_v41 }
  0x34   : > { %790 = vrot.lane.b32.xlu0 %v713_v47, %s2391_s25  ;;  %v731_v47 = vrot.slane %v2580_v31, 2 }
  0x35   : > { %615 = vrot.lane.b32.xlu2 %v538_v48, %s2390_s24  ;;  %840 = vrot.lane.b32.xlu1 %v775_v49, %s2391_s25  ;;  %v732_v48 = vrot.slane %v2583_v34, 2  ;;  %v544_v49 = vrot.slane %v2602_v45, 1 }
  0x37   : > { %v733_v57 = vsel %vm705_vm1, %v731_v47, %v732_v48  ;;  %v546_v58 = vsel %vm528_vm0, %v544_v49, %v545_v54  ;;  %v2688_v49 = vld [vmem:[%s2449_s23 + $0xa8] sm:$0xff] }
  0x3c   : > { %625 = vrot.lane.b32.xlu0 %v551_v59, %s2390_s24  ;;  %v783_v59 = vsel %vm705_vm1, %v781_v55, %v782_v56  ;;  %v564_v55 = vrot.slane %v2688_v49, 1 }
  0x3d   : > { %792 = vrot.lane.b32.xlu2 %v715_v60, %s2391_s25  ;;  %665 = vrot.lane.b32.xlu1 %v601_v61, %s2390_s24  ;;  %v429_v60 = vld [vmem:[%s2449_s23 + $0x88] sm:$0x3]  ;;  %v459_v61 = vld [vmem:[%s2449_s23 + $0x178] sm:$0x3] }
  0x3e   : > { %v557_v3 = vrot.slane %v429_v60, 1  ;;  %v607_v9 = vrot.slane %v459_v61, 1  ;;  %v734_v15 = vrot.slane %v429_v60, 2  ;;  %v784_v17 = vrot.slane %v459_v61, 2 }
  0x3f   : > { %v741_v60 = vrot.slane %v2688_v49, 2 }
  0x40   : > { %v608_v14 = vsel %vm528_vm0, %v605_v41, %v607_v9  ;;  %v432_v41 = vld [vmem:[%s2449_s23 + $0xa0] sm:$0x3] }
  0x41   : > { %v739_v47 = vrot.slane %v432_v41, 2 }
  0x44   : > { %802 = vrot.lane.b32.xlu0 %v728_v10, %s2391_s25  ;;  %v2223_v10 = vld [vmem:[%s3741_s3 + $0x10] sm:$0xff] }
  0x45   : > { %617 = vrot.lane.b32.xlu2 %v541_v11, %s2390_s24  ;;  %842 = vrot.lane.b32.xlu1 %v778_v12, %s2391_s25  ;;  %v2644_v11 = vld [vmem:[%s3741_s3] sm:$0xff]  ;;  %v558_v12 = vsel %vm528_vm0, %v555_v38, %v557_v3  ;;  %v737_v38 = vrot.slane %v2663_v25, 2 }
  0x46   : > { %1130 = vmatpush.msra.mxu0 %v2223_v10  ;;  %1308 = vmatpush.msra.mxu1 %v2644_v11 }
  0x47   : > { %2333 = vmatpush.msra.mxu2 %v2223_v10  ;;  %v2392_v10 = vmov 0.0  }
  0x48   : > { %2002 = vst.msk [vmem:[%s2706_s11] sm:$0x1] %vm2001_vm6, %v2392_v10 }
  0x49   : > { %2334 = vmatpush.msk.msrb.mxu2 %vm1111_vm2, %v2630_v6  ;;  %2003 = vst.msk [vmem:[%s2706_s11 + $0x18] sm:$0x1] %vm2001_vm6, %v2392_v10 }
  0x4a   : > { %2004 = vst.msk [vmem:[%s2706_s11 + $0x30] sm:$0x1] %vm2001_vm6, %v2392_v10 }
  0x4b   : > { %2335 = vmatpush.msrb.mxu2 %v2644_v11  ;;  %2005 = vst.msk [vmem:[%s2706_s11 + $0x48] sm:$0x1] %vm2001_vm6, %v2392_v10 }
  0x4c   : > { %627 = vrot.lane.b32.xlu0 %v553_v19, %s2390_s24  ;;  %2006 = vst.msk [vmem:[%s2706_s11 + $0x60] sm:$0x1] %vm2001_vm6, %v2392_v10 }
  0x4d   : > { %794 = vrot.lane.b32.xlu2 %v718_v20, %s2391_s25  ;;  %667 = vrot.lane.b32.xlu1 %v603_v21, %s2390_s24  ;;  %v735_v20 = vsel %vm705_vm1, %v732_v48, %v734_v15  ;;  %v785_v21 = vsel %vm705_vm1, %v782_v56, %v784_v17  ;;  %v2724_v15 = vld [vmem:[%s2449_s23 + $0xc0] sm:$0xff]  ;;  %2007 = vst.msk [vmem:[%s2706_s11 + $0x78] sm:$0x1] %vm2001_vm6, %v2392_v10 }
  0x4e   : > { %v569_v18 = vrot.slane %v2724_v15, 1  ;;  %2008 = vst.msk [vmem:[%s2706_s11 + $0x90] sm:$0x1] %vm2001_vm6, %v2392_v10 }
  0x4f   : > { %2009 = vst.msk [vmem:[%s2706_s11 + $0xa8] sm:$0x1] %vm2001_vm6, %v2392_v10 }
  0x50   : > { %2010 = vst.msk [vmem:[%s2706_s11 + $0xc0] sm:$0x1] %vm2001_vm6, %v2392_v10 }
  0x51   : > { %2011 = vst.msk [vmem:[%s2706_s11 + $0xd8] sm:$0x1] %vm2001_vm6, %v2392_v10 }
  0x52   : > { %2012 = vst.msk [vmem:[%s2706_s11 + $0xf0] sm:$0x1] %vm2001_vm6, %v2392_v10 }
  0x53   : > { %2013 = vst.msk [vmem:[%s2706_s11 + $0x108] sm:$0x1] %vm2001_vm6, %v2392_v10 }
  0x54   : > { %804 = vrot.lane.b32.xlu0 %v730_v28, %s2391_s25  ;;  %v560_v28 = vrot.slane %v2663_v25, 1  ;;  %2014 = vst.msk [vmem:[%s2706_s11 + $0x120] sm:$0x1] %vm2001_vm6, %v2392_v10 }
  0x55   : > { %619 = vrot.lane.b32.xlu2 %v543_v29, %s2390_s24  ;;  %844 = vrot.lane.b32.xlu1 %v780_v30, %s2391_s25  ;;  %v724_v29 = vrot.slane %v423_v16, 2  ;;  %v736_v30 = vrot.slane %v2660_v24, 2  ;;  %v2727_v16 = vld [vmem:[%s2449_s23 + $0xc8] sm:$0xff]  ;;  %2015 = vst.msk [vmem:[%s2706_s11 + $0x138] sm:$0x1] %vm2001_vm6, %v2392_v10 }
  0x56   : > { %v561_v39 = vsel %vm528_vm0, %v559_v27, %v560_v28  ;;  %v747_v27 = vrot.slane %v2727_v16, 2  ;;  %2016 = vst.msk [vmem:[%s2706_s11 + $0x150] sm:$0x1] %vm2001_vm6, %v2392_v10 }
  0x57   : > { %v725_v40 = vsel %vm705_vm1, %v722_v8, %v724_v29  ;;  %2017 = vst.msk [vmem:[%s2706_s11 + $0x168] sm:$0x1] %vm2001_vm6, %v2392_v10 }
  0x58   : > { %2018 = vst.msk [vmem:[%s2706_s11 + $0x11] sm:$0x1] %vm2001_vm6, %v2392_v10 }
  0x59   : > { %2019 = vst.msk [vmem:[%s2706_s11 + $0x29] sm:$0x1] %vm2001_vm6, %v2392_v10 }
  0x5a   : > { %2020 = vst.msk [vmem:[%s2706_s11 + $0x41] sm:$0x1] %vm2001_vm6, %v2392_v10 }
  0x5b   : > { %2021 = vst.msk [vmem:[%s2706_s11 + $0x59] sm:$0x1] %vm2001_vm6, %v2392_v10 }
  0x5c   : > { %629 = vrot.lane.b32.xlu0 %v556_v42, %s2390_s24  ;;  %v738_v42 = vsel %vm705_vm1, %v736_v30, %v737_v38  ;;  %2022 = vst.msk [vmem:[%s2706_s11 + $0x71] sm:$0x1] %vm2001_vm6, %v2392_v10 }
  0x5d   : > { %796 = vrot.lane.b32.xlu2 %v720_v43, %s2391_s25  ;;  %669 = vrot.lane.b32.xlu1 %v606_v44, %s2390_s24  ;;  %v562_v43 = vrot.slane %v432_v41, 1  ;;  %v2682_v44 = vld [vmem:[%s2449_s23 + $0xb0] sm:$0xff]  ;;  %2023 = vst.msk [vmem:[%s2706_s11 + $0x89] sm:$0x1] %vm2001_vm6, %v2392_v10 }
  0x5e   : > { %v565_v54 = vrot.slane %v2682_v44, 1  ;;  %v742_v61 = vrot.slane %v2682_v44, 2  ;;  %2024 = vst.msk [vmem:[%s2706_s11 + $0xa1] sm:$0x1] %vm2001_vm6, %v2392_v10 }
  0x5f   : > { %v563_v56 = vsel %vm528_vm0, %v560_v28, %v562_v43  ;;  %v2787_v43 = vld [vmem:[%s2449_s23 + $0xd8] sm:$0xff]  ;;  %2025 = vst.msk [vmem:[%s2706_s11 + $0xb9] sm:$0x1] %vm2001_vm6, %v2392_v10 }
  0x60   : > { %2026 = vst.msk [vmem:[%s2706_s11 + $0xd1] sm:$0x1] %vm2001_vm6, %v2392_v10 }
  0x61   : > { %2027 = vst.msk [vmem:[%s2706_s11 + $0xe9] sm:$0x1] %vm2001_vm6, %v2392_v10 }
  0x62   : > { %2028 = vst.msk [vmem:[%s2706_s11 + $0x101] sm:$0x1] %vm2001_vm6, %v2392_v10 }
  0x63   : > { %2029 = vst.msk [vmem:[%s2706_s11 + $0x119] sm:$0x1] %vm2001_vm6, %v2392_v10 }
  0x64   : > { %806 = vrot.lane.b32.xlu0 %v733_v57, %s2391_s25  ;;  %v740_v57 = vsel %vm705_vm1, %v737_v38, %v739_v47  ;;  %v438_v38 = vld [vmem:[%s2449_s23 + $0xd0] sm:$0x3]  ;;  %v2790_v47 = vld [vmem:[%s2449_s23 + $0xe0] sm:$0xff]  ;;  %2030 = vst.msk [vmem:[%s2706_s11 + $0x131] sm:$0x1] %vm2001_vm6, %v2392_v10 }
  0x65   : > { %621 = vrot.lane.b32.xlu2 %v546_v58, %s2390_s24  ;;  %846 = vrot.lane.b32.xlu1 %v783_v59, %s2391_s25  ;;  %v566_v58 = vsel %vm528_vm0, %v564_v55, %v565_v54  ;;  %v435_v59 = vld [vmem:[%s2449_s23 + $0xb8] sm:$0x3]  ;;  %2031 = vst.msk [vmem:[%s2706_s11 + $0x149] sm:$0x1] %vm2001_vm6, %v2392_v10 }
  0x66   : > { %v567_v4 = vrot.slane %v435_v59, 1  ;;  %2032 = vst.msk [vmem:[%s2706_s11 + $0x161] sm:$0x1] %vm2001_vm6, %v2392_v10 }
  0x67   : > { %2033 = vst.msk [vmem:[%s2706_s11 + $0x179] sm:$0x1] %vm2001_vm6, %v2392_v10 }
  0x6c   : > { %631 = vrot.lane.b32.xlu0 %v558_v12, %s2390_s24 }
  0x6d   : > { %798 = vrot.lane.b32.xlu2 %v723_v13, %s2391_s25  ;;  %671 = vrot.lane.b32.xlu1 %v608_v14, %s2390_s24  ;;  %v743_v13 = vsel %vm705_vm1, %v741_v60, %v742_v61  ;;  %v744_v14 = vrot.slane %v435_v59, 2  ;;  %v2826_v60 = vld [vmem:[%s3741_s3 + $0x20] sm:$0xff] }
  0x6f   : > { %v787_v19 = vpop.permute.xlu2 %786  ;;  %v745_v17 = vsel %vm705_vm1, %v742_v61, %v744_v14 }
  0x74   : > { %808 = vrot.lane.b32.xlu0 %v735_v20, %s2391_s25 }
  0x75   : > { %848 = vrot.lane.b32.xlu1 %v785_v21, %s2391_s25  ;;  %623 = vrot.lane.b32.xlu2 %v548_v26, %s2390_s24  ;;  %v746_v26 = vrot.slane %v2724_v15, 2 }
  0x77   : > { %v2672_v37 = vpop.permute.xlu2 %836  ;;  %v748_v41 = vsel %vm705_vm1, %v746_v26, %v747_v27 }
  0x7c   : > { %633 = vrot.lane.b32.xlu0 %v561_v39, %s2390_s24  ;;  %v2771_v39 = vld [vmem:[%s3741_s3 + $0x28] sm:$0xf] }
  0x7d   : > { %800 = vrot.lane.b32.xlu1 %v725_v40, %s2391_s25  ;;  %810 = vrot.lane.b32.xlu2 %v738_v42, %s2391_s25 }
  0x7e   : > { %2336 = vmatpush.msk.msra.mxu3 %vm1111_vm2, %v2771_v39 }
  0x7f   : > { %v2685_v48 = vpop.permute.xlu2 %788 }
  0x80   : > { %2337 = vmatpush.msra.mxu3 %v2826_v60 }
  0x84   : > { %635 = vrot.lane.b32.xlu0 %v563_v56, %s2390_s24 }
  0x85   : > { %812 = vrot.lane.b32.xlu1 %v740_v57, %s2391_s25  ;;  %637 = vrot.lane.b32.xlu2 %v566_v58, %s2390_s24 }
  0x86   : > { %v658_v3 = vpop.permute.xlu0 %657 }
  0x87   : > { %v2708_v7 = vpop.permute.xlu2 %663  ;;  %v610_v8 = vpop.permute.xlu1 %609  ;;  %v907_v20 = vsel %vm882_vm3, %v2452_v0, %v658_v3  ;;  %v572_v0 = vrot.slane %v438_v38, 1  ;;  %v751_v3 = vrot.slane %v2787_v43, 2 }
  0x88   : > { %v883_v9 = vsel %vm882_vm3, %v2458_v2, %v610_v8  ;;  %v568_v2 = vsel %vm528_vm0, %v565_v54, %v567_v4  ;;  %v749_v54 = vrot.slane %v438_v38, 2  ;;  %v752_v4 = vrot.slane %v2790_v47, 2 }
  0x89   : > { %v916_v12 = vsel %vm915_vm4, %v883_v9, %v787_v19  ;;  %v570_v19 = vrot.slane %v2727_v16, 1 }
  0x8a   : > { %2228 = vmatmul.msk.f32.vlgmr.msra.gmra.mxu0 %vm1014_vm5, %v916_v12  ;;  %2261 = vmatmul.msk.f32.vlgmr.msra.gmra.mxu1 %vm1014_vm5, %v916_v12 }
  0x8b   : > { %v571_v40 = vsel %vm528_vm0, %v569_v18, %v570_v19  ;;  %v573_v42 = vsel %vm528_vm0, %v570_v19, %v572_v0  ;;  %v2883_v18 = vrot.slane %v2392_v10, 2 }
  0x8c   : > { %814 = vrot.lane.b32.xlu0 %v743_v13, %s2391_s25 }
  0x8d   : > { %639 = vrot.lane.b32.xlu1 %v568_v2, %s2390_s24  ;;  %816 = vrot.lane.b32.xlu2 %v745_v17, %s2391_s25  ;;  %v441_v2 = vld [vmem:[%s2449_s23 + $0xe8] sm:$0x3]  ;;  %v753_v17 = vsel %vm705_vm1, %v751_v3, %v752_v4 }
  0x8e   : > { %v835_v21 = vpop.permute.xlu0 %834  ;;  %v754_v26 = vrot.slane %v441_v2, 2 }
  0x8f   : > { %v2754_v28 = vpop.permute.xlu2 %615  ;;  %v660_v29 = vpop.permute.xlu1 %659  ;;  %v2757_v30 = vsel %vm915_vm4, %v907_v20, %v835_v21 }
  0x90   : > { %2252 = vmatmul.msk.f32.vlgmr.msra.gmra.mxu2 %vm1014_vm5, %v2757_v30 }
  0x91   : > { %2291 = vmatpush.msk.msra.mxu2 %vm1111_vm2, %v2630_v6  ;;  %v908_v6 = vsel %vm882_vm3, %v2455_v1, %v660_v29  ;;  %v575_v1 = vrot.slane %v2790_v47, 1 }
  0x92   : > { %v2818_v59 = vsel %vm915_vm4, %v908_v6, %v2672_v37  ;;  %v750_v37 = vsel %vm705_vm1, %v747_v27, %v749_v54  ;;  %v910_v27 = vsel %vm882_vm3, %v2486_v23, %v2708_v7  ;;  %v755_v23 = vsel %vm705_vm1, %v752_v4, %v754_v26  ;;  %v2930_v7 = vld [vmem:[%s2449_s23 + $0xf0] sm:$0xff] }
  0x93   : > { %1483 = vmatpush.msra.mxu2 %v2644_v11  ;;  %v574_v11 = vrot.slane %v2787_v43, 1  ;;  %v756_v54 = vrot.slane %v2930_v7, 2 }
  0x94   : > { %641 = vrot.lane.b32.xlu0 %v571_v40, %s2390_s24  ;;  %v886_v40 = vsel %vm882_vm3, %v2501_v33, %v2754_v28 }
  0x95   : > { %818 = vrot.lane.b32.xlu1 %v748_v41, %s2391_s25  ;;  %643 = vrot.lane.b32.xlu2 %v573_v42, %s2390_s24  ;;  %v576_v61 = vsel %vm528_vm0, %v574_v11, %v575_v1  ;;  %v579_v41 = vrot.slane %v2930_v7, 1 }
  0x96   : > { %v612_v55 = vpop.permute.xlu0 %611 }
  0x97   : > { %v884_v56 = vsel %vm882_vm3, %v2463_v5, %v612_v55  ;;  %v2814_v57 = vpop.permute.xlu2 %792  ;;  %v662_v58 = vpop.permute.xlu1 %661 }
  0x98   : > { %2253 = vmatmul.msk.f32.gmra.mxu2 %vm1014_vm5, %v2818_v59  ;;  %v917_v5 = vsel %vm915_vm4, %v884_v56, %v2685_v48  ;;  %v2850_v48 = vrot.slane %v2392_v10, 1  ;;  %v909_v8 = vsel %vm882_vm3, %v2483_v22, %v662_v58  ;;  %v577_v22 = vrot.slane %v441_v2, 1  ;;  %v2933_v10 = vld [vmem:[%s2449_s23 + $0xf8] sm:$0xff] }
  0x99   : > { %2229 = vmatmul.msk.f32.gmra.mxu0 %vm1014_vm5, %v917_v5  ;;  %2262 = vmatmul.msk.f32.gmra.mxu1 %vm1014_vm5, %v917_v5  ;;  %v580_v42 = vrot.slane %v2933_v10, 1  ;;  %v757_v33 = vrot.slane %v2933_v10, 2  ;;  %v2949_v11 = vsel %vm915_vm4, %v886_v40, %v2814_v57  ;;  %v444_v5 = vld [vmem:[%s2449_s23 + $0x100] sm:$0x3] }
  0x9a   : > { %v578_v19 = vsel %vm528_vm0, %v575_v1, %v577_v22  ;;  %v759_v3 = vrot.slane %v444_v5, 2 }
  0x9b   : > { %v581_v1 = vsel %vm528_vm0, %v579_v41, %v580_v42  ;;  %v758_v58 = vsel %vm705_vm1, %v756_v54, %v757_v33 }
  0x9c   : > { %820 = vrot.lane.b32.xlu0 %v750_v37, %s2391_s25  ;;  %v2961_v37 = vld [vmem:[%s2449_s23 + $0x108] sm:$0xff] }
  0x9d   : > { %645 = vrot.lane.b32.xlu1 %v576_v61, %s2390_s24  ;;  %956 = vrot.lane.b32.xlu2 %v2850_v48, %s2390_s24  ;;  %v2964_v61 = vld [vmem:[%s2449_s23 + $0x110] sm:$0xff] }
  0x9e   : > { %v839_v9 = vpop.permute.xlu0 %838 }
  0x9f   : > { %v618_v12 = vpop.permute.xlu2 %617  ;;  %v614_v13 = vpop.permute.xlu1 %613  ;;  %v2870_v14 = vsel %vm915_vm4, %v909_v8, %v839_v9  ;;  %v585_v9 = vrot.slane %v2964_v61, 1 }
  0xa0   : > { %2254 = vmatmul.msk.f32.gmra.mxu2 %vm1014_vm5, %v2870_v14  ;;  %v885_v20 = vsel %vm882_vm3, %v2498_v32, %v614_v13  ;;  %v887_v56 = vsel %vm882_vm3, %v2545_v62, %v618_v12  ;;  %v584_v62 = vrot.slane %v2961_v37, 1 }
  0xa4   : > { %822 = vrot.lane.b32.xlu0 %v753_v17, %s2391_s25 }
  0xa5   : > { %967 = vrot.lane.b32.xlu1 %v2883_v18, %s2391_s25  ;;  %647 = vrot.lane.b32.xlu2 %v578_v19, %s2390_s24 }
  0xa6   : > { %v791_v21 = vpop.permute.xlu0 %790 }
  0xa7   : > { %v795_v29 = vpop.permute.xlu2 %794  ;;  %v841_v38 = vpop.permute.xlu1 %840  ;;  %v2917_v0 = vsel %vm915_vm4, %v885_v20, %v791_v21  ;;  %v586_v20 = vsel %vm528_vm0, %v584_v62, %v585_v9  ;;  %v447_v21 = vld [vmem:[%s2449_s23 + $0x118] sm:$0x3] }
  0xa8   : > { %2230 = vmatmul.msk.f32.gmra.mxu0 %vm1014_vm5, %v2917_v0  ;;  %v2922_v32 = vsel %vm915_vm4, %v910_v27, %v841_v38  ;;  %2263 = vmatmul.msk.f32.gmra.mxu1 %vm1014_vm5, %v2917_v0  ;;  %v2968_v57 = vsel %vm915_vm4, %v887_v56, %v795_v29  ;;  %v587_v29 = vrot.slane %v447_v21, 1  ;;  %v764_v40 = vrot.slane %v447_v21, 2 }
  0xa9   : > { %2255 = vmatmul.msk.f32.gmra.mxu2 %vm1014_vm5, %v2922_v32 }
  0xac   : > { %958 = vrot.lane.b32.xlu0 %v2850_v48, %s2390_s24 }
  0xad   : > { %824 = vrot.lane.b32.xlu1 %v755_v23, %s2391_s25  ;;  %969 = vrot.lane.b32.xlu2 %v2883_v18, %s2391_s25  ;;  %v762_v23 = vrot.slane %v2964_v61, 2 }
  0xae   : > { %v626_v6 = vpop.permute.xlu0 %625 }
  0xaf   : > { %v620_v28 = vpop.permute.xlu2 %619  ;;  %v666_v55 = vpop.permute.xlu1 %665  ;;  %v891_v4 = vsel %vm882_vm3, %v2523_v50, %v626_v6  ;;  %v760_v50 = vsel %vm705_vm1, %v757_v33, %v759_v3  ;;  %v588_v6 = vsel %vm528_vm0, %v585_v9, %v587_v29  ;;  %v765_v54 = vsel %vm705_vm1, %v762_v23, %v764_v40 }
  0xb0   : > { %2231 = vmatmul.msk.f32.gmra.mxu0 %vm1014_vm5, %v2949_v11  ;;  %2264 = vmatmul.msk.f32.gmra.mxu1 %vm1014_vm5, %v2949_v11  ;;  %v911_v12 = vsel %vm882_vm3, %v2529_v52, %v666_v55  ;;  %v582_v52 = vrot.slane %v444_v5, 1  ;;  %v888_v19 = vsel %vm882_vm3, %v2548_v63, %v620_v28 }
  0xb2   : > { %v583_v26 = vsel %vm528_vm0, %v580_v42, %v582_v52  ;;  %v761_v42 = vrot.slane %v2961_v37, 2 }
  0xb4   : > { %649 = vrot.lane.b32.xlu0 %v581_v1, %s2390_s24  ;;  %v763_v33 = vsel %vm705_vm1, %v761_v42, %v762_v23 }
  0xb5   : > { %826 = vrot.lane.b32.xlu1 %v758_v58, %s2391_s25  ;;  %651 = vrot.lane.b32.xlu2 %v583_v26, %s2390_s24 }
  0xb6   : > { %v803_v8 = vpop.permute.xlu0 %802 }
  0xb7   : > { %v797_v13 = vpop.permute.xlu2 %796  ;;  %v843_v2 = vpop.permute.xlu1 %842  ;;  %v2978_v22 = vsel %vm915_vm4, %v891_v4, %v803_v8 }
  0xb8   : > { %2232 = vmatmul.msk.f32.gmra.mxu0 %vm1014_vm5, %v2968_v57  ;;  %v2983_v17 = vsel %vm915_vm4, %v911_v12, %v843_v2  ;;  %2301 = vmatmul.msk.f32.vlgmr.msra.gmra.mxu3 %vm1014_vm5, %v2978_v22  ;;  %v3000_v27 = vsel %vm915_vm4, %v888_v19, %v797_v13 }
  0xb9   : > { %2256 = vmatmul.msk.f32.gmra.mxu2 %vm1014_vm5, %v2983_v17  ;;  %2265 = vmatmul.msk.f32.gmra.mxu1 %vm1014_vm5, %v2968_v57 }
  0xbc   : > { %828 = vrot.lane.b32.xlu0 %v760_v50, %s2391_s25 }
  0xbd   : > { %653 = vrot.lane.b32.xlu1 %v586_v20, %s2390_s24  ;;  %830 = vrot.lane.b32.xlu2 %v763_v33, %s2391_s25 }
  0xbe   : > { %v628_v38 = vpop.permute.xlu0 %627 }
  0xbf   : > { %v622_v63 = vpop.permute.xlu2 %621  ;;  %v668_v41 = vpop.permute.xlu1 %667  ;;  %v892_v55 = vsel %vm882_vm3, %v2526_v51, %v628_v38 }
  0xc0   : > { %2233 = vmatmul.msk.f32.gmra.mxu0 %vm1014_vm5, %v3000_v27  ;;  %v889_v28 = vsel %vm882_vm3, %v2602_v45, %v622_v63  ;;  %v912_v56 = vsel %vm882_vm3, %v2532_v53, %v668_v41 }
  0xc1   : > { %2266 = vmatmul.msk.f32.gmra.mxu1 %vm1014_vm5, %v3000_v27 }
  0xc4   : > { %655 = vrot.lane.b32.xlu0 %v588_v6, %s2390_s24 }
  0xc5   : > { %832 = vrot.lane.b32.xlu1 %v765_v54, %s2391_s25  ;;  %985 = vrot.lane.b32.xlu2 %v2850_v48, %s2390_s24 }
  0xc6   : > { %v805_v1 = vpop.permute.xlu0 %804 }
  0xc7   : > { %v799_v58 = vpop.permute.xlu2 %798  ;;  %v845_v5 = vpop.permute.xlu1 %844  ;;  %v925_v3 = vsel %vm915_vm4, %v892_v55, %v805_v1 }
  0xc8   : > { %v3023_v4 = vsel %vm915_vm4, %v889_v28, %v799_v58  ;;  %v3026_v8 = vsel %vm915_vm4, %v912_v56, %v845_v5  ;;  %2302 = vmatmul.msk.f32.gmra.mxu3 %vm1014_vm5, %v925_v3 }
  0xc9   : > { %2234 = vmatmul.msk.f32.gmra.mxu0 %vm1014_vm5, %v3023_v4  ;;  %2257 = vmatmul.msk.f32.gmra.mxu2 %vm1014_vm5, %v3026_v8 }
  0xca   : > { %2267 = vmatmul.msk.f32.gmra.mxu1 %vm1014_vm5, %v3023_v4 }
  0xcc   : > { %996 = vrot.lane.b32.xlu0 %v2883_v18, %s2391_s25 }
  0xcd   : > { %987 = vrot.lane.b32.xlu1 %v2850_v48, %s2390_s24  ;;  %998 = vrot.lane.b32.xlu2 %v2883_v18, %s2391_s25 }
  0xce   : > { %v630_v51 = vpop.permute.xlu0 %629 }
  0xcf   : > { %v670_v53 = vpop.permute.xlu1 %669  ;;  %v893_v45 = vsel %vm882_vm3, %v2580_v31, %v630_v51  ;;  %v624_v50 = vpop.permute.xlu2 %623 }
  0xd0   : > { %v913_v9 = vsel %vm882_vm3, %v2586_v35, %v670_v53 }
  0xd6   : > { %v807_v62 = vpop.permute.xlu0 %806 }
  0xd7   : > { %v847_v12 = vpop.permute.xlu1 %846  ;;  %v926_v13 = vsel %vm915_vm4, %v893_v45, %v807_v62  ;;  %v811_v26 = vpop.permute.xlu2 %810 }
  0xd8   : > { %v3049_v2 = vsel %vm915_vm4, %v913_v9, %v847_v12  ;;  %2303 = vmatmul.msk.f32.gmra.mxu3 %vm1014_vm5, %v926_v13 }
  0xd9   : > { %2258 = vmatmul.msk.f32.gmra.mxu2 %vm1014_vm5, %v3049_v2 }
  0xde   : > { %v632_v48 = vpop.permute.xlu0 %631 }
  0xdf   : > { %v672_v18 = vpop.permute.xlu1 %671  ;;  %v894_v31 = vsel %vm882_vm3, %v2583_v34, %v632_v48  ;;  %v890_v34 = vsel %vm882_vm3, %v2605_v46, %v624_v50  ;;  %v638_v46 = vpop.permute.xlu2 %637 }
  0xe0   : > { %v914_v35 = vsel %vm882_vm3, %v2589_v36, %v672_v18  ;;  %v897_v6 = vsel %vm882_vm3, %v2688_v49, %v638_v46 }
  0xe6   : > { %v809_v52 = vpop.permute.xlu0 %808 }
  0xe7   : > { %v849_v19 = vpop.permute.xlu1 %848  ;;  %v927_v20 = vsel %vm915_vm4, %v894_v31, %v809_v52  ;;  %v817_v54 = vpop.permute.xlu2 %816 }
  0xe8   : > { %v3060_v21 = vsel %vm915_vm4, %v914_v35, %v849_v19  ;;  %2304 = vmatmul.msk.f32.gmra.mxu3 %vm1014_vm5, %v927_v20 }
  0xe9   : > { %2259 = vmatmul.msk.f32.gmra.mxu2 %vm1014_vm5, %v3060_v21 }
  0xee   : > { %v634_v29 = vpop.permute.xlu0 %633 }
  0xef   : > { %v895_v38 = vsel %vm882_vm3, %v2660_v24, %v634_v29  ;;  %v801_v36 = vpop.permute.xlu1 %800  ;;  %v644_v1 = vpop.permute.xlu2 %643 }
  0xf0   : > { %v3070_v23 = vsel %vm915_vm4, %v890_v34, %v801_v36  ;;  %v928_v40 = vsel %vm915_vm4, %v895_v38, %v811_v26 }
  0xf1   : > { %2235 = vmatmul.msk.f32.gmra.mxu0 %vm1014_vm5, %v3070_v23  ;;  %2268 = vmatmul.msk.f32.gmra.mxu1 %vm1014_vm5, %v3070_v23 }
  0xf2   : > { %2285 = vmatmul.msk.f32.vlgmr.msrb.gmra.mxu2 %vm1014_vm5, %v2757_v30  ;;  %2305 = vmatmul.msk.f32.gmra.mxu3 %vm1014_vm5, %v928_v40 }
  0xf3   : > { %2294 = vmatpush.msk.msrb.mxu2 %vm1111_vm2, %v2771_v39 }
  0xf5   : > { %1543 = vmatpush.msrb.mxu2 %v2826_v60 }
  0xf6   : > { %v636_v24 = vpop.permute.xlu0 %635 }
  0xf7   : > { %v896_v63 = vsel %vm882_vm3, %v2663_v25, %v636_v24  ;;  %v813_v41 = vpop.permute.xlu1 %812  ;;  %v957_v53 = vpop.permute.xlu2 %956 }
  0xf8   : > { %v929_v42 = vsel %vm915_vm4, %v896_v63, %v813_v41  ;;  %v973_v50 = vsel %vm882_vm3, 0.0, %v957_v53 }
  0xf9   : > { %2236 = vmatmul.msk.f32.gmra.mxu0 %vm1014_vm5, %v2978_v22  ;;  %2269 = vmatmul.msk.f32.gmra.mxu1 %vm1014_vm5, %v2978_v22 }
  0xfa   : > { %2286 = vmatmul.msk.f32.gmra.mxu2 %vm1014_vm5, %v2818_v59  ;;  %2306 = vmatmul.msk.f32.gmra.mxu3 %vm1014_vm5, %v929_v42 }
  0xfe   : > { %v815_v33 = vpop.permute.xlu0 %814 }
  0xff   : > { %v640_v25 = vpop.permute.xlu1 %639  ;;  %v930_v28 = vsel %vm915_vm4, %v897_v6, %v815_v33  ;;  %v648_v48 = vpop.permute.xlu2 %647 }
 0x100   : > { %v898_v22 = vsel %vm882_vm3, %v2682_v44, %v640_v25  ;;  %v902_v34 = vsel %vm882_vm3, %v2790_v47, %v648_v48 }
 0x101   : > { %2237 = vmatmul.msk.f32.gmra.mxu0 %vm1014_vm5, %v925_v3  ;;  %2270 = vmatmul.msk.f32.gmra.mxu1 %vm1014_vm5, %v925_v3  ;;  %v3104_v56 = vsel %vm915_vm4, %v898_v22, %v817_v54 }
 0x102   : > { %2287 = vmatmul.msk.f32.gmra.mxu2 %vm1014_vm5, %v2870_v14  ;;  %2307 = vmatmul.msk.f32.gmra.mxu3 %vm1014_vm5, %v930_v28 }
 0x106   : > { %v642_v55 = vpop.permute.xlu0 %641 }
 0x107   : > { %v1132_v49 = vpop.f32.mrf.mxu0  ;;  %v819_v58 = vpop.permute.xlu1 %818  ;;  %v899_v44 = vsel %vm882_vm3, %v2724_v15, %v642_v55  ;;  %v900_v15 = vsel %vm882_vm3, %v2727_v16, %v644_v1 }
 0x108   : > { %1228 = vst.msk [vmem:[#allocation2] sm:$0xff] %vm915_vm4, %v1132_v49  ;;  %v3116_v3 = vsel %vm915_vm4, %v899_v44, %v819_v58  ;;  %v970_v26 = vpop.permute.xlu2 %969 }
 0x109   : > { %2238 = vmatmul.msk.f32.gmra.mxu0 %vm1014_vm5, %v926_v13  ;;  %2271 = vmatmul.msk.f32.gmra.mxu1 %vm1014_vm5, %v926_v13 }
 0x10a   : > { %2288 = vmatmul.msk.f32.gmra.mxu2 %vm1014_vm5, %v2922_v32  ;;  %2308 = vmatmul.msk.f32.gmra.mxu3 %vm1014_vm5, %v3104_v56 }
 0x10e   : > { %v821_v5 = vpop.permute.xlu0 %820 }
 0x10f   : > { %v646_v51 = vpop.permute.xlu1 %645  ;;  %v3131_v12 = vsel %vm915_vm4, %v900_v15, %v821_v5 }
 0x110   : > { %v901_v18 = vsel %vm882_vm3, %v2787_v43, %v646_v51 }
 0x111   : > { %2239 = vmatmul.msk.f32.gmra.mxu0 %vm1014_vm5, %v927_v20  ;;  %2272 = vmatmul.msk.f32.gmra.mxu1 %vm1014_vm5, %v927_v20 }
 0x112   : > { %2289 = vmatmul.msk.f32.gmra.mxu2 %vm1014_vm5, %v2983_v17  ;;  %2309 = vmatmul.msk.f32.gmra.mxu3 %vm1014_vm5, %v3116_v3 }
 0x113   : > { %v1204_v45 = vpop.f32.mrf.mxu2 }
 0x114   : > { %1252 = vst.msk [vmem:[#allocation2 + $0xc0] sm:$0xff] %vm915_vm4, %v1204_v45 }
 0x116   : > { %v1135_v62 = vpop.f32.mrf.mxu0  ;;  %v823_v9 = vpop.permute.xlu0 %822 }
 0x117   : > { %1229 = vst.msk [vmem:[#allocation2 + $0x8] sm:$0xff] %vm915_vm4, %v1135_v62  ;;  %v968_v13 = vpop.permute.xlu1 %967  ;;  %v3145_v35 = vsel %vm915_vm4, %v901_v18, %v823_v9 }
 0x118   : > { %v975_v52 = vsel %vm915_vm4, %v973_v50, %v968_v13 }
 0x119   : > { %2240 = vmatmul.msk.f32.gmra.mxu0 %vm1014_vm5, %v928_v40  ;;  %2273 = vmatmul.msk.f32.gmra.mxu1 %vm1014_vm5, %v928_v40 }
 0x11a   : > { %2290 = vmatmul.msk.f32.gmra.mxu2 %vm1014_vm5, %v3026_v8  ;;  %2310 = vmatmul.msk.f32.gmra.mxu3 %vm1014_vm5, %v3131_v12 }
 0x11b   : > { %v1207_v16 = vpop.f32.mrf.mxu2 }
 0x11c   : > { %1253 = vst.msk [vmem:[#allocation2 + $0xc8] sm:$0xff] %vm915_vm4, %v1207_v16 }
 0x11e   : > { %v959_v31 = vpop.permute.xlu0 %958 }
 0x11f   : > { %v825_v43 = vpop.permute.xlu1 %824  ;;  %v974_v20 = vsel %vm882_vm3, 0.0, %v959_v31 }
 0x120   : > { %v976_v38 = vsel %vm915_vm4, %v974_v20, %v970_v26 }
 0x121   : > { %2241 = vmatmul.msk.f32.gmra.mxu0 %vm1014_vm5, %v929_v42  ;;  %2274 = vmatmul.msk.f32.gmra.mxu1 %vm1014_vm5, %v929_v42 }
 0x122   : > { %2292 = vmatmul.msk.f32.vlgmr.msra.gmra.mxu2 %vm1014_vm5, %v975_v52  ;;  %2311 = vmatmul.msk.f32.gmra.mxu3 %vm1014_vm5, %v3145_v35 }
 0x123   : > { %v1210_v19 = vpop.f32.mrf.mxu2  ;;  %2325 = vmatpush.msk.msra.mxu2 %vm1111_vm2, %v2771_v39  ;;  %v3162_v39 = vsel %vm915_vm4, %v902_v34, %v825_v43 }
 0x124   : > { %1254 = vst.msk [vmem:[#allocation2 + $0xd0] sm:$0xff] %vm915_vm4, %v1210_v19 }
 0x125   : > { %v1138_v29 = vpop.f32.mrf.mxu0  ;;  %1718 = vmatpush.msra.mxu2 %v2826_v60  ;;  %v1310_v60 = vpop.f32.mrf.mxu1 }
 0x126   : > { %1230 = vst.msk [vmem:[#allocation2 + $0x10] sm:$0xff] %vm915_vm4, %v1138_v29  ;;  %v650_v36 = vpop.permute.xlu0 %649 }
 0x127   : > { %v903_v47 = vsel %vm882_vm3, %v2930_v7, %v650_v36  ;;  %v827_v46 = vpop.permute.xlu1 %826  ;;  %v652_v7 = vpop.permute.xlu2 %651 }
 0x128   : > { %v3172_v42 = vsel %vm915_vm4, %v903_v47, %v827_v46  ;;  %v904_v54 = vsel %vm882_vm3, %v2933_v10, %v652_v7 }
 0x129   : > { %2242 = vmatmul.msk.f32.gmra.mxu0 %vm1014_vm5, %v930_v28  ;;  %2275 = vmatmul.msk.f32.gmra.mxu1 %vm1014_vm5, %v930_v28 }
 0x12a   : > { %2293 = vmatmul.msk.f32.gmra.mxu2 %vm1014_vm5, %v976_v38  ;;  %2312 = vmatmul.msk.f32.gmra.mxu3 %vm1014_vm5, %v3162_v39 }
 0x12b   : > { %v1284_v36 = vld [vmem:[#allocation2 + $0xd0] sm:$0xff] }
 0x12c   : > { %v1213_v40 = vpop.f32.mrf.mxu2 }
 0x12d   : > { %v1260_v24 = vld [vmem:[#allocation2 + $0x10] sm:$0xff]  ;;  %1255 = vst.msk [vmem:[#allocation2 + $0xd8] sm:$0xff] %vm915_vm4, %v1213_v40  ;;  %v1141_v63 = vpop.f32.mrf.mxu0  ;;  %v1313_v6 = vpop.f32.mrf.mxu1 }
 0x12e   : > { %v1400_v41 = vadd.f32 %v1310_v60, %v1260_v24  ;;  %1231 = vst.msk [vmem:[#allocation2 + $0x18] sm:$0xff] %vm915_vm4, %v1141_v63  ;;  %v829_v33 = vpop.permute.xlu0 %828 }
 0x12f   : > { %v3187_v55 = vsel %vm915_vm4, %v904_v54, %v829_v33 }
 0x130   : > { %1430 = vst.msk [vmem:[#allocation2 + $0x10] sm:$0xff] %vm915_vm4, %v1400_v41 }
 0x131   : > { %2243 = vmatmul.msk.f32.gmra.mxu0 %vm1014_vm5, %v3104_v56  ;;  %2276 = vmatmul.msk.f32.gmra.mxu1 %vm1014_vm5, %v3104_v56  ;;  %v831_v56 = vpop.permute.xlu2 %830 }
 0x132   : > { %2295 = vmatmul.msk.f32.vlgmr.msrb.gmra.mxu2 %vm1014_vm5, %v2917_v0  ;;  %2313 = vmatmul.msk.f32.gmra.mxu3 %vm1014_vm5, %v3172_v42  ;;  %v654_v0 = vpop.permute.xlu1 %653 }
 0x133   : > { %v905_v49 = vsel %vm882_vm3, %v2961_v37, %v654_v0 }
 0x134   : > { %v1285_v41 = vld [vmem:[#allocation2 + $0xd8] sm:$0xff] }
 0x135   : > { %v1261_v25 = vld [vmem:[#allocation2 + $0x18] sm:$0xff]  ;;  %v1144_v28 = vpop.f32.mrf.mxu0  ;;  %v1316_v10 = vpop.f32.mrf.mxu1 }
 0x136   : > { %v1401_v22 = vadd.f32 %v1313_v6, %v1261_v25  ;;  %1232 = vst.msk [vmem:[#allocation2 + $0x20] sm:$0xff] %vm915_vm4, %v1144_v28 }
 0x138   : > { %1431 = vst.msk [vmem:[#allocation2 + $0x18] sm:$0xff] %vm915_vm4, %v1401_v22 }
 0x139   : > { %2244 = vmatmul.msk.f32.gmra.mxu0 %vm1014_vm5, %v3116_v3  ;;  %2277 = vmatmul.msk.f32.gmra.mxu1 %vm1014_vm5, %v3116_v3  ;;  %v938_v3 = vsel %vm915_vm4, %v905_v49, %v831_v56  ;;  %v986_v18 = vpop.permute.xlu2 %985 }
 0x13a   : > { %2296 = vmatmul.msk.f32.gmra.mxu2 %vm1014_vm5, %v2949_v11  ;;  %2314 = vmatmul.msk.f32.gmra.mxu3 %vm1014_vm5, %v3187_v55  ;;  %v656_v11 = vpop.permute.xlu0 %655  ;;  %v833_v51 = vpop.permute.xlu1 %832  ;;  %v1002_v50 = vsel %vm882_vm3, 0.0, %v986_v18 }
 0x13b   : > { %v906_v37 = vsel %vm882_vm3, %v2964_v61, %v656_v11 }
 0x13c   : > { %v1216_v1 = vpop.f32.mrf.mxu2  ;;  %v939_v9 = vsel %vm915_vm4, %v906_v37, %v833_v51 }
 0x13d   : > { %v1262_v58 = vld [vmem:[#allocation2 + $0x20] sm:$0xff]  ;;  %1256 = vst.msk [vmem:[#allocation2 + $0xe0] sm:$0xff] %vm915_vm4, %v1216_v1  ;;  %v1147_v44 = vpop.f32.mrf.mxu0  ;;  %v1319_v53 = vpop.f32.mrf.mxu1 }
 0x13e   : > { %v1402_v5 = vadd.f32 %v1316_v10, %v1262_v58  ;;  %1233 = vst.msk [vmem:[#allocation2 + $0x28] sm:$0xff] %vm915_vm4, %v1147_v44 }
 0x140   : > { %1432 = vst.msk [vmem:[#allocation2 + $0x20] sm:$0xff] %vm915_vm4, %v1402_v5 }
 0x141   : > { %2245 = vmatmul.msk.f32.gmra.mxu0 %vm1014_vm5, %v3131_v12  ;;  %2278 = vmatmul.msk.f32.gmra.mxu1 %vm1014_vm5, %v3131_v12  ;;  %v999_v20 = vpop.permute.xlu2 %998 }
 0x142   : > { %2297 = vmatmul.msk.f32.gmra.mxu2 %vm1014_vm5, %v2968_v57  ;;  %2315 = vmatmul.msk.f32.gmra.mxu3 %vm1014_vm5, %v938_v3  ;;  %v997_v31 = vpop.permute.xlu0 %996 }
 0x145   : > { %v1263_v45 = vld [vmem:[#allocation2 + $0x28] sm:$0xff]  ;;  %v1322_v57 = vpop.f32.mrf.mxu1 }
 0x146   : > { %v1403_v15 = vadd.f32 %v1319_v53, %v1263_v45  ;;  %v1150_v62 = vpop.f32.mrf.mxu0 }
 0x147   : > { %1234 = vst.msk [vmem:[#allocation2 + $0x30] sm:$0xff] %vm915_vm4, %v1150_v62 }
 0x148   : > { %1433 = vst.msk [vmem:[#allocation2 + $0x28] sm:$0xff] %vm915_vm4, %v1403_v15 }
 0x149   : > { %2246 = vmatmul.msk.f32.gmra.mxu0 %vm1014_vm5, %v3145_v35  ;;  %2279 = vmatmul.msk.f32.gmra.mxu1 %vm1014_vm5, %v3145_v35  ;;  %v1004_v35 = vsel %vm915_vm4, %v1002_v50, %v997_v31 }
 0x14a   : > { %2298 = vmatmul.msk.f32.gmra.mxu2 %vm1014_vm5, %v3000_v27  ;;  %2316 = vmatmul.msk.f32.gmra.mxu3 %vm1014_vm5, %v939_v9  ;;  %v1563_v27 = vpop.f32.mrf.mxu3 }
 0x14c   : > { %v1219_v61 = vpop.f32.mrf.mxu2 }
 0x14d   : > { %1257 = vst.msk [vmem:[#allocation2 + $0xe8] sm:$0xff] %vm915_vm4, %v1219_v61  ;;  %v1325_v52 = vpop.f32.mrf.mxu1 }
 0x14e   : > { %v1264_v12 = vld [vmem:[#allocation2 + $0x30] sm:$0xff] }
 0x14f   : > { %v1404_v13 = vadd.f32 %v1322_v57, %v1264_v12 }
 0x151   : > { %1434 = vst.msk [vmem:[#allocation2 + $0x30] sm:$0xff] %vm915_vm4, %v1404_v13  ;;  %2247 = vmatmul.msk.f32.gmra.mxu0 %vm1014_vm5, %v3162_v39  ;;  %2280 = vmatmul.msk.f32.gmra.mxu1 %vm1014_vm5, %v3162_v39 }
 0x152   : > { %2299 = vmatmul.msk.f32.gmra.mxu2 %vm1014_vm5, %v3023_v4  ;;  %2317 = vmatmul.msk.f32.gmra.mxu3 %vm1014_vm5, %v2757_v30  ;;  %v1566_v30 = vpop.f32.mrf.mxu3 }
 0x155   : > { %v1328_v26 = vpop.f32.mrf.mxu1 }
 0x158   : > { %v1501_v48 = vld [vmem:[#allocation2 + $0x30] sm:$0xff] }
 0x159   : > { %v1641_v16 = vadd.f32 %v1563_v27, %v1501_v48  ;;  %2248 = vmatmul.msk.f32.gmra.mxu0 %vm1014_vm5, %v3172_v42  ;;  %2281 = vmatmul.msk.f32.gmra.mxu1 %vm1014_vm5, %v3172_v42 }
 0x15a   : > { %2300 = vmatmul.msk.f32.gmra.mxu2 %vm1014_vm5, %v3070_v23  ;;  %2318 = vmatmul.msk.f32.gmra.mxu3 %vm1014_vm5, %v2818_v59  ;;  %v988_v23 = vpop.permute.xlu1 %987 }
 0x15b   : > { %1671 = vst.msk [vmem:[#allocation2 + $0x30] sm:$0xff] %vm915_vm4, %v1641_v16  ;;  %v1569_v19 = vpop.f32.mrf.mxu3  ;;  %v1003_v43 = vsel %vm882_vm3, 0.0, %v988_v23 }
 0x15c   : > { %v1222_v4 = vpop.f32.mrf.mxu2  ;;  %v1005_v29 = vsel %vm915_vm4, %v1003_v43, %v999_v20 }
 0x15d   : > { %1258 = vst.msk [vmem:[#allocation2 + $0xf0] sm:$0xff] %vm915_vm4, %v1222_v4 }
 0x161   : > { %2249 = vmatmul.msk.f32.gmra.mxu0 %vm1014_vm5, %v3187_v55  ;;  %2282 = vmatmul.msk.f32.gmra.mxu1 %vm1014_vm5, %v3187_v55 }
 0x162   : > { %v3249_v59 = vld [vmem:[#allocation2 + $0x30] sm:$0xff]  ;;  %2326 = vmatmul.msk.f32.vlgmr.msra.gmra.mxu2 %vm1014_vm5, %v1004_v35  ;;  %2319 = vmatmul.msk.f32.gmra.mxu3 %vm1014_vm5, %v2870_v14 }
 0x163   : > { %1975 = vst.msk [vmem:[%s2706_s11 + $0x49] sm:$0xff] %vm915_vm4, %v3249_v59 }
 0x164   : > { %v1288_v57 = vld [vmem:[#allocation2 + $0xf0] sm:$0xff] }
 0x169   : > { %2250 = vmatmul.msk.f32.gmra.mxu0 %vm1014_vm5, %v938_v3  ;;  %2283 = vmatmul.msk.f32.gmra.mxu1 %vm1014_vm5, %v938_v3  ;;  %v1287_v3 = vld [vmem:[#allocation2 + $0xe8] sm:$0xff] }
 0x16a   : > { %2327 = vmatmul.msk.f32.gmra.mxu2 %vm1014_vm5, %v1005_v29  ;;  %2320 = vmatmul.msk.f32.gmra.mxu3 %vm1014_vm5, %v2922_v32 }
 0x16b   : > { %v3264_v14 = vpop.f32.mrf.mxu3 }
 0x16c   : > { %v1225_v34 = vpop.f32.mrf.mxu2 }
 0x16d   : > { %1259 = vst.msk [vmem:[#allocation2 + $0xf8] sm:$0xff] %vm915_vm4, %v1225_v34 }
 0x16e   : > { %v1153_v38 = vpop.f32.mrf.mxu0  ;;  %v1331_v39 = vpop.f32.mrf.mxu1 }
 0x16f   : > { %1235 = vst.msk [vmem:[#allocation2 + $0x38] sm:$0xff] %vm915_vm4, %v1153_v38 }
 0x171   : > { %2251 = vmatmul.msk.f32.gmra.mxu0 %vm1014_vm5, %v939_v9  ;;  %2284 = vmatmul.msk.f32.gmra.mxu1 %vm1014_vm5, %v939_v9 }
 0x172   : > { %2321 = vmatmul.msk.f32.gmra.mxu3 %vm1014_vm5, %v2983_v17 }
 0x175   : > { %v1382_v60 = vpop.f32.mrf.mxu2  ;;  %v3272_v40 = vpop.f32.mrf.mxu3 }
 0x176   : > { %v1265_v32 = vld [vmem:[#allocation2 + $0x38] sm:$0xff]  ;;  %v1424_v47 = vadd.f32 %v1382_v60, %v1284_v36  ;;  %v1156_v46 = vpop.f32.mrf.mxu0  ;;  %v1334_v24 = vpop.f32.mrf.mxu1 }
 0x177   : > { %v1405_v63 = vadd.f32 %v1325_v52, %v1265_v32  ;;  %1236 = vst.msk [vmem:[#allocation2 + $0x40] sm:$0xff] %vm915_vm4, %v1156_v46  ;;  %v1289_v52 = vld [vmem:[#allocation2 + $0xf8] sm:$0xff] }
 0x178   : > { %1454 = vst.msk [vmem:[#allocation2 + $0xd0] sm:$0xff] %vm915_vm4, %v1424_v47 }
 0x179   : > { %1435 = vst.msk [vmem:[#allocation2 + $0x38] sm:$0xff] %vm915_vm4, %v1405_v63 }
 0x17a   : > { %2322 = vmatmul.msk.f32.gmra.mxu3 %vm1014_vm5, %v3026_v8  ;;  %v1286_v8 = vld [vmem:[#allocation2 + $0xe0] sm:$0xff] }
 0x17d   : > { %v1385_v17 = vpop.f32.mrf.mxu2  ;;  %v3279_v42 = vpop.f32.mrf.mxu3 }
 0x17e   : > { %v1266_v7 = vld [vmem:[#allocation2 + $0x40] sm:$0xff]  ;;  %v1425_v6 = vadd.f32 %v1385_v17, %v1285_v41  ;;  %v1159_v54 = vpop.f32.mrf.mxu0  ;;  %v1337_v33 = vpop.f32.mrf.mxu1 }
 0x17f   : > { %v1406_v25 = vadd.f32 %v1328_v26, %v1266_v7  ;;  %1237 = vst.msk [vmem:[#allocation2 + $0x48] sm:$0xff] %vm915_vm4, %v1159_v54 }
 0x180   : > { %v1502_v28 = vld [vmem:[#allocation2 + $0x38] sm:$0xff]  ;;  %1455 = vst.msk [vmem:[#allocation2 + $0xd8] sm:$0xff] %vm915_vm4, %v1425_v6 }
 0x181   : > { %v1642_v22 = vadd.f32 %v1566_v30, %v1502_v28  ;;  %1436 = vst.msk [vmem:[#allocation2 + $0x40] sm:$0xff] %vm915_vm4, %v1406_v25 }
 0x182   : > { %2323 = vmatmul.msk.f32.gmra.mxu3 %vm1014_vm5, %v3049_v2 }
 0x183   : > { %1672 = vst.msk [vmem:[#allocation2 + $0x38] sm:$0xff] %vm915_vm4, %v1642_v22 }
 0x185   : > { %v1388_v55 = vpop.f32.mrf.mxu2  ;;  %v3287_v0 = vpop.f32.mrf.mxu3 }
 0x186   : > { %v1267_v10 = vld [vmem:[#allocation2 + $0x48] sm:$0xff]  ;;  %v1426_v1 = vadd.f32 %v1388_v55, %v1286_v8  ;;  %v1162_v49 = vpop.f32.mrf.mxu0  ;;  %v1340_v56 = vpop.f32.mrf.mxu1 }
 0x187   : > { %v1407_v58 = vadd.f32 %v1331_v39, %v1267_v10  ;;  %1238 = vst.msk [vmem:[#allocation2 + $0x50] sm:$0xff] %vm915_vm4, %v1162_v49  ;;  %v1460_v39 = vld [vmem:[#allocation2] sm:$0xff] }
 0x188   : > { %v1503_v44 = vld [vmem:[#allocation2 + $0x40] sm:$0xff]  ;;  %1456 = vst.msk [vmem:[#allocation2 + $0xe0] sm:$0xff] %vm915_vm4, %v1426_v1 }
 0x189   : > { %v1643_v5 = vadd.f32 %v1569_v19, %v1503_v44  ;;  %1437 = vst.msk [vmem:[#allocation2 + $0x48] sm:$0xff] %vm915_vm4, %v1407_v58 }
 0x18a   : > { %v3292_v2 = vld [vmem:[#allocation2 + $0x38] sm:$0xff]  ;;  %2324 = vmatmul.msk.f32.gmra.mxu3 %vm1014_vm5, %v3060_v21 }
 0x18b   : > { %1976 = vst.msk [vmem:[%s2706_s11 + $0x51] sm:$0xff] %vm915_vm4, %v3292_v2 }
 0x18c   : > { %1673 = vst.msk [vmem:[#allocation2 + $0x40] sm:$0xff] %vm915_vm4, %v1643_v5 }
 0x18d   : > { %v1391_v11 = vpop.f32.mrf.mxu2  ;;  %v3300_v37 = vpop.f32.mrf.mxu3 }
 0x18e   : > { %v1268_v51 = vld [vmem:[#allocation2 + $0x50] sm:$0xff]  ;;  %v1427_v53 = vadd.f32 %v1391_v11, %v1287_v3  ;;  %v1165_v45 = vpop.f32.mrf.mxu0  ;;  %v1343_v15 = vpop.f32.mrf.mxu1 }
 0x18f   : > { %v1408_v62 = vadd.f32 %v1334_v24, %v1268_v51  ;;  %1239 = vst.msk [vmem:[#allocation2 + $0x58] sm:$0xff] %vm915_vm4, %v1165_v45 }
 0x190   : > { %v1504_v9 = vld [vmem:[#allocation2 + $0x48] sm:$0xff]  ;;  %1457 = vst.msk [vmem:[#allocation2 + $0xe8] sm:$0xff] %vm915_vm4, %v1427_v53 }
 0x191   : > { %v1644_v21 = vadd.f32 %v3264_v14, %v1504_v9  ;;  %1438 = vst.msk [vmem:[#allocation2 + $0x50] sm:$0xff] %vm915_vm4, %v1408_v62 }
 0x193   : > { %v3306_v61 = vld [vmem:[#allocation2 + $0x40] sm:$0xff]  ;;  %1674 = vst.msk [vmem:[#allocation2 + $0x48] sm:$0xff] %vm915_vm4, %v1644_v21 }
 0x194   : > { %1977 = vst.msk [vmem:[%s2706_s11 + $0x61] sm:$0xff] %vm915_vm4, %v3306_v61 }
 0x195   : > { %v1394_v12 = vpop.f32.mrf.mxu2  ;;  %v3312_v13 = vpop.f32.mrf.mxu3 }
 0x196   : > { %v1269_v27 = vld [vmem:[#allocation2 + $0x58] sm:$0xff]  ;;  %v1428_v48 = vadd.f32 %v1394_v12, %v1288_v57  ;;  %v1168_v16 = vpop.f32.mrf.mxu0  ;;  %v1346_v18 = vpop.f32.mrf.mxu1 }
 0x197   : > { %v1409_v30 = vadd.f32 %v1337_v33, %v1269_v27  ;;  %1240 = vst.msk [vmem:[#allocation2 + $0x60] sm:$0xff] %vm915_vm4, %v1168_v16 }
 0x198   : > { %v1505_v4 = vld [vmem:[#allocation2 + $0x50] sm:$0xff]  ;;  %1458 = vst.msk [vmem:[#allocation2 + $0xf0] sm:$0xff] %vm915_vm4, %v1428_v48 }
 0x199   : > { %v1645_v50 = vadd.f32 %v3272_v40, %v1505_v4  ;;  %1439 = vst.msk [vmem:[#allocation2 + $0x58] sm:$0xff] %vm915_vm4, %v1409_v30 }
 0x19a   : > { %v3318_v31 = vld [vmem:[#allocation2 + $0x48] sm:$0xff] }
 0x19b   : > { %1978 = vst.msk [vmem:[%s2706_s11 + $0x69] sm:$0xff] %vm915_vm4, %v3318_v31 }
 0x19c   : > { %1675 = vst.msk [vmem:[#allocation2 + $0x50] sm:$0xff] %vm915_vm4, %v1645_v50 }
 0x19d   : > { %v1397_v35 = vpop.f32.mrf.mxu2  ;;  %v3324_v23 = vpop.f32.mrf.mxu3 }
 0x19e   : > { %v1270_v19 = vld [vmem:[#allocation2 + $0x60] sm:$0xff]  ;;  %v1429_v43 = vadd.f32 %v1397_v35, %v1289_v52  ;;  %v1171_v20 = vpop.f32.mrf.mxu0  ;;  %v1349_v26 = vpop.f32.mrf.mxu1 }
 0x19f   : > { %v1410_v29 = vadd.f32 %v1340_v56, %v1270_v19  ;;  %1241 = vst.msk [vmem:[#allocation2 + $0x68] sm:$0xff] %vm915_vm4, %v1171_v20 }
 0x1a0   : > { %v1506_v14 = vld [vmem:[#allocation2 + $0x58] sm:$0xff]  ;;  %1459 = vst.msk [vmem:[#allocation2 + $0xf8] sm:$0xff] %vm915_vm4, %v1429_v43 }
 0x1a1   : > { %v1646_v34 = vadd.f32 %v3279_v42, %v1506_v14  ;;  %1440 = vst.msk [vmem:[#allocation2 + $0x60] sm:$0xff] %vm915_vm4, %v1410_v29  ;;  %v1461_v42 = vld [vmem:[#allocation2 + $0x8] sm:$0xff]  ;;  %v1498_v14 = vld [vmem:[#allocation2 + $0x18] sm:$0xff] }
 0x1a3   : > { %v3330_v38 = vld [vmem:[#allocation2 + $0x50] sm:$0xff]  ;;  %1676 = vst.msk [vmem:[#allocation2 + $0x58] sm:$0xff] %vm915_vm4, %v1646_v34 }
 0x1a4   : > { %1979 = vst.msk [vmem:[%s2706_s11 + $0x79] sm:$0xff] %vm915_vm4, %v3330_v38 }
 0x1a5   : > { %v1485_v36 = vpop.f32.mrf.mxu2  ;;  %v3336_v60 = vpop.f32.mrf.mxu3 }
 0x1a6   : > { %v1271_v40 = vld [vmem:[#allocation2 + $0x68] sm:$0xff]  ;;  %v1491_v32 = vadd.f32 %v1485_v36, %v1460_v39  ;;  %v1174_v47 = vpop.f32.mrf.mxu0  ;;  %v1352_v46 = vpop.f32.mrf.mxu1 }
 0x1a7   : > { %v1411_v24 = vadd.f32 %v1343_v15, %v1271_v40  ;;  %1242 = vst.msk [vmem:[#allocation2 + $0x70] sm:$0xff] %vm915_vm4, %v1174_v47 }
 0x1a8   : > { %v1507_v63 = vld [vmem:[#allocation2 + $0x60] sm:$0xff]  ;;  %1493 = vst.msk [vmem:[#allocation2] sm:$0xff] %vm915_vm4, %v1491_v32 }
 0x1a9   : > { %v1647_v41 = vadd.f32 %v3287_v0, %v1507_v63  ;;  %1441 = vst.msk [vmem:[#allocation2 + $0x68] sm:$0xff] %vm915_vm4, %v1411_v24 }
 0x1aa   : > { %v3342_v17 = vld [vmem:[#allocation2 + $0x58] sm:$0xff] }
 0x1ab   : > { %1980 = vst.msk [vmem:[%s2706_s11 + $0x81] sm:$0xff] %vm915_vm4, %v3342_v17 }
 0x1ac   : > { %1677 = vst.msk [vmem:[#allocation2 + $0x60] sm:$0xff] %vm915_vm4, %v1647_v41 }
 0x1ad   : > { %v1488_v7 = vpop.f32.mrf.mxu2  ;;  %v3348_v6 = vpop.f32.mrf.mxu3 }
 0x1ae   : > { %v1272_v54 = vld [vmem:[#allocation2 + $0x70] sm:$0xff]  ;;  %v1492_v33 = vadd.f32 %v1488_v7, %v1461_v42  ;;  %v1177_v25 = vpop.f32.mrf.mxu0  ;;  %v1355_v28 = vpop.f32.mrf.mxu1  ;;  %v1499_v42 = vld [vmem:[#allocation2 + $0x20] sm:$0xff] }
 0x1af   : > { %v1412_v22 = vadd.f32 %v1346_v18, %v1272_v54  ;;  %1243 = vst.msk [vmem:[#allocation2 + $0x78] sm:$0xff] %vm915_vm4, %v1177_v25  ;;  %v1495_v10 = vld [vmem:[#allocation2] sm:$0xff]  ;;  %v1497_v18 = vld [vmem:[#allocation2 + $0x10] sm:$0xff] }
 0x1b0   : > { %v1508_v8 = vld [vmem:[#allocation2 + $0x68] sm:$0xff]  ;;  %1494 = vst.msk [vmem:[#allocation2 + $0x8] sm:$0xff] %vm915_vm4, %v1492_v33 }
 0x1b1   : > { %v1648_v55 = vadd.f32 %v3300_v37, %v1508_v8  ;;  %1442 = vst.msk [vmem:[#allocation2 + $0x70] sm:$0xff] %vm915_vm4, %v1412_v22 }
 0x1b3   : > { %v3354_v0 = vld [vmem:[#allocation2 + $0x60] sm:$0xff]  ;;  %1678 = vst.msk [vmem:[#allocation2 + $0x68] sm:$0xff] %vm915_vm4, %v1648_v55 }
 0x1b4   : > { %1981 = vst.msk [vmem:[%s2706_s11 + $0x91] sm:$0xff] %vm915_vm4, %v3354_v0 }
 0x1b5   : > { %v1545_v1 = vpop.f32.mrf.mxu2  ;;  %v3360_v49 = vpop.f32.mrf.mxu3 }
 0x1b6   : > { %v1273_v56 = vld [vmem:[#allocation2 + $0x78] sm:$0xff]  ;;  %v1635_v58 = vadd.f32 %v1545_v1, %v1495_v10  ;;  %v1180_v44 = vpop.f32.mrf.mxu0  ;;  %v1358_v5 = vpop.f32.mrf.mxu1 }
 0x1b7   : > { %v1413_v3 = vadd.f32 %v1349_v26, %v1273_v56  ;;  %1244 = vst.msk [vmem:[#allocation2 + $0x80] sm:$0xff] %vm915_vm4, %v1180_v44  ;;  %v1496_v53 = vld [vmem:[#allocation2 + $0x8] sm:$0xff] }
 0x1b8   : > { %v1509_v11 = vld [vmem:[#allocation2 + $0x70] sm:$0xff]  ;;  %1665 = vst.msk [vmem:[#allocation2] sm:$0xff] %vm915_vm4, %v1635_v58  ;;  %v1500_v56 = vld [vmem:[#allocation2 + $0x28] sm:$0xff] }
 0x1b9   : > { %v1649_v37 = vadd.f32 %v3312_v13, %v1509_v11  ;;  %1443 = vst.msk [vmem:[#allocation2 + $0x78] sm:$0xff] %vm915_vm4, %v1413_v3 }
 0x1ba   : > { %v3366_v51 = vld [vmem:[#allocation2 + $0x68] sm:$0xff] }
 0x1bb   : > { %1982 = vst.msk [vmem:[%s2706_s11 + $0x99] sm:$0xff] %vm915_vm4, %v3366_v51 }
 0x1bc   : > { %1679 = vst.msk [vmem:[#allocation2 + $0x70] sm:$0xff] %vm915_vm4, %v1649_v37 }
 0x1bd   : > { %v1548_v45 = vpop.f32.mrf.mxu2  ;;  %v3372_v15 = vpop.f32.mrf.mxu3 }
 0x1be   : > { %v1274_v62 = vld [vmem:[#allocation2 + $0x80] sm:$0xff]  ;;  %v1636_v9 = vadd.f32 %v1548_v45, %v1496_v53  ;;  %v1183_v21 = vpop.f32.mrf.mxu0  ;;  %v1361_v57 = vpop.f32.mrf.mxu1 }
 0x1bf   : > { %v3374_v12 = vld [vmem:[#allocation2] sm:$0xff]  ;;  %v1414_v13 = vadd.f32 %v1352_v46, %v1274_v62  ;;  %1245 = vst.msk [vmem:[#allocation2 + $0x88] sm:$0xff] %vm915_vm4, %v1183_v21 }
 0x1c0   : > { %v1510_v27 = vld [vmem:[#allocation2 + $0x78] sm:$0xff]  ;;  %1969 = vst.msk [vmem:[%s2706_s11 + $0x1] sm:$0xff] %vm915_vm4, %v3374_v12  ;;  %v1762_v21 = vsel %vm915_vm4, %v3374_v12, 0.0 }
 0x1c1   : > { %v1650_v48 = vadd.f32 %v3324_v23, %v1510_v27  ;;  %1444 = vst.msk [vmem:[#allocation2 + $0x80] sm:$0xff] %vm915_vm4, %v1414_v13 }
 0x1c2   : > { %1666 = vst.msk [vmem:[#allocation2 + $0x8] sm:$0xff] %vm915_vm4, %v1636_v9 }
 0x1c3   : > { %v3383_v16 = vld [vmem:[#allocation2 + $0x70] sm:$0xff]  ;;  %1680 = vst.msk [vmem:[#allocation2 + $0x78] sm:$0xff] %vm915_vm4, %v1650_v48 }
 0x1c4   : > { %1983 = vst.msk [vmem:[%s2706_s11 + $0xa9] sm:$0xff] %vm915_vm4, %v3383_v16 }
 0x1c5   : > { %v1551_v30 = vpop.f32.mrf.mxu2  ;;  %v3389_v4 = vpop.f32.mrf.mxu3 }
 0x1c6   : > { %v1275_v50 = vld [vmem:[#allocation2 + $0x88] sm:$0xff]  ;;  %v1637_v52 = vadd.f32 %v1551_v30, %v1497_v18  ;;  %v1186_v35 = vpop.f32.mrf.mxu0  ;;  %v1364_v23 = vpop.f32.mrf.mxu1  ;;  %v1695_v18 = vld [vmem:[#allocation2 + $0xf0] sm:$0xff] }
 0x1c7   : > { %v1415_v19 = vadd.f32 %v1355_v28, %v1275_v50  ;;  %1246 = vst.msk [vmem:[#allocation2 + $0x90] sm:$0xff] %vm915_vm4, %v1186_v35 }
 0x1c8   : > { %v1511_v43 = vld [vmem:[#allocation2 + $0x80] sm:$0xff]  ;;  %1667 = vst.msk [vmem:[#allocation2 + $0x10] sm:$0xff] %vm915_vm4, %v1637_v52 }
 0x1c9   : > { %v1651_v20 = vadd.f32 %v3336_v60, %v1511_v43  ;;  %v3394_v26 = vld [vmem:[#allocation2 + $0x8] sm:$0xff]  ;;  %1445 = vst.msk [vmem:[#allocation2 + $0x88] sm:$0xff] %vm915_vm4, %v1415_v19 }
 0x1ca   : > { %v3397_v29 = vld [vmem:[#allocation2 + $0x78] sm:$0xff]  ;;  %1970 = vst.msk [vmem:[%s2706_s11 + $0x9] sm:$0xff] %vm915_vm4, %v3394_v26  ;;  %v1763_v45 = vsel %vm915_vm4, %v3394_v26, 0.0 }
 0x1cb   : > { %1984 = vst.msk [vmem:[%s2706_s11 + $0xb1] sm:$0xff] %vm915_vm4, %v3397_v29  ;;  %v1764_v13 = vadd.f32 %v1763_v45, %v1762_v21 }
 0x1cc   : > { %1681 = vst.msk [vmem:[#allocation2 + $0x80] sm:$0xff] %vm915_vm4, %v1651_v20 }
 0x1cd   : > { %v1554_v34 = vpop.f32.mrf.mxu2  ;;  %v3406_v39 = vpop.f32.mrf.mxu3 }
 0x1ce   : > { %v1276_v36 = vld [vmem:[#allocation2 + $0x90] sm:$0xff]  ;;  %v1638_v60 = vadd.f32 %v1554_v34, %v1498_v14  ;;  %v1189_v40 = vpop.f32.mrf.mxu0  ;;  %v3408_v32 = vpop.f32.mrf.mxu1 }
 0x1cf   : > { %v3410_v47 = vld [vmem:[#allocation2 + $0x10] sm:$0xff]  ;;  %v1416_v46 = vadd.f32 %v1358_v5, %v1276_v36  ;;  %1247 = vst.msk [vmem:[#allocation2 + $0x98] sm:$0xff] %vm915_vm4, %v1189_v40  ;;  %v1282_v36 = vld [vmem:[#allocation2 + $0xc0] sm:$0xff] }
 0x1d0   : > { %v1512_v24 = vld [vmem:[#allocation2 + $0x88] sm:$0xff]  ;;  %1971 = vst.msk [vmem:[%s2706_s11 + $0x19] sm:$0xff] %vm915_vm4, %v3410_v47 }
 0x1d1   : > { %v1652_v63 = vadd.f32 %v3348_v6, %v1512_v24  ;;  %1446 = vst.msk [vmem:[#allocation2 + $0x90] sm:$0xff] %vm915_vm4, %v1416_v46 }
 0x1d2   : > { %1668 = vst.msk [vmem:[#allocation2 + $0x18] sm:$0xff] %vm915_vm4, %v1638_v60 }
 0x1d3   : > { %v3419_v41 = vld [vmem:[#allocation2 + $0x80] sm:$0xff]  ;;  %1682 = vst.msk [vmem:[#allocation2 + $0x88] sm:$0xff] %vm915_vm4, %v1652_v63 }
 0x1d4   : > { %1985 = vst.msk [vmem:[%s2706_s11 + $0xc1] sm:$0xff] %vm915_vm4, %v3419_v41 }
 0x1d5   : > { %v1557_v7 = vpop.f32.mrf.mxu2  ;;  %v3425_v54 = vpop.f32.mrf.mxu3 }
 0x1d6   : > { %v1277_v33 = vld [vmem:[#allocation2 + $0x98] sm:$0xff]  ;;  %v1639_v25 = vadd.f32 %v1557_v7, %v1499_v42  ;;  %v1192_v6 = vpop.f32.mrf.mxu0  ;;  %v3427_v28 = vpop.f32.mrf.mxu1 }
 0x1d7   : > { %v1417_v22 = vadd.f32 %v1361_v57, %v1277_v33  ;;  %1248 = vst.msk [vmem:[#allocation2 + $0xa0] sm:$0xff] %vm915_vm4, %v1192_v6  ;;  %v1765_v57 = vsel %vm915_vm4, %v3410_v47, 0.0  ;;  %v1696_v33 = vld [vmem:[#allocation2 + $0xf8] sm:$0xff] }
 0x1d8   : > { %v1513_v8 = vld [vmem:[#allocation2 + $0x90] sm:$0xff]  ;;  %1669 = vst.msk [vmem:[#allocation2 + $0x20] sm:$0xff] %vm915_vm4, %v1639_v25  ;;  %v1766_v48 = vadd.f32 %v1765_v57, %v1764_v13 }
 0x1d9   : > { %v1653_v55 = vadd.f32 %v3360_v49, %v1513_v8  ;;  %v3432_v10 = vld [vmem:[#allocation2 + $0x18] sm:$0xff]  ;;  %1447 = vst.msk [vmem:[#allocation2 + $0x98] sm:$0xff] %vm915_vm4, %v1417_v22  ;;  %v1775_v22 = vsel %vm915_vm4, %v3292_v2, 0.0 }
 0x1da   : > { %v3435_v1 = vld [vmem:[#allocation2 + $0x88] sm:$0xff]  ;;  %1972 = vst.msk [vmem:[%s2706_s11 + $0x21] sm:$0xff] %vm915_vm4, %v3432_v10 }
 0x1db   : > { %1986 = vst.msk [vmem:[%s2706_s11 + $0xc9] sm:$0xff] %vm915_vm4, %v3435_v1 }
 0x1dc   : > { %1683 = vst.msk [vmem:[#allocation2 + $0x90] sm:$0xff] %vm915_vm4, %v1653_v55 }
 0x1dd   : > { %v1560_v58 = vpop.f32.mrf.mxu2  ;;  %v3444_v44 = vpop.f32.mrf.mxu3 }
 0x1de   : > { %v1278_v49 = vld [vmem:[#allocation2 + $0xa0] sm:$0xff]  ;;  %v1640_v5 = vadd.f32 %v1560_v58, %v1500_v56  ;;  %v1195_v3 = vpop.f32.mrf.mxu0  ;;  %v3446_v11 = vpop.f32.mrf.mxu1 }
 0x1df   : > { %v3448_v37 = vld [vmem:[#allocation2 + $0x20] sm:$0xff]  ;;  %v1418_v53 = vadd.f32 %v1364_v23, %v1278_v49  ;;  %1249 = vst.msk [vmem:[#allocation2 + $0xa8] sm:$0xff] %vm915_vm4, %v1195_v3 }
 0x1e0   : > { %v1514_v62 = vld [vmem:[#allocation2 + $0x98] sm:$0xff]  ;;  %1973 = vst.msk [vmem:[%s2706_s11 + $0x31] sm:$0xff] %vm915_vm4, %v3448_v37  ;;  %v1769_v52 = vsel %vm915_vm4, %v3448_v37, 0.0 }
 0x1e1   : > { %v1654_v9 = vadd.f32 %v3372_v15, %v1514_v62  ;;  %1448 = vst.msk [vmem:[#allocation2 + $0xa0] sm:$0xff] %vm915_vm4, %v1418_v53  ;;  %v1767_v15 = vsel %vm915_vm4, %v3432_v10, 0.0  ;;  %v1777_v53 = vsel %vm915_vm4, %v3306_v61, 0.0  ;;  %v1283_v62 = vld [vmem:[#allocation2 + $0xc8] sm:$0xff] }
 0x1e2   : > { %1670 = vst.msk [vmem:[#allocation2 + $0x28] sm:$0xff] %vm915_vm4, %v1640_v5  ;;  %v1768_v20 = vadd.f32 %v1767_v15, %v1766_v48  ;;  %v1781_v48 = vsel %vm915_vm4, %v3330_v38, 0.0 }
 0x1e3   : > { %v3463_v27 = vld [vmem:[#allocation2 + $0x90] sm:$0xff]  ;;  %1684 = vst.msk [vmem:[#allocation2 + $0x98] sm:$0xff] %vm915_vm4, %v1654_v9 }
 0x1e4   : > { %1987 = vst.msk [vmem:[%s2706_s11 + $0xd9] sm:$0xff] %vm915_vm4, %v3463_v27  ;;  %v1770_v60 = vadd.f32 %v1769_v52, %v1768_v20  ;;  %v1521_v52 = vld [vmem:[#allocation2 + $0xd0] sm:$0xff] }
 0x1e5   : > { %v1720_v30 = vpop.f32.mrf.mxu2  ;;  %v1617_v50 = vpop.f32.mrf.mxu3 }
 0x1e6   : > { %v1279_v35 = vld [vmem:[#allocation2 + $0xa8] sm:$0xff]  ;;  %v1726_v23 = vadd.f32 %v1720_v30, %v1695_v18  ;;  %v1198_v19 = vpop.f32.mrf.mxu0  ;;  %v1376_v43 = vpop.f32.mrf.mxu1 }
 0x1e7   : > { %v1419_v14 = vadd.f32 %v3408_v32, %v1279_v35  ;;  %1250 = vst.msk [vmem:[#allocation2 + $0xb0] sm:$0xff] %vm915_vm4, %v1198_v19  ;;  %v1422_v24 = vadd.f32 %v1376_v43, %v1282_v36 }
 0x1e8   : > { %v1515_v34 = vld [vmem:[#allocation2 + $0xa0] sm:$0xff]  ;;  %1728 = vst.msk [vmem:[#allocation2 + $0xf0] sm:$0xff] %vm915_vm4, %v1726_v23  ;;  %v1783_v23 = vsel %vm915_vm4, %v3342_v17, 0.0 }
 0x1e9   : > { %v1655_v40 = vadd.f32 %v3389_v4, %v1515_v34  ;;  %v3477_v46 = vld [vmem:[#allocation2 + $0x28] sm:$0xff]  ;;  %1449 = vst.msk [vmem:[#allocation2 + $0xa8] sm:$0xff] %vm915_vm4, %v1419_v14  ;;  %v1773_v4 = vsel %vm915_vm4, %v3249_v59, 0.0  ;;  %v1785_v34 = vsel %vm915_vm4, %v3354_v0, 0.0 }
 0x1ea   : > { %v3480_v63 = vld [vmem:[#allocation2 + $0x98] sm:$0xff]  ;;  %v1771_v42 = vsel %vm915_vm4, %v3477_v46, 0.0  ;;  %1974 = vst.msk [vmem:[%s2706_s11 + $0x39] sm:$0xff] %vm915_vm4, %v3477_v46 }
 0x1eb   : > { %1988 = vst.msk [vmem:[%s2706_s11 + $0xe1] sm:$0xff] %vm915_vm4, %v3480_v63  ;;  %v1772_v32 = vadd.f32 %v1771_v42, %v1770_v60 }
 0x1ec   : > { %1685 = vst.msk [vmem:[#allocation2 + $0xa0] sm:$0xff] %vm915_vm4, %v1655_v40 }
 0x1ed   : > { %v1774_v7 = vadd.f32 %v1773_v4, %v1772_v32  ;;  %1452 = vst.msk [vmem:[#allocation2 + $0xc0] sm:$0xff] %vm915_vm4, %v1422_v24  ;;  %v1723_v25 = vpop.f32.mrf.mxu2  ;;  %v1620_v6 = vpop.f32.mrf.mxu3  ;;  %v1787_v24 = vsel %vm915_vm4, %v3366_v51, 0.0 }
 0x1ee   : > { %v1280_v8 = vld [vmem:[#allocation2 + $0xb0] sm:$0xff]  ;;  %v1727_v55 = vadd.f32 %v1723_v25, %v1696_v33  ;;  %v1201_v56 = vpop.f32.mrf.mxu0  ;;  %v1379_v58 = vpop.f32.mrf.mxu1  ;;  %v1522_v33 = vld [vmem:[#allocation2 + $0xd8] sm:$0xff] }
 0x1ef   : > { %v1776_v49 = vadd.f32 %v1775_v22, %v1774_v7  ;;  %v3496_v5 = vld [vmem:[#allocation2 + $0xf0] sm:$0xff]  ;;  %v1420_v3 = vadd.f32 %v3427_v28, %v1280_v8  ;;  %1251 = vst.msk [vmem:[#allocation2 + $0xb8] sm:$0xff] %vm915_vm4, %v1201_v56  ;;  %v1423_v57 = vadd.f32 %v1379_v58, %v1283_v62  ;;  %v1779_v28 = vsel %vm915_vm4, %v3318_v31, 0.0 }
 0x1f0   : > { %v1516_v45 = vld [vmem:[#allocation2 + $0xa8] sm:$0xff]  ;;  %1999 = vst.msk [vmem:[%s2706_s11 + $0x169] sm:$0xff] %vm915_vm4, %v3496_v5  ;;  %v1791_v22 = vsel %vm915_vm4, %v3397_v29, 0.0 }
 0x1f1   : > { %v1778_v9 = vadd.f32 %v1777_v53, %v1776_v49  ;;  %v1656_v21 = vadd.f32 %v3406_v39, %v1516_v45  ;;  %1450 = vst.msk [vmem:[#allocation2 + $0xb0] sm:$0xff] %vm915_vm4, %v1420_v3  ;;  %v1793_v49 = vsel %vm915_vm4, %v3419_v41, 0.0  ;;  %v1795_v45 = vsel %vm915_vm4, %v3435_v1, 0.0 }
 0x1f2   : > { %1729 = vst.msk [vmem:[#allocation2 + $0xf8] sm:$0xff] %vm915_vm4, %v1727_v55 }
 0x1f3   : > { %v3510_v13 = vld [vmem:[#allocation2 + $0xa0] sm:$0xff]  ;;  %v1780_v15 = vadd.f32 %v1779_v28, %v1778_v9  ;;  %1686 = vst.msk [vmem:[#allocation2 + $0xa8] sm:$0xff] %vm915_vm4, %v1656_v21  ;;  %v1797_v21 = vsel %vm915_vm4, %v3463_v27, 0.0 }
 0x1f4   : > { %1989 = vst.msk [vmem:[%s2706_s11 + $0xf1] sm:$0xff] %vm915_vm4, %v3510_v13  ;;  %v1519_v39 = vld [vmem:[#allocation2 + $0xc0] sm:$0xff] }
 0x1f5   : > { %v1782_v18 = vadd.f32 %v1781_v48, %v1780_v15  ;;  %v1659_v30 = vadd.f32 %v1617_v50, %v1519_v39  ;;  %1453 = vst.msk [vmem:[#allocation2 + $0xc8] sm:$0xff] %vm915_vm4, %v1423_v57  ;;  %v1623_v35 = vpop.f32.mrf.mxu3  ;;  %v1523_v57 = vld [vmem:[#allocation2 + $0xe0] sm:$0xff]  ;;  %v1799_v15 = vsel %vm915_vm4, %v3480_v63, 0.0 }
 0x1f6   : > { %v1281_v19 = vld [vmem:[#allocation2 + $0xb8] sm:$0xff]  ;;  %v1661_v43 = vadd.f32 %v1623_v35, %v1521_v52 }
 0x1f7   : > { %v1784_v20 = vadd.f32 %v1783_v23, %v1782_v18  ;;  %1689 = vst.msk [vmem:[#allocation2 + $0xc0] sm:$0xff] %vm915_vm4, %v1659_v30  ;;  %v1421_v14 = vadd.f32 %v3446_v11, %v1281_v19  ;;  %v1801_v30 = vsel %vm915_vm4, %v3510_v13, 0.0 }
 0x1f8   : > { %v1517_v50 = vld [vmem:[#allocation2 + $0xb0] sm:$0xff]  ;;  %1691 = vst.msk [vmem:[#allocation2 + $0xd0] sm:$0xff] %vm915_vm4, %v1661_v43 }
 0x1f9   : > { %v1786_v36 = vadd.f32 %v1785_v34, %v1784_v20  ;;  %v1657_v60 = vadd.f32 %v3425_v54, %v1517_v50  ;;  %v3527_v40 = vld [vmem:[#allocation2 + $0xf8] sm:$0xff]  ;;  %1451 = vst.msk [vmem:[#allocation2 + $0xb8] sm:$0xff] %vm915_vm4, %v1421_v14  ;;  %v1789_v54 = vsel %vm915_vm4, %v3383_v16, 0.0  ;;  %v1524_v50 = vld [vmem:[#allocation2 + $0xe8] sm:$0xff] }
 0x1fa   : > { %v3532_v42 = vld [vmem:[#allocation2 + $0xa8] sm:$0xff]  ;;  %2000 = vst.msk [vmem:[%s2706_s11 + $0x171] sm:$0xff] %vm915_vm4, %v3527_v40 }
 0x1fb   : > { %v1788_v11 = vadd.f32 %v1787_v24, %v1786_v36  ;;  %1990 = vst.msk [vmem:[%s2706_s11 + $0xf9] sm:$0xff] %vm915_vm4, %v3532_v42  ;;  %v1803_v23 = vsel %vm915_vm4, %v3532_v42, 0.0 }
 0x1fc   : > { %1687 = vst.msk [vmem:[#allocation2 + $0xb0] sm:$0xff] %vm915_vm4, %v1657_v60  ;;  %v1520_v32 = vld [vmem:[#allocation2 + $0xc8] sm:$0xff] }
 0x1fd   : > { %v1790_v4 = vadd.f32 %v1789_v54, %v1788_v11  ;;  %v1660_v7 = vadd.f32 %v1620_v6, %v1520_v32  ;;  %v1626_v25 = vpop.f32.mrf.mxu3 }
 0x1fe   : > { %v3545_v8 = vld [vmem:[#allocation2 + $0xc0] sm:$0xff]  ;;  %v1662_v55 = vadd.f32 %v1626_v25, %v1522_v33 }
 0x1ff   : > { %v1792_v56 = vadd.f32 %v1791_v22, %v1790_v4  ;;  %1993 = vst.msk [vmem:[%s2706_s11 + $0x121] sm:$0xff] %vm915_vm4, %v3545_v8  ;;  %v3550_v58 = vld [vmem:[#allocation2 + $0xd0] sm:$0xff]  ;;  %v1809_v11 = vsel %vm915_vm4, %v3545_v8, 0.0 }
 0x200   : > { %v1518_v3 = vld [vmem:[#allocation2 + $0xb8] sm:$0xff]  ;;  %1690 = vst.msk [vmem:[#allocation2 + $0xc8] sm:$0xff] %vm915_vm4, %v1660_v7  ;;  %v1813_v33 = vsel %vm915_vm4, %v3550_v58, 0.0 }
 0x201   : > { %v1794_v6 = vadd.f32 %v1793_v49, %v1792_v56  ;;  %v1658_v53 = vadd.f32 %v3444_v44, %v1518_v3  ;;  %1995 = vst.msk [vmem:[%s2706_s11 + $0x139] sm:$0xff] %vm915_vm4, %v3550_v58 }
 0x202   : > { %1692 = vst.msk [vmem:[#allocation2 + $0xd8] sm:$0xff] %vm915_vm4, %v1662_v55 }
 0x203   : > { %v1796_v62 = vadd.f32 %v1795_v45, %v1794_v6  ;;  %v3562_v9 = vld [vmem:[#allocation2 + $0xb0] sm:$0xff]  ;;  %1688 = vst.msk [vmem:[#allocation2 + $0xb8] sm:$0xff] %vm915_vm4, %v1658_v53  ;;  %v1821_v45 = vsel %vm915_vm4, %v3496_v5, 0.0 }
 0x204   : > { %1991 = vst.msk [vmem:[%s2706_s11 + $0x109] sm:$0xff] %vm915_vm4, %v3562_v9  ;;  %v1805_v20 = vsel %vm915_vm4, %v3562_v9, 0.0 }
 0x205   : > { %v1798_v44 = vadd.f32 %v1797_v21, %v1796_v62  ;;  %v1629_v28 = vpop.f32.mrf.mxu3  ;;  %v1823_v21 = vsel %vm915_vm4, %v3527_v40, 0.0 }
 0x206   : > { %v1663_v48 = vadd.f32 %v1629_v28, %v1523_v57 }
 0x207   : > { %v1800_v39 = vadd.f32 %v1799_v15, %v1798_v44  ;;  %v3572_v18 = vld [vmem:[#allocation2 + $0xc8] sm:$0xff] }
 0x208   : > { %1994 = vst.msk [vmem:[%s2706_s11 + $0x129] sm:$0xff] %vm915_vm4, %v3572_v18  ;;  %v1811_v4 = vsel %vm915_vm4, %v3572_v18, 0.0 }
 0x209   : > { %v1802_v52 = vadd.f32 %v1801_v30, %v1800_v39  ;;  %v3579_v35 = vld [vmem:[#allocation2 + $0xd8] sm:$0xff]  ;;  %1693 = vst.msk [vmem:[#allocation2 + $0xe0] sm:$0xff] %vm915_vm4, %v1663_v48 }
 0x20a   : > { %v3584_v19 = vld [vmem:[#allocation2 + $0xb8] sm:$0xff]  ;;  %1996 = vst.msk [vmem:[%s2706_s11 + $0x141] sm:$0xff] %vm915_vm4, %v3579_v35  ;;  %v1815_v22 = vsel %vm915_vm4, %v3579_v35, 0.0 }
 0x20b   : > { %v1804_v43 = vadd.f32 %v1803_v23, %v1802_v52  ;;  %1992 = vst.msk [vmem:[%s2706_s11 + $0x111] sm:$0xff] %vm915_vm4, %v3584_v19  ;;  %v1807_v14 = vsel %vm915_vm4, %v3584_v19, 0.0 }
 0x20d   : > { %v1806_v34 = vadd.f32 %v1805_v20, %v1804_v43  ;;  %v1632_v36 = vpop.f32.mrf.mxu3 }
 0x20e   : > { %v1664_v60 = vadd.f32 %v1632_v36, %v1524_v50 }
 0x20f   : > { %v1808_v24 = vadd.f32 %v1807_v14, %v1806_v34 }
 0x210   : > { %v3598_v54 = vld [vmem:[#allocation2 + $0xe0] sm:$0xff]  ;;  %1694 = vst.msk [vmem:[#allocation2 + $0xe8] sm:$0xff] %vm915_vm4, %v1664_v60 }
 0x211   : > { %v1810_v32 = vadd.f32 %v1809_v11, %v1808_v24  ;;  %1997 = vst.msk [vmem:[%s2706_s11 + $0x151] sm:$0xff] %vm915_vm4, %v3598_v54  ;;  %v1817_v49 = vsel %vm915_vm4, %v3598_v54, 0.0 }
 0x213   : > { %v1812_v7 = vadd.f32 %v1811_v4, %v1810_v32 }
 0x215   : > { %v1814_v25 = vadd.f32 %v1813_v33, %v1812_v7 }
 0x217   : > { %v1816_v55 = vadd.f32 %v1815_v22, %v1814_v25  ;;  %v3610_v56 = vld [vmem:[#allocation2 + $0xe8] sm:$0xff] }
 0x218   : > { %v1819_v3 = vsel %vm915_vm4, %v3610_v56, 0.0  ;;  %1998 = vst.msk [vmem:[%s2706_s11 + $0x159] sm:$0xff] %vm915_vm4, %v3610_v56 }
 0x219   : > { %v1818_v6 = vadd.f32 %v1817_v49, %v1816_v55 }
 0x21b   : > { %v1820_v53 = vadd.f32 %v1819_v3, %v1818_v6 }
 0x21d   : > { %v1822_v62 = vadd.f32 %v1821_v45, %v1820_v53 }
 0x21f   : > { %v1824_v44 = vadd.f32 %v1823_v21, %v1822_v62 }
 0x221   : > { %v1825_v57 = vrot.slane %v1824_v44, 4 }
 0x223   : > { %v1826_v28 = vadd.f32 %v1825_v57, %v1824_v44 }
 0x225   : > { %v1827_v15 = vrot.slane %v1826_v28, 2 }
 0x227   : > { %v1828_v48 = vadd.f32 %v1827_v15, %v1826_v28 }
 0x229   : > { %v1829_v39 = vrot.slane %v1828_v48, 1 }
 0x22b   : > { %v3623_v30 = vadd.f32 %v1829_v39, %v1828_v48 }
 0x22d   : > { %v3626_v52 = vmul.f32 0.00390625, %v3623_v30 }
 0x22f   : > { %v1832_v23 = vsub.f32 %v3374_v12, %v3626_v52  ;;  %v1833_v43 = vsub.f32 %v3394_v26, %v3626_v52  ;;  %v1834_v20 = vsub.f32 %v3410_v47, %v3626_v52  ;;  %v1835_v14 = vsub.f32 %v3432_v10, %v3626_v52 }
 0x230   : > { %v1836_v36 = vsub.f32 %v3448_v37, %v3626_v52  ;;  %v1837_v24 = vsub.f32 %v3477_v46, %v3626_v52  ;;  %v1838_v47 = vsub.f32 %v3249_v59, %v3626_v52  ;;  %v1839_v37 = vsub.f32 %v3292_v2, %v3626_v52 }
 0x231   : > { %v1864_v34 = vmul.f32 %v1832_v23, %v1832_v23  ;;  %v1865_v50 = vmul.f32 %v1833_v43, %v1833_v43  ;;  %v1866_v60 = vmul.f32 %v1834_v20, %v1834_v20  ;;  %v1867_v11 = vmul.f32 %v1835_v14, %v1835_v14 }
 0x232   : > { %v1868_v4 = vmul.f32 %v1836_v36, %v1836_v36  ;;  %v1869_v33 = vmul.f32 %v1837_v24, %v1837_v24  ;;  %v1840_v22 = vsub.f32 %v3306_v61, %v3626_v52  ;;  %v1870_v55 = vmul.f32 %v1838_v47, %v1838_v47 }
 0x233   : > { %v1896_v12 = vsel %vm915_vm4, %v1864_v34, 0.0  ;;  %v1897_v26 = vsel %vm915_vm4, %v1865_v50, 0.0  ;;  %v1899_v10 = vsel %vm915_vm4, %v1866_v60, 0.0  ;;  %v1901_v25 = vsel %vm915_vm4, %v1867_v11, 0.0 }
 0x234   : > { %v1898_v32 = vadd.f32 %v1897_v26, %v1896_v12  ;;  %v1903_v49 = vsel %vm915_vm4, %v1868_v4, 0.0  ;;  %v1841_v59 = vsub.f32 %v3318_v31, %v3626_v52  ;;  %v1871_v6 = vmul.f32 %v1839_v37, %v1839_v37 }
 0x235   : > { %v1905_v53 = vsel %vm915_vm4, %v1869_v33, 0.0  ;;  %v1842_v2 = vsub.f32 %v3330_v38, %v3626_v52  ;;  %v1872_v62 = vmul.f32 %v1840_v22, %v1840_v22  ;;  %v1907_v21 = vsel %vm915_vm4, %v1870_v55, 0.0 }
 0x236   : > { %v1900_v7 = vadd.f32 %v1899_v10, %v1898_v32  ;;  %v1843_v61 = vsub.f32 %v3342_v17, %v3626_v52  ;;  %v1873_v57 = vmul.f32 %v1841_v59, %v1841_v59  ;;  %v1909_v28 = vsel %vm915_vm4, %v1871_v6, 0.0 }
 0x237   : > { %v1844_v31 = vsub.f32 %v3354_v0, %v3626_v52  ;;  %v1874_v48 = vmul.f32 %v1842_v2, %v1842_v2  ;;  %v1911_v39 = vsel %vm915_vm4, %v1872_v62, 0.0  ;;  %v1845_v38 = vsub.f32 %v3366_v51, %v3626_v52 }
 0x238   : > { %v1902_v46 = vadd.f32 %v1901_v25, %v1900_v7  ;;  %v1875_v43 = vmul.f32 %v1843_v61, %v1843_v61  ;;  %v1913_v20 = vsel %vm915_vm4, %v1873_v57, 0.0  ;;  %v1846_v17 = vsub.f32 %v3383_v16, %v3626_v52 }
 0x239   : > { %v1876_v34 = vmul.f32 %v1844_v31, %v1844_v31  ;;  %v1915_v50 = vsel %vm915_vm4, %v1874_v48, 0.0  ;;  %v1847_v0 = vsub.f32 %v3397_v29, %v3626_v52  ;;  %v1877_v60 = vmul.f32 %v1845_v38, %v1845_v38 }
 0x23a   : > { %v1904_v3 = vadd.f32 %v1903_v49, %v1902_v46  ;;  %v1917_v24 = vsel %vm915_vm4, %v1875_v43, 0.0  ;;  %v1848_v51 = vsub.f32 %v3419_v41, %v3626_v52  ;;  %v1878_v12 = vmul.f32 %v1846_v17, %v1846_v17 }
 0x23b   : > { %v1919_v26 = vsel %vm915_vm4, %v1876_v34, 0.0  ;;  %v1849_v16 = vsub.f32 %v3435_v1, %v3626_v52  ;;  %v1879_v47 = vmul.f32 %v1847_v0, %v1847_v0  ;;  %v1921_v4 = vsel %vm915_vm4, %v1877_v60, 0.0 }
 0x23c   : > { %v1906_v45 = vadd.f32 %v1905_v53, %v1904_v3  ;;  %v1850_v29 = vsub.f32 %v3463_v27, %v3626_v52  ;;  %v1880_v7 = vmul.f32 %v1848_v51, %v1848_v51  ;;  %v1923_v37 = vsel %vm915_vm4, %v1878_v12, 0.0 }
 0x23d   : > { %v1851_v41 = vsub.f32 %v3480_v63, %v3626_v52  ;;  %v1881_v25 = vmul.f32 %v1849_v16, %v1849_v16  ;;  %v1925_v46 = vsel %vm915_vm4, %v1879_v47, 0.0  ;;  %v1852_v1 = vsub.f32 %v3510_v13, %v3626_v52 }
 0x23e   : > { %v1908_v44 = vadd.f32 %v1907_v21, %v1906_v45  ;;  %v1882_v55 = vmul.f32 %v1850_v29, %v1850_v29  ;;  %v1927_v49 = vsel %vm915_vm4, %v1880_v7, 0.0  ;;  %v1853_v27 = vsub.f32 %v3532_v42, %v3626_v52 }
 0x23f   : > { %v1883_v59 = vmul.f32 %v1851_v41, %v1851_v41  ;;  %v1929_v6 = vsel %vm915_vm4, %v1881_v25, 0.0  ;;  %v1854_v63 = vsub.f32 %v3562_v9, %v3626_v52  ;;  %v1884_v45 = vmul.f32 %v1852_v1, %v1852_v1 }
 0x240   : > { %v1910_v15 = vadd.f32 %v1909_v28, %v1908_v44  ;;  %v1931_v2 = vsel %vm915_vm4, %v1882_v55, 0.0  ;;  %v1855_v13 = vsub.f32 %v3584_v19, %v3626_v52  ;;  %v1885_v21 = vmul.f32 %v1853_v27, %v1853_v27 }
 0x241   : > { %v1933_v44 = vsel %vm915_vm4, %v1883_v59, 0.0  ;;  %v1856_v42 = vsub.f32 %v3545_v8, %v3626_v52  ;;  %v1886_v57 = vmul.f32 %v1854_v63, %v1854_v63  ;;  %v1935_v28 = vsel %vm915_vm4, %v1884_v45, 0.0 }
 0x242   : > { %v1912_v23 = vadd.f32 %v1911_v39, %v1910_v15  ;;  %v1857_v9 = vsub.f32 %v3572_v18, %v3626_v52  ;;  %v1887_v31 = vmul.f32 %v1855_v13, %v1855_v13  ;;  %v1937_v48 = vsel %vm915_vm4, %v1885_v21, 0.0 }
 0x243   : > { %v1858_v19 = vsub.f32 %v3550_v58, %v3626_v52  ;;  %v1939_v38 = vsel %vm915_vm4, %v1886_v57, 0.0  ;;  %v1859_v8 = vsub.f32 %v3579_v35, %v3626_v52  ;;  %v1860_v18 = vsub.f32 %v3598_v54, %v3626_v52 }
 0x244   : > { %v1914_v14 = vadd.f32 %v1913_v20, %v1912_v23  ;;  %v1888_v23 = vmul.f32 %v1856_v42, %v1856_v42  ;;  %v1889_v20 = vmul.f32 %v1857_v9, %v1857_v9  ;;  %v1861_v58 = vsub.f32 %v3610_v56, %v3626_v52 }
 0x245   : > { %v1890_v34 = vmul.f32 %v1858_v19, %v1858_v19  ;;  %v1891_v0 = vmul.f32 %v1859_v8, %v1859_v8  ;;  %v1862_v35 = vsub.f32 %v3496_v5, %v3626_v52  ;;  %v1863_v54 = vsub.f32 %v3527_v40, %v3626_v52 }
 0x246   : > { %v1916_v36 = vadd.f32 %v1915_v50, %v1914_v14  ;;  %v1941_v14 = vsel %vm915_vm4, %v1887_v31, 0.0  ;;  %v1943_v50 = vsel %vm915_vm4, %v1888_v23, 0.0  ;;  %v1945_v60 = vsel %vm915_vm4, %v1889_v20, 0.0 }
 0x247   : > { %v1947_v51 = vsel %vm915_vm4, %v1890_v34, 0.0  ;;  %v1894_v56 = vmul.f32 %v1862_v35, %v1862_v35 }
 0x248   : > { %v1918_v11 = vadd.f32 %v1917_v24, %v1916_v36 }
 0x249   : > { %v1955_v7 = vsel %vm915_vm4, %v1894_v56, 0.0 }
 0x24a   : > { %v1920_v32 = vadd.f32 %v1919_v26, %v1918_v11  ;;  %v1892_v11 = vmul.f32 %v1860_v18, %v1860_v18  ;;  %v1893_v26 = vmul.f32 %v1861_v58, %v1861_v58 }
 0x24c   : > { %v1922_v10 = vadd.f32 %v1921_v4, %v1920_v32  ;;  %v1949_v32 = vsel %vm915_vm4, %v1891_v0, 0.0  ;;  %v1951_v47 = vsel %vm915_vm4, %v1892_v11, 0.0  ;;  %v1953_v29 = vsel %vm915_vm4, %v1893_v26, 0.0 }
 0x24e   : > { %v1924_v33 = vadd.f32 %v1923_v37, %v1922_v10  ;;  %v1895_v10 = vmul.f32 %v1863_v54, %v1863_v54 }
 0x250   : > { %v1926_v22 = vadd.f32 %v1925_v46, %v1924_v33  ;;  %v1957_v33 = vsel %vm915_vm4, %v1895_v10, 0.0 }
 0x252   : > { %v1928_v3 = vadd.f32 %v1927_v49, %v1926_v22 }
 0x254   : > { %v1930_v53 = vadd.f32 %v1929_v6, %v1928_v3 }
 0x256   : > { %v1932_v62 = vadd.f32 %v1931_v2, %v1930_v53 }
 0x258   : > { %v1934_v61 = vadd.f32 %v1933_v44, %v1932_v62 }
 0x25a   : > { %v1936_v15 = vadd.f32 %v1935_v28, %v1934_v61 }
 0x25c   : > { %v1938_v39 = vadd.f32 %v1937_v48, %v1936_v15 }
 0x25e   : > { %v1940_v43 = vadd.f32 %v1939_v38, %v1938_v39 }
 0x260   : > { %v1942_v17 = vadd.f32 %v1941_v14, %v1940_v43 }
 0x262   : > { %v1944_v36 = vadd.f32 %v1943_v50, %v1942_v17 }
 0x264   : > { %v1946_v24 = vadd.f32 %v1945_v60, %v1944_v36 }
 0x266   : > { %v1948_v12 = vadd.f32 %v1947_v51, %v1946_v24 }
 0x268   : > { %v1950_v16 = vadd.f32 %v1949_v32, %v1948_v12 }
 0x26a   : > { %v1952_v4 = vadd.f32 %v1951_v47, %v1950_v16 }
 0x26c   : > { %v1954_v5 = vadd.f32 %v1953_v29, %v1952_v4 }
 0x26e   : > { %v1956_v37 = vadd.f32 %v1955_v7, %v1954_v5 }
 0x270   : > { %v1958_v41 = vadd.f32 %v1957_v33, %v1956_v37 }
 0x272   : > { %v1959_v40 = vrot.slane %v1958_v41, 4 }
 0x274   : > { %v1960_v52 = vadd.f32 %v1959_v40, %v1958_v41 }
 0x276   : > { %v1961_v25 = vrot.slane %v1960_v52, 2 }
 0x278   : > { %v1962_v46 = vadd.f32 %v1961_v25, %v1960_v52 }
 0x27a   : > { %v1963_v22 = vrot.slane %v1962_v46, 1 }
 0x27c   : > { %v1964_v1 = vadd.f32 %v1963_v22, %v1962_v46 }
 0x27e   : > { %v1966_v55 = vsel %vm1965_vm7, %v3623_v30, %v1964_v1 }
 0x27f   : > { %1968 = vst.msk [vmem:[%s411_s21] sm:$0x3] %vm1967_vm8, %v1966_v55 }
 0x280 PF: > { %s16_s20 = sadd.s32 1, %s2388_s20   ;;  %s3744_s18 = smov %s2384_s19 }
 0x281   : > { %p13_p5 = scmp.ge.s32.totalorder %s16_s20, 4   ;;  %s3745_s19 = smov %s3747_s1 }
 0x283   :  { %15 = sbr.rel (!%p13_p5) target bundleno = 2 (0x2), region = 86 }

// kernel: double_convolution.4
= control target key start
LH: loop header
LB: loop body
LE: loop exit
PB: predicated region body
PF: predicated region fallthrough
CT: control target
= control target key end

     0   :  { %s2727_s24 = smov 0   ;;  %s2729_s1 = smov 0   ;;  %s4242_s0 = inlined_call_operand.vmem [shape: f32[2,16,18,8], index: 0, kind: input, shape index: {}, may-alias: {0,1,2}]   ;;  %s4243_s1 = inlined_call_operand.vmem [shape: f32[2,16,18,8], index: 1, kind: input, shape index: {}, may-alias: {0,1,2}]   ;;  %s4244_s2 = inlined_call_operand.vmem [shape: f32[2,16,18,8], index: 2, kind: input, shape index: {}, may-alias: {0,1,2}]   ;;  %s4245_s3 = inlined_call_operand.vmem [shape: f32[3,24,8], index: 3, kind: input, shape index: {}]   ;;  %s4246_s4 = inlined_call_operand.vmem [shape: f32[1,8], index: 4, kind: input, shape index: {}]   ;;  %s4247_s5 = inlined_call_operand.vmem [shape: f32[1,8], index: 5, kind: input, shape index: {}]   ;;  %s4248_s6 = inlined_call_operand.vmem [shape: f32[2,16,18,8], index: 6, kind: output, shape index: {0}]   ;;  %s4249_s7 = inlined_call_operand.vmem [shape: f32[2,1,2,8], index: 7, kind: output, shape index: {1}]  }
   0x1   :  { %s2731_s2 = smov 0  }
   0x2 LB: > { %s30_s25 = sadd.s32 1, %s2678_s1  ;;  %p2507_p0 = scmp.ge.s32.totalorder %s2682_s2, 1  ;;  %s2682_s2 = sphi %s2731_s2, %s18_s2   ;;  %s2678_s1 = sphi %s2729_s1, %s4251_s1   ;;  %s2674_s24 = sphi %s2727_s24, %s4250_s24  }
   0x3   : > { %p32_p1 = scmp.ge.s32.totalorder %s30_s25, 2  ;;  %p328_p2 = scmp.lt.s32.totalorder %s2682_s2, 3 }
   0x5   : > { %s4253_s25 = smov (%p32_p1, %s30_s25), 0  ;;  %p329_p3 = pnand %p2507_p0, %p328_p2 }
   0x6   : > { %p404_p4 = scmp.lt.s32.totalorder (!%p329_p3), %s2674_s24, 1  ;;  %s2684_s11 = smov (!%p329_p3), 8  }
   0x7   : > { %332 = sbr.rel (%p329_p3) target bundleno = 647 (0x287), region = 44  ;;  %s2685_s12 = smov (!%p329_p3), 16  }
   0xc   : > { %s4255_s24 = smov (!%p404_p4, %s2674_s24), 1  ;;  %v522_v0 = vlaneseq  ;;  %v2751_v1 = vld [vmem:[%s4246_s4] ss:$0 sm:$0xff]  ;;  %vm825_vm0 = vcmask 1046528   ;;  %vm1002_vm2 = vcmask 1045504   ;;  %vm1179_vm4 = vcmask 64512  }
   0xd   : > { %s2628_s26 = smul.u32 384, %s4255_s24  ;;  %v2763_v2 = vld [vmem:[%s4247_s5] ss:$0 sm:$0xff]  ;;  %vm1212_vm5 = vcmask 130048   ;;  %vm2291_vm6 = vcmask 57344   ;;  %vm1314_vm7 = vcmask 195584  }
   0xe   : > { %v2767_v5 = vshrl.u32 %v522_v0, 7  ;;  %vm2255_vm8 = vcmask 1040384   ;;  %vm2257_vm9 = vcmask 58368  }
   0xf   : > { %s2758_s8 = scalar_lea.vmem %s4242_s0, %s2628_s26  ;;  %s3172_s30 = scalar_lea.vmem %s4248_s6, %s2628_s26 }
  0x10   : > { %v502_v3 = vld [vmem:[%s2758_s8 + $0x120] sm:$0xff]  ;;  %v503_v4 = vld [vmem:[%s2758_s8 + $0x128] sm:$0xff]  ;;  %v504_v11 = vld [vmem:[%s2758_s8 + $0x130] sm:$0x3]  ;;  %v2777_v13 = vadd.s32 16, %v2767_v5  ;;  %vm526_vm1 = vcmp.ge.s32.totalorder %v2767_v5, 1 }
  0x11   : > { %v466_v6 = vld [vmem:[%s2758_s8] sm:$0xff]  ;;  %v574_v7 = vmul.f32 %v2751_v1, %v502_v3  ;;  %v575_v8 = vmul.f32 %v2751_v1, %v503_v4  ;;  %v467_v9 = vld [vmem:[%s2758_s8 + $0x8] sm:$0xff]  ;;  %v576_v14 = vmul.f32 %v2751_v1, %v504_v11  ;;  %v468_v15 = vld [vmem:[%s2758_s8 + $0x10] sm:$0x3] }
  0x12   : > { %v538_v10 = vmul.f32 %v2751_v1, %v466_v6  ;;  %v539_v12 = vmul.f32 %v2751_v1, %v467_v9  ;;  %v505_v19 = vld [vmem:[%s2758_s8 + $0x138] sm:$0xff]  ;;  %v506_v22 = vld [vmem:[%s2758_s8 + $0x140] sm:$0xff]  ;;  %v540_v26 = vmul.f32 %v2751_v1, %v468_v15  ;;  %vm531_vm3 = vcmp.le.s32.totalorder %v2777_v13, 16  ;;  %v507_v44 = vld [vmem:[%s2758_s8 + $0x148] sm:$0x3] }
  0x13   : > { %v625_v16 = vadd.f32 %v2763_v2, %v574_v7  ;;  %v626_v17 = vadd.f32 %v2763_v2, %v575_v8  ;;  %v627_v21 = vadd.f32 %v2763_v2, %v576_v14  ;;  %v577_v29 = vmul.f32 %v2751_v1, %v505_v19  ;;  %v469_v46 = vld [vmem:[%s2758_s8 + $0x18] sm:$0xff]  ;;  %v470_v55 = vld [vmem:[%s2758_s8 + $0x20] sm:$0xff]  ;;  %v471_v4 = vld [vmem:[%s2758_s8 + $0x28] sm:$0x3] }
  0x14   : > { %v589_v18 = vadd.f32 %v2763_v2, %v538_v10  ;;  %v590_v20 = vadd.f32 %v2763_v2, %v539_v12  ;;  %v578_v33 = vmul.f32 %v2751_v1, %v506_v22  ;;  %v591_v40 = vadd.f32 %v2763_v2, %v540_v26  ;;  %v478_v22 = vld [vmem:[%s2758_s8 + $0x60] sm:$0xff] }
  0x15   : > { %v673_v23 = vmax.f32 %v625_v16, 0.0  ;;  %v2789_v24 = vmax.f32 %v626_v17, 0.0  ;;  %v675_v28 = vmax.f32 %v627_v21, 0.0  ;;  %v628_v43 = vadd.f32 %v2763_v2, %v577_v29 }
  0x16   : > { %v637_v25 = vmax.f32 %v589_v18, 0.0  ;;  %v2792_v27 = vmax.f32 %v590_v20, 0.0  ;;  %v629_v50 = vadd.f32 %v2763_v2, %v578_v33  ;;  %v639_v52 = vmax.f32 %v591_v40, 0.0 }
  0x17   : > { %v2798_v30 = vsel %vm526_vm1, %v673_v23, 0.0  ;;  %v887_v31 = vrot.slane %v2789_v24, 1  ;;  %v729_v39 = vsel %vm531_vm3, %v675_v28, 0.0  ;;  %v1064_v48 = vrot.slane %v2789_v24, 2  ;;  %v508_v23 = vld [vmem:[%s2758_s8 + $0x150] sm:$0xff] }
  0x18   : > { %v2803_v32 = vsel %vm526_vm1, %v637_v25, 0.0  ;;  %v886_v34 = vrot.slane %v2798_v30, 1  ;;  %v1004_v36 = vrot.slane %v2792_v27, 2  ;;  %v827_v38 = vrot.slane %v2792_v27, 1 }
  0x19   : > { %v1003_v35 = vrot.slane %v2803_v32, 2  ;;  %v826_v37 = vrot.slane %v2803_v32, 1  ;;  %v1063_v47 = vrot.slane %v2798_v30, 2  ;;  %v1066_v49 = vrot.slane %v729_v39, 2 }
  0x1a   : > { %v888_v41 = vsel %vm825_vm0, %v886_v34, %v887_v31  ;;  %v889_v51 = vrot.slane %v729_v39, 1  ;;  %v579_v53 = vmul.f32 %v2751_v1, %v507_v44  ;;  %v676_v54 = vmax.f32 %v628_v43, 0.0  ;;  %v479_v34 = vld [vmem:[%s2758_s8 + $0x68] sm:$0xff] }
  0x1b   : > { %v1005_v42 = vsel %vm1002_vm2, %v1003_v35, %v1004_v36  ;;  %954 = vrot.lane.b32.xlu0 %v888_v41, %s2684_s11  ;;  %v828_v45 = vsel %vm825_vm0, %v826_v37, %v827_v38  ;;  %v541_v56 = vmul.f32 %v2751_v1, %v469_v46  ;;  %v1065_v57 = vsel %vm1002_vm2, %v1063_v47, %v1064_v48  ;;  %v472_v46 = vld [vmem:[%s2758_s8 + $0x30] sm:$0xff] }
  0x1c   : > { %1083 = vrot.lane.b32.xlu2 %v1005_v42, %s2685_s12  ;;  %906 = vrot.lane.b32.xlu1 %v828_v45, %s2684_s11  ;;  %v1067_v58 = vsel %vm1002_vm2, %v1064_v48, %v1066_v49  ;;  %v2831_v59 = vmax.f32 %v629_v50, 0.0  ;;  %v890_v60 = vsel %vm825_vm0, %v887_v31, %v889_v51  ;;  %v693_v61 = vsel %vm531_vm3, %v639_v52, 0.0 }
  0x1d   : > { %v630_v62 = vadd.f32 %v2763_v2, %v579_v53  ;;  %v542_v63 = vmul.f32 %v2751_v1, %v470_v55  ;;  %v2840_v0 = vsel %vm526_vm1, %v676_v54, 0.0  ;;  %v592_v3 = vadd.f32 %v2763_v2, %v541_v56  ;;  %v473_v54 = vld [vmem:[%s2758_s8 + $0x38] sm:$0xff] }
  0x1e   : > { %v829_v6 = vrot.slane %v693_v61, 1  ;;  %v1006_v7 = vrot.slane %v693_v61, 2  ;;  %v892_v8 = vrot.slane %v2831_v59, 1  ;;  %v891_v9 = vrot.slane %v2840_v0, 1 }
  0x1f   : > { %v678_v10 = vmax.f32 %v630_v62, 0.0  ;;  %v593_v11 = vadd.f32 %v2763_v2, %v542_v63  ;;  %v543_v12 = vmul.f32 %v2751_v1, %v471_v4  ;;  %v640_v14 = vmax.f32 %v592_v3, 0.0 }
  0x20   : > { %v830_v15 = vsel %vm825_vm0, %v827_v38, %v829_v6  ;;  %v1007_v16 = vsel %vm1002_vm2, %v1004_v36, %v1006_v7  ;;  %v893_v17 = vsel %vm825_vm0, %v891_v9, %v892_v8  ;;  %v1068_v25 = vrot.slane %v2840_v0, 2  ;;  %v509_v36 = vld [vmem:[%s2758_s8 + $0x158] sm:$0xff]  ;;  %v480_v7 = vld [vmem:[%s2758_s8 + $0x70] sm:$0x3] }
  0x21   : > { %v732_v18 = vsel %vm531_vm3, %v678_v10, 0.0  ;;  %v2856_v19 = vmax.f32 %v593_v11, 0.0  ;;  %v594_v20 = vadd.f32 %v2763_v2, %v543_v12  ;;  %v2861_v21 = vsel %vm526_vm1, %v640_v14, 0.0 }
  0x22   : > { %v1069_v26 = vrot.slane %v2831_v59, 2  ;;  %v894_v28 = vrot.slane %v732_v18, 1  ;;  %v831_v29 = vrot.slane %v2861_v21, 1  ;;  %v550_v35 = vmul.f32 %v2751_v1, %v478_v22 }
  0x23   : > { %1131 = vrot.lane.b32.xlu0 %v1065_v57, %s2685_s12  ;;  %v832_v31 = vrot.slane %v2856_v19, 1  ;;  %v642_v33 = vmax.f32 %v594_v20, 0.0  ;;  %v580_v37 = vmul.f32 %v2751_v1, %v508_v23  ;;  %v551_v40 = vmul.f32 %v2751_v1, %v479_v34 }
  0x24   : > { %1133 = vrot.lane.b32.xlu2 %v1067_v58, %s2685_s12  ;;  %956 = vrot.lane.b32.xlu1 %v890_v60, %s2684_s11  ;;  %v1070_v38 = vsel %vm1002_vm2, %v1068_v25, %v1069_v26  ;;  %v895_v39 = vsel %vm825_vm0, %v892_v8, %v894_v28  ;;  %v601_v43 = vadd.f32 %v2763_v2, %v550_v35  ;;  %v1008_v47 = vrot.slane %v2861_v21, 2  ;;  %v510_v8 = vld [vmem:[%s2758_s8 + $0x160] sm:$0x3] }
  0x25   : > { %v833_v41 = vsel %vm825_vm0, %v831_v29, %v832_v31  ;;  %v696_v42 = vsel %vm531_vm3, %v642_v33, 0.0  ;;  %v581_v44 = vmul.f32 %v2751_v1, %v509_v36  ;;  %v631_v45 = vadd.f32 %v2763_v2, %v580_v37 }
  0x26   : > { %v1009_v48 = vrot.slane %v2856_v19, 2  ;;  %v834_v49 = vrot.slane %v696_v42, 1  ;;  %v602_v50 = vadd.f32 %v2763_v2, %v551_v40  ;;  %v1071_v51 = vrot.slane %v732_v18, 2 }
  0x27   : > { %v649_v52 = vmax.f32 %v601_v43, 0.0  ;;  %v632_v53 = vadd.f32 %v2763_v2, %v581_v44  ;;  %v544_v55 = vmul.f32 %v2751_v1, %v472_v46  ;;  %v679_v56 = vmax.f32 %v631_v45, 0.0 }
  0x28   : > { %v1010_v57 = vsel %vm1002_vm2, %v1008_v47, %v1009_v48  ;;  %v835_v58 = vsel %vm825_vm0, %v832_v31, %v834_v49  ;;  %v2897_v60 = vmax.f32 %v602_v50, 0.0  ;;  %v545_v61 = vmul.f32 %v2751_v1, %v473_v54  ;;  %v474_v31 = vld [vmem:[%s2758_s8 + $0x40] sm:$0x3]  ;;  %v511_v49 = vld [vmem:[%s2758_s8 + $0x168] sm:$0xff] }
  0x29   : > { %v1072_v62 = vsel %vm1002_vm2, %v1069_v26, %v1071_v51  ;;  %v2903_v63 = vsel %vm526_vm1, %v649_v52, 0.0  ;;  %v2905_v3 = vmax.f32 %v632_v53, 0.0  ;;  %v595_v4 = vadd.f32 %v2763_v2, %v544_v55  ;;  %v482_v55 = vld [vmem:[%s2758_s8 + $0x80] sm:$0xff] }
  0x2a   : > { %v2910_v6 = vsel %vm526_vm1, %v679_v56, 0.0  ;;  %v846_v9 = vrot.slane %v2903_v63, 1  ;;  %v847_v10 = vrot.slane %v2897_v60, 1  ;;  %v1011_v11 = vrot.slane %v696_v42, 2 }
  0x2b   : > { %908 = vrot.lane.b32.xlu0 %v830_v15, %s2684_s11  ;;  %v596_v12 = vadd.f32 %v2763_v2, %v545_v61  ;;  %v896_v14 = vrot.slane %v2910_v6, 1  ;;  %v897_v15 = vrot.slane %v2905_v3, 1  ;;  %v582_v18 = vmul.f32 %v2751_v1, %v510_v8 }
  0x2c   : > { %1085 = vrot.lane.b32.xlu2 %v1007_v16, %s2685_s12  ;;  %958 = vrot.lane.b32.xlu1 %v893_v17, %s2684_s11  ;;  %v643_v16 = vmax.f32 %v595_v4, 0.0  ;;  %v552_v17 = vmul.f32 %v2751_v1, %v480_v7  ;;  %v848_v20 = vsel %vm825_vm0, %v846_v9, %v847_v10  ;;  %v1012_v22 = vsel %vm1002_vm2, %v1009_v48, %v1011_v11  ;;  %v481_v48 = vld [vmem:[%s2758_s8 + $0x78] sm:$0xff] }
  0x2d   : > { %v2926_v23 = vmax.f32 %v596_v12, 0.0  ;;  %v898_v25 = vsel %vm825_vm0, %v896_v14, %v897_v15  ;;  %v633_v29 = vadd.f32 %v2763_v2, %v582_v18  ;;  %v1023_v33 = vrot.slane %v2903_v63, 2  ;;  %v475_v14 = vld [vmem:[%s2758_s8 + $0x48] sm:$0xff] }
  0x2e   : > { %v2931_v26 = vsel %vm526_vm1, %v643_v16, 0.0  ;;  %v603_v28 = vadd.f32 %v2763_v2, %v552_v17  ;;  %v1024_v34 = vrot.slane %v2897_v60, 2  ;;  %v1073_v37 = vrot.slane %v2910_v6, 2 }
  0x2f   : > { %v836_v35 = vrot.slane %v2931_v26, 1  ;;  %v837_v36 = vrot.slane %v2926_v23, 1  ;;  %v546_v40 = vmul.f32 %v2751_v1, %v474_v31  ;;  %v1013_v51 = vrot.slane %v2931_v26, 2 }
  0x30   : > { %v1025_v42 = vsel %vm1002_vm2, %v1023_v33, %v1024_v34  ;;  %v1014_v52 = vrot.slane %v2926_v23, 2  ;;  %v553_v56 = vmul.f32 %v2751_v1, %v481_v48  ;;  %v554_v4 = vmul.f32 %v2751_v1, %v482_v55 }
  0x31   : > { %v838_v43 = vsel %vm825_vm0, %v836_v35, %v837_v36  ;;  %v597_v46 = vadd.f32 %v2763_v2, %v546_v40 }
  0x32   : > { %v604_v9 = vadd.f32 %v2763_v2, %v553_v56 }
  0x33   : > { %1135 = vrot.lane.b32.xlu0 %v1070_v38, %s2685_s12  ;;  %v1074_v38 = vrot.slane %v2905_v3, 2  ;;  %v645_v54 = vmax.f32 %v597_v46, 0.0 }
  0x34   : > { %960 = vrot.lane.b32.xlu2 %v895_v39, %s2684_s11  ;;  %910 = vrot.lane.b32.xlu1 %v833_v41, %s2684_s11  ;;  %v651_v39 = vmax.f32 %v603_v28, 0.0  ;;  %v681_v41 = vmax.f32 %v633_v29, 0.0  ;;  %v652_v18 = vmax.f32 %v604_v9, 0.0 }
  0x35   : > { %v1075_v44 = vsel %vm1002_vm2, %v1073_v37, %v1074_v38  ;;  %v699_v8 = vsel %vm531_vm3, %v645_v54, 0.0 }
  0x36   : > { %v705_v45 = vsel %vm531_vm3, %v651_v39, 0.0  ;;  %v735_v47 = vsel %vm531_vm3, %v681_v41, 0.0  ;;  %v839_v16 = vrot.slane %v699_v8, 1  ;;  %v2990_v39 = vsel %vm526_vm1, %v652_v18, 0.0 }
  0x37   : > { %v849_v50 = vrot.slane %v705_v45, 1  ;;  %v899_v53 = vrot.slane %v735_v47, 1  ;;  %v1076_v17 = vrot.slane %v735_v47, 2 }
  0x38   : > { %v840_v31 = vsel %vm825_vm0, %v837_v36, %v839_v16  ;;  %v513_v36 = vld [vmem:[%s2758_s8 + $0x178] sm:$0x3] }
  0x39   : > { %v850_v61 = vsel %vm825_vm0, %v847_v10, %v849_v50  ;;  %v900_v7 = vsel %vm825_vm0, %v897_v15, %v899_v53  ;;  %v1026_v10 = vrot.slane %v705_v45, 2  ;;  %v605_v15 = vadd.f32 %v2763_v2, %v554_v4 }
  0x3a   : > { %v1077_v37 = vsel %vm1002_vm2, %v1074_v38, %v1076_v17  ;;  %v851_v38 = vrot.slane %v2990_v39, 1  ;;  %v585_v50 = vmul.f32 %v2751_v1, %v513_v36  ;;  %v485_v36 = vld [vmem:[%s2758_s8 + $0x98] sm:$0xff] }
  0x3b   : > { %1087 = vrot.lane.b32.xlu0 %v1010_v57, %s2685_s12  ;;  %v512_v57 = vld [vmem:[%s2758_s8 + $0x170] sm:$0xff]  ;;  %v1027_v29 = vsel %vm1002_vm2, %v1024_v34, %v1026_v10  ;;  %v2984_v33 = vmax.f32 %v605_v15, 0.0  ;;  %v483_v34 = vld [vmem:[%s2758_s8 + $0x88] sm:$0x3] }
  0x3c   : > { %912 = vrot.lane.b32.xlu2 %v835_v58, %s2684_s11  ;;  %1137 = vrot.lane.b32.xlu1 %v1072_v62, %s2685_s12  ;;  %v583_v58 = vmul.f32 %v2751_v1, %v511_v49  ;;  %v1015_v62 = vsel %vm1002_vm2, %v1013_v51, %v1014_v52  ;;  %v584_v11 = vmul.f32 %v2751_v1, %v512_v57 }
  0x3d   : > { %v555_v49 = vmul.f32 %v2751_v1, %v483_v34 }
  0x3e   : > { %v634_v12 = vadd.f32 %v2763_v2, %v583_v58  ;;  %v636_v58 = vadd.f32 %v2763_v2, %v585_v50  ;;  %v557_v50 = vmul.f32 %v2751_v1, %v485_v36 }
  0x3f   : > { %v606_v57 = vadd.f32 %v2763_v2, %v555_v49 }
  0x40   : > { %v682_v28 = vmax.f32 %v634_v12, 0.0  ;;  %v2515_v12 = vld [vmem:[%s4245_s3 + $0x28] sm:$0xff]  ;;  %v684_v10 = vmax.f32 %v636_v58, 0.0 }
  0x41   : > { %1424 = vmatpush.msra.mxu0 %v2515_v12  ;;  %2619 = vmatpush.msra.mxu2 %v2515_v12 }
  0x43   : > { %922 = vrot.lane.b32.xlu0 %v848_v20, %s2684_s11  ;;  %v635_v20 = vadd.f32 %v2763_v2, %v584_v11  ;;  %v654_v11 = vmax.f32 %v606_v57, 0.0 }
  0x44   : > { %1089 = vrot.lane.b32.xlu2 %v1012_v22, %s2685_s12  ;;  %962 = vrot.lane.b32.xlu1 %v898_v25, %s2684_s11  ;;  %v476_v22 = vld [vmem:[%s2758_s8 + $0x50] sm:$0xff]  ;;  %v547_v25 = vmul.f32 %v2751_v1, %v475_v14 }
  0x45   : > { %v548_v35 = vmul.f32 %v2751_v1, %v476_v22  ;;  %v2992_v40 = vmax.f32 %v635_v20, 0.0  ;;  %v3038_v14 = vld [vmem:[%s4245_s3 + $0x10] sm:$0xff]  ;;  %v708_v20 = vsel %vm531_vm3, %v654_v11, 0.0  ;;  %v738_v22 = vsel %vm531_vm3, %v684_v10, 0.0  ;;  %v487_v11 = vld [vmem:[%s2758_s8 + $0xa8] sm:$0xff] }
  0x46   : > { %v598_v41 = vadd.f32 %v2763_v2, %v547_v25  ;;  %1599 = vmatpush.msra.mxu1 %v3038_v14  ;;  %v484_v25 = vld [vmem:[%s2758_s8 + $0x90] sm:$0xff]  ;;  %v904_v34 = vrot.slane %v738_v22, 1  ;;  %v1031_v57 = vrot.slane %v708_v20, 2 }
  0x47   : > { %v599_v45 = vadd.f32 %v2763_v2, %v548_v35  ;;  %v902_v47 = vrot.slane %v2992_v40, 1  ;;  %v1079_v9 = vrot.slane %v2992_v40, 2 }
  0x48   : > { %v646_v48 = vmax.f32 %v598_v41, 0.0  ;;  %v3066_v41 = vld [vmem:[%s4245_s3 + $0x8] sm:$0xff] }
  0x49   : > { %v3013_v54 = vmax.f32 %v599_v45, 0.0  ;;  %1600 = vmatpush.msra.mxu1 %v3066_v41  ;;  %v2513_v45 = vld [vmem:[%s4245_s3 + $0x18] sm:$0xff] }
  0x4a   : > { %v3018_v56 = vsel %vm526_vm1, %v646_v48, 0.0 }
  0x4b   : > { %1099 = vrot.lane.b32.xlu0 %v1025_v42, %s2685_s12  ;;  %v2997_v42 = vsel %vm526_vm1, %v682_v28, 0.0  ;;  %v842_v4 = vrot.slane %v3013_v54, 1  ;;  %v1019_v35 = vrot.slane %v3013_v54, 2 }
  0x4c   : > { %914 = vrot.lane.b32.xlu2 %v838_v43, %s2684_s11  ;;  %1139 = vrot.lane.b32.xlu1 %v1075_v44, %s2685_s12  ;;  %v852_v43 = vrot.slane %v2984_v33, 1  ;;  %v1016_v44 = vrot.slane %v699_v8, 2  ;;  %v901_v46 = vrot.slane %v2997_v42, 1  ;;  %v1078_v8 = vrot.slane %v2997_v42, 2 }
  0x4e   : > { %v853_v51 = vsel %vm825_vm0, %v851_v38, %v852_v43  ;;  %v1017_v53 = vsel %vm1002_vm2, %v1014_v52, %v1016_v44  ;;  %v903_v55 = vsel %vm825_vm0, %v901_v46, %v902_v47  ;;  %v1028_v52 = vrot.slane %v2990_v39, 2  ;;  %v3077_v46 = vld [vmem:[%s4245_s3] sm:$0xff] }
  0x4f   : > { %v1080_v18 = vsel %vm1002_vm2, %v1078_v8, %v1079_v9  ;;  %v556_v38 = vmul.f32 %v2751_v1, %v484_v25  ;;  %1601 = vmatpush.msra.mxu1 %v3077_v46  ;;  %v489_v25 = vld [vmem:[%s2758_s8 + $0xb8] sm:$0x3] }
  0x53   : > { %924 = vrot.lane.b32.xlu0 %v850_v61, %s2684_s11  ;;  %v1029_v61 = vrot.slane %v2984_v33, 2 }
  0x54   : > { %1091 = vrot.lane.b32.xlu2 %v1015_v62, %s2685_s12  ;;  %964 = vrot.lane.b32.xlu1 %v900_v7, %s2684_s11  ;;  %v841_v62 = vrot.slane %v3018_v56, 1  ;;  %v477_v7 = vld [vmem:[%s2758_s8 + $0x58] sm:$0x3] }
  0x55   : > { %v549_v16 = vmul.f32 %v2751_v1, %v477_v7  ;;  %v1030_v15 = vsel %vm1002_vm2, %v1028_v52, %v1029_v61  ;;  %v1032_v12 = vsel %vm1002_vm2, %v1029_v61, %v1031_v57 }
  0x56   : > { %v843_v17 = vsel %vm825_vm0, %v841_v62, %v842_v4  ;;  %v1081_v62 = vrot.slane %v738_v22, 2  ;;  %v559_v22 = vmul.f32 %v2751_v1, %v487_v11 }
  0x57   : > { %v600_v28 = vadd.f32 %v2763_v2, %v549_v16  ;;  %v488_v16 = vld [vmem:[%s2758_s8 + $0xb0] sm:$0xff] }
  0x58   : > { %v560_v61 = vmul.f32 %v2751_v1, %v488_v16  ;;  %v610_v36 = vadd.f32 %v2763_v2, %v559_v22 }
  0x59   : > { %v648_v44 = vmax.f32 %v600_v28, 0.0 }
  0x5b   : > { %1101 = vrot.lane.b32.xlu0 %v1027_v29, %s2685_s12  ;;  %v854_v29 = vrot.slane %v708_v20, 1 }
  0x5c   : > { %916 = vrot.lane.b32.xlu2 %v840_v31, %s2684_s11  ;;  %1141 = vrot.lane.b32.xlu1 %v1077_v37, %s2685_s12  ;;  %v1018_v31 = vrot.slane %v3018_v56, 2  ;;  %v2514_v37 = vld [vmem:[%s4245_s3 + $0x20] sm:$0xff] }
  0x5d   : > { %1425 = vmatpush.msra.mxu0 %v2514_v37  ;;  %2620 = vmatpush.msra.mxu2 %v2514_v37  ;;  %v855_v48 = vsel %vm825_vm0, %v852_v43, %v854_v29  ;;  %v702_v43 = vsel %vm531_vm3, %v648_v44, 0.0  ;;  %v611_v44 = vadd.f32 %v2763_v2, %v560_v61 }
  0x5e   : > { %v1020_v49 = vsel %vm1002_vm2, %v1018_v31, %v1019_v35  ;;  %v844_v58 = vrot.slane %v702_v43, 1  ;;  %v1021_v31 = vrot.slane %v702_v43, 2 }
  0x5f   : > { %1426 = vmatpush.msra.mxu0 %v2513_v45  ;;  %2621 = vmatpush.msra.mxu2 %v2513_v45  ;;  %v3137_v43 = vmax.f32 %v611_v44, 0.0 }
  0x61   : > { %2622 = vmatpush.msrb.mxu2 %v3038_v14  ;;  %v862_v11 = vrot.slane %v3137_v43, 1 }
  0x63   : > { %926 = vrot.lane.b32.xlu0 %v853_v51, %s2684_s11  ;;  %v905_v51 = vsel %vm825_vm0, %v902_v47, %v904_v34  ;;  %v608_v47 = vadd.f32 %v2763_v2, %v557_v50  ;;  %2623 = vmatpush.msrb.mxu2 %v3066_v41 }
  0x64   : > { %1093 = vrot.lane.b32.xlu2 %v1017_v53, %s2685_s12  ;;  %966 = vrot.lane.b32.xlu1 %v903_v55, %s2684_s11  ;;  %v607_v53 = vadd.f32 %v2763_v2, %v556_v38  ;;  %v486_v55 = vld [vmem:[%s2758_s8 + $0xa0] sm:$0x3]  ;;  %v561_v38 = vmul.f32 %v2751_v1, %v489_v25 }
  0x65   : > { %v558_v8 = vmul.f32 %v2751_v1, %v486_v55  ;;  %2624 = vmatpush.msrb.mxu2 %v3077_v46  ;;  %v3102_v10 = vmax.f32 %v608_v47, 0.0  ;;  %v490_v55 = vld [vmem:[%s2758_s8 + $0xc0] sm:$0xff] }
  0x66   : > { %v655_v7 = vmax.f32 %v607_v53, 0.0  ;;  %v612_v53 = vadd.f32 %v2763_v2, %v561_v38 }
  0x67   : > { %v609_v20 = vadd.f32 %v2763_v2, %v558_v8  ;;  %v1034_v34 = vrot.slane %v3102_v10, 2 }
  0x68   : > { %v660_v8 = vmax.f32 %v612_v53, 0.0 }
  0x69   : > { %v657_v37 = vmax.f32 %v609_v20, 0.0 }
  0x6a   : > { %v714_v25 = vsel %vm531_vm3, %v660_v8, 0.0 }
  0x6b   : > { %1103 = vrot.lane.b32.xlu0 %v1030_v15, %s2685_s12  ;;  %v845_v15 = vsel %vm825_vm0, %v842_v4, %v844_v58  ;;  %v711_v50 = vsel %vm531_vm3, %v657_v37, 0.0  ;;  %v491_v58 = vld [vmem:[%s2758_s8 + $0xc8] sm:$0xff]  ;;  %v864_v38 = vrot.slane %v714_v25, 1 }
  0x6c   : > { %918 = vrot.lane.b32.xlu2 %v843_v17, %s2684_s11  ;;  %1143 = vrot.lane.b32.xlu1 %v1080_v18, %s2685_s12  ;;  %v1082_v17 = vsel %vm1002_vm2, %v1079_v9, %v1081_v62  ;;  %v3111_v18 = vsel %vm526_vm1, %v655_v7, 0.0  ;;  %v857_v9 = vrot.slane %v3102_v10, 1  ;;  %v859_v57 = vrot.slane %v711_v50, 1 }
  0x6d   : > { %v856_v4 = vrot.slane %v3111_v18, 1  ;;  %v1033_v28 = vrot.slane %v3111_v18, 2  ;;  %v562_v62 = vmul.f32 %v2751_v1, %v490_v55 }
  0x6f   : > { %v858_v45 = vsel %vm825_vm0, %v856_v4, %v857_v9  ;;  %v613_v22 = vadd.f32 %v2763_v2, %v562_v62 }
  0x71   : > { %v661_v44 = vmax.f32 %v613_v22, 0.0 }
  0x73   : > { %928 = vrot.lane.b32.xlu0 %v855_v48, %s2684_s11  ;;  %v1035_v48 = vsel %vm1002_vm2, %v1033_v28, %v1034_v34  ;;  %v493_v28 = vld [vmem:[%s2758_s8 + $0xd8] sm:$0xff]  ;;  %v3200_v62 = vsel %vm526_vm1, %v661_v44, 0.0 }
  0x74   : > { %1095 = vrot.lane.b32.xlu2 %v1020_v49, %s2685_s12  ;;  %968 = vrot.lane.b32.xlu1 %v905_v51, %s2684_s11  ;;  %v1022_v49 = vsel %vm1002_vm2, %v1019_v35, %v1021_v31  ;;  %v658_v51 = vmax.f32 %v610_v36, 0.0  ;;  %v1036_v35 = vrot.slane %v711_v50, 2  ;;  %v1039_v31 = vrot.slane %v3137_v43, 2  ;;  %v3254_v44 = vld [vmem:[%s4245_s3 + $0x38] sm:$0xff] }
  0x75   : > { %v565_v50 = vmul.f32 %v2751_v1, %v493_v28 }
  0x76   : > { %v3094_v52 = vpop.permute.xlu2 %1083  ;;  %v3147_v7 = vsel %vm526_vm1, %v658_v51, 0.0  ;;  %v1037_v20 = vsel %vm1002_vm2, %v1034_v34, %v1036_v35  ;;  %v2686_v51 = vmov 0.0  }
  0x77   : > { %v861_v16 = vrot.slane %v3147_v7, 1  ;;  %2292 = vst.msk [vmem:[%s3172_s30] sm:$0x1] %vm2291_vm6, %v2686_v51 }
  0x78   : > { %2293 = vst.msk [vmem:[%s3172_s30 + $0x18] sm:$0x1] %vm2291_vm6, %v2686_v51 }
  0x79   : > { %v863_v61 = vsel %vm825_vm0, %v861_v16, %v862_v11  ;;  %2294 = vst.msk [vmem:[%s3172_s30 + $0x30] sm:$0x1] %vm2291_vm6, %v2686_v51 }
  0x7a   : > { %2295 = vst.msk [vmem:[%s3172_s30 + $0x48] sm:$0x1] %vm2291_vm6, %v2686_v51 }
  0x7b   : > { %1105 = vrot.lane.b32.xlu0 %v1032_v12, %s2685_s12  ;;  %v492_v12 = vld [vmem:[%s2758_s8 + $0xd0] sm:$0x3]  ;;  %2296 = vst.msk [vmem:[%s3172_s30 + $0x60] sm:$0x1] %vm2291_vm6, %v2686_v51 }
  0x7c   : > { %920 = vrot.lane.b32.xlu2 %v845_v15, %s2684_s11  ;;  %1145 = vrot.lane.b32.xlu1 %v1082_v17, %s2685_s12  ;;  %v860_v15 = vsel %vm825_vm0, %v857_v9, %v859_v57  ;;  %v563_v17 = vmul.f32 %v2751_v1, %v491_v58  ;;  %v564_v4 = vmul.f32 %v2751_v1, %v492_v12  ;;  %v1038_v9 = vrot.slane %v3147_v7, 2 }
  0x7d   : > { %v1041_v58 = vrot.slane %v714_v25, 2  ;;  %v616_v12 = vadd.f32 %v2763_v2, %v565_v50  ;;  %2297 = vst.msk [vmem:[%s3172_s30 + $0x78] sm:$0x1] %vm2291_vm6, %v2686_v51 }
  0x7e   : > { %v3123_v29 = vpop.permute.xlu2 %1133  ;;  %v614_v37 = vadd.f32 %v2763_v2, %v563_v17  ;;  %v1040_v57 = vsel %vm1002_vm2, %v1038_v9, %v1039_v31  ;;  %2298 = vst.msk [vmem:[%s3172_s30 + $0x90] sm:$0x1] %vm2291_vm6, %v2686_v51 }
  0x7f   : > { %v1042_v16 = vsel %vm1002_vm2, %v1039_v31, %v1041_v58  ;;  %2299 = vst.msk [vmem:[%s3172_s30 + $0xa8] sm:$0x1] %vm2291_vm6, %v2686_v51  ;;  %v664_v31 = vmax.f32 %v616_v12, 0.0 }
  0x80   : > { %v3190_v35 = vmax.f32 %v614_v37, 0.0  ;;  %2300 = vst.msk [vmem:[%s3172_s30 + $0xc0] sm:$0x1] %vm2291_vm6, %v2686_v51  ;;  %v495_v37 = vld [vmem:[%s2758_s8 + $0xe8] sm:$0x3] }
  0x81   : > { %2301 = vst.msk [vmem:[%s3172_s30 + $0xd8] sm:$0x1] %vm2291_vm6, %v2686_v51 }
  0x82   : > { %v1044_v25 = vrot.slane %v3190_v35, 2  ;;  %2302 = vst.msk [vmem:[%s3172_s30 + $0xf0] sm:$0x1] %vm2291_vm6, %v2686_v51 }
  0x83   : > { %930 = vrot.lane.b32.xlu0 %v858_v45, %s2684_s11  ;;  %2303 = vst.msk [vmem:[%s3172_s30 + $0x108] sm:$0x1] %vm2291_vm6, %v2686_v51 }
  0x84   : > { %1107 = vrot.lane.b32.xlu2 %v1035_v48, %s2685_s12  ;;  %1097 = vrot.lane.b32.xlu1 %v1022_v49, %s2685_s12  ;;  %v615_v48 = vadd.f32 %v2763_v2, %v564_v4  ;;  %v494_v49 = vld [vmem:[%s2758_s8 + $0xe0] sm:$0xff]  ;;  %2304 = vst.msk [vmem:[%s3172_s30 + $0x120] sm:$0x1] %vm2291_vm6, %v2686_v51 }
  0x85   : > { %2305 = vst.msk [vmem:[%s3172_s30 + $0x138] sm:$0x1] %vm2291_vm6, %v2686_v51 }
  0x86   : > { %v3141_v47 = vpop.permute.xlu2 %1085  ;;  %v663_v8 = vmax.f32 %v615_v48, 0.0  ;;  %2306 = vst.msk [vmem:[%s3172_s30 + $0x150] sm:$0x1] %vm2291_vm6, %v2686_v51 }
  0x87   : > { %2307 = vst.msk [vmem:[%s3172_s30 + $0x168] sm:$0x1] %vm2291_vm6, %v2686_v51 }
  0x88   : > { %2308 = vst.msk [vmem:[%s3172_s30 + $0x11] sm:$0x1] %vm2291_vm6, %v2686_v51 }
  0x89   : > { %2309 = vst.msk [vmem:[%s3172_s30 + $0x29] sm:$0x1] %vm2291_vm6, %v2686_v51 }
  0x8a   : > { %2310 = vst.msk [vmem:[%s3172_s30 + $0x41] sm:$0x1] %vm2291_vm6, %v2686_v51 }
  0x8b   : > { %932 = vrot.lane.b32.xlu0 %v860_v15, %s2684_s11  ;;  %v867_v15 = vrot.slane %v3190_v35, 1  ;;  %2311 = vst.msk [vmem:[%s3172_s30 + $0x59] sm:$0x1] %vm2291_vm6, %v2686_v51 }
  0x8c   : > { %934 = vrot.lane.b32.xlu2 %v863_v61, %s2684_s11  ;;  %1109 = vrot.lane.b32.xlu1 %v1037_v20, %s2685_s12  ;;  %v1043_v61 = vrot.slane %v3200_v62, 2  ;;  %2312 = vst.msk [vmem:[%s3172_s30 + $0x71] sm:$0x1] %vm2291_vm6, %v2686_v51 }
  0x8d   : > { %v955_v34 = vpop.permute.xlu0 %954  ;;  %2313 = vst.msk [vmem:[%s3172_s30 + $0x89] sm:$0x1] %vm2291_vm6, %v2686_v51 }
  0x8e   : > { %v3174_v36 = vpop.permute.xlu2 %960  ;;  %v907_v45 = vpop.permute.xlu1 %906  ;;  %v1204_v17 = vsel %vm1179_vm4, %v2798_v30, %v955_v34  ;;  %v717_v30 = vsel %vm531_vm3, %v663_v8, 0.0  ;;  %v3249_v34 = vld [vmem:[%s4245_s3 + $0x40] sm:$0xff]  ;;  %v1045_v48 = vsel %vm1002_vm2, %v1043_v61, %v1044_v25  ;;  %2314 = vst.msk [vmem:[%s3172_s30 + $0xa1] sm:$0x1] %vm2291_vm6, %v2686_v51 }
  0x8f   : > { %v1180_v53 = vsel %vm1179_vm4, %v2803_v32, %v907_v45  ;;  %v865_v32 = vsel %vm825_vm0, %v862_v11, %v864_v38  ;;  %v866_v11 = vrot.slane %v3200_v62, 1  ;;  %v869_v38 = vrot.slane %v717_v30, 1  ;;  %2625 = vmatpush.msra.mxu3 %v3249_v34  ;;  %2315 = vst.msk [vmem:[%s3172_s30 + $0xb9] sm:$0x1] %vm2291_vm6, %v2686_v51 }
  0x90   : > { %v1213_v55 = vsel %vm1212_vm5, %v1180_v53, %v3094_v52  ;;  %v566_v52 = vmul.f32 %v2751_v1, %v494_v49  ;;  %v3271_v53 = vsel %vm526_vm1, %v664_v31, 0.0  ;;  %2316 = vst.msk [vmem:[%s3172_s30 + $0xd1] sm:$0x1] %vm2291_vm6, %v2686_v51 }
  0x91   : > { %2519 = vmatmul.msk.f32.vlgmr.msra.gmra.mxu0 %vm1314_vm7, %v1213_v55  ;;  %2551 = vmatmul.msk.f32.vlgmr.msra.gmra.mxu1 %vm1314_vm7, %v1213_v55  ;;  %v868_v45 = vsel %vm825_vm0, %v866_v11, %v867_v15  ;;  %v870_v50 = vsel %vm825_vm0, %v867_v15, %v869_v38  ;;  %2317 = vst.msk [vmem:[%s3172_s30 + $0xe9] sm:$0x1] %vm2291_vm6, %v2686_v51 }
  0x92   : > { %v617_v4 = vadd.f32 %v2763_v2, %v566_v52  ;;  %2626 = vmatpush.msra.mxu3 %v3254_v44  ;;  %2318 = vst.msk [vmem:[%s3172_s30 + $0x101] sm:$0x1] %vm2291_vm6, %v2686_v51 }
  0x93   : > { %1111 = vrot.lane.b32.xlu0 %v1040_v57, %s2685_s12  ;;  %v1046_v57 = vrot.slane %v717_v30, 2  ;;  %v497_v30 = vld [vmem:[%s2758_s8 + $0xf8] sm:$0xff]  ;;  %2319 = vst.msk [vmem:[%s3172_s30 + $0x119] sm:$0x1] %vm2291_vm6, %v2686_v51 }
  0x94   : > { %1113 = vrot.lane.b32.xlu2 %v1042_v16, %s2685_s12  ;;  %936 = vrot.lane.b32.xlu1 %v865_v32, %s2684_s11  ;;  %v3263_v49 = vmax.f32 %v617_v4, 0.0  ;;  %v3311_v16 = vld [vmem:[%s4245_s3 + $0x30] sm:$0xff]  ;;  %2320 = vst.msk [vmem:[%s3172_s30 + $0x131] sm:$0x1] %vm2291_vm6, %v2686_v51 }
  0x95   : > { %v1132_v20 = vpop.permute.xlu0 %1131  ;;  %2627 = vmatpush.msra.mxu3 %v3311_v16  ;;  %2321 = vst.msk [vmem:[%s3172_s30 + $0x149] sm:$0x1] %vm2291_vm6, %v2686_v51 }
  0x96   : > { %v3224_v22 = vpop.permute.xlu2 %912  ;;  %v957_v28 = vpop.permute.xlu1 %956  ;;  %v3233_v9 = vsel %vm1212_vm5, %v1204_v17, %v1132_v20  ;;  %v872_v32 = vrot.slane %v3263_v49, 1  ;;  %v496_v17 = vld [vmem:[%s2758_s8 + $0xf0] sm:$0xff]  ;;  %v1048_v20 = vrot.slane %v3271_v53, 2  ;;  %v1049_v61 = vrot.slane %v3263_v49, 2  ;;  %2322 = vst.msk [vmem:[%s3172_s30 + $0x161] sm:$0x1] %vm2291_vm6, %v2686_v51 }
  0x97   : > { %2543 = vmatmul.msk.f32.vlgmr.msra.gmra.mxu2 %vm1314_vm7, %v3233_v9  ;;  %v1205_v55 = vsel %vm1179_vm4, %v2789_v24, %v957_v28  ;;  %v871_v24 = vrot.slane %v3271_v53, 1  ;;  %v568_v31 = vmul.f32 %v2751_v1, %v496_v17  ;;  %2323 = vst.msk [vmem:[%s3172_s30 + $0x179] sm:$0x1] %vm2291_vm6, %v2686_v51  ;;  %v500_v17 = vld [vmem:[%s2758_s8 + $0x110] sm:$0xff] }
  0x98   : > { %1774 = vmatpush.msra.mxu2 %v3038_v14  ;;  %v567_v14 = vmul.f32 %v2751_v1, %v495_v37 }
  0x99   : > { %v873_v11 = vsel %vm825_vm0, %v871_v24, %v872_v32 }
  0x9a   : > { %1775 = vmatpush.msra.mxu2 %v3066_v41  ;;  %v618_v12 = vadd.f32 %v2763_v2, %v567_v14  ;;  %v569_v14 = vmul.f32 %v2751_v1, %v497_v30  ;;  %v499_v1 = vld [vmem:[%s2758_s8 + $0x108] sm:$0xff] }
  0x9b   : > { %938 = vrot.lane.b32.xlu0 %v868_v45, %s2684_s11 }
  0x9c   : > { %940 = vrot.lane.b32.xlu2 %v870_v50, %s2684_s11  ;;  %1115 = vrot.lane.b32.xlu1 %v1045_v48, %s2685_s12  ;;  %v666_v15 = vmax.f32 %v618_v12, 0.0  ;;  %v1050_v48 = vsel %vm1002_vm2, %v1048_v20, %v1049_v61  ;;  %v3374_v50 = vrot.slane %v2686_v51, 2  ;;  %v620_v24 = vadd.f32 %v2763_v2, %v569_v14 }
  0x9d   : > { %1776 = vmatpush.msra.mxu2 %v3077_v46  ;;  %v909_v41 = vpop.permute.xlu0 %908  ;;  %v3302_v46 = vsel %vm1212_vm5, %v1205_v55, %v3123_v29  ;;  %v1047_v29 = vsel %vm1002_vm2, %v1044_v25, %v1046_v57  ;;  %v619_v55 = vadd.f32 %v2763_v2, %v568_v31 }
  0x9e   : > { %v3291_v58 = vpop.permute.xlu2 %1089  ;;  %v1181_v52 = vsel %vm1179_vm4, %v2792_v27, %v909_v41  ;;  %v959_v8 = vpop.permute.xlu1 %958  ;;  %v498_v41 = vld [vmem:[%s2758_s8 + $0x100] sm:$0x3] }
  0x9f   : > { %2544 = vmatmul.msk.f32.gmra.mxu2 %vm1314_vm7, %v3302_v46  ;;  %v1214_v27 = vsel %vm1212_vm5, %v1181_v52, %v3141_v47  ;;  %v3332_v47 = vrot.slane %v2686_v51, 1  ;;  %v1206_v25 = vsel %vm1179_vm4, %v2840_v0, %v959_v8  ;;  %v720_v0 = vsel %vm531_vm3, %v666_v15, 0.0 }
  0xa0   : > { %2520 = vmatmul.msk.f32.gmra.mxu0 %vm1314_vm7, %v1214_v27  ;;  %2552 = vmatmul.msk.f32.gmra.mxu1 %vm1314_vm7, %v1214_v27  ;;  %v874_v45 = vrot.slane %v720_v0, 1  ;;  %v1051_v12 = vrot.slane %v720_v0, 2  ;;  %v667_v27 = vmax.f32 %v619_v55, 0.0  ;;  %v1207_v15 = vsel %vm1179_vm4, %v2831_v59, %v3174_v36  ;;  %v501_v0 = vld [vmem:[%s2758_s8 + $0x118] sm:$0x3]  ;;  %s2512_s8 = sshll.u32 %s4255_s24, 1 }
  0xa1   : > { %v3425_v59 = vmax.f32 %v620_v24, 0.0  ;;  %s465_s20 = scalar_lea.vmem %s4249_s7, %s2512_s8 }
  0xa2   : > { %v875_v57 = vsel %vm825_vm0, %v872_v32, %v874_v45  ;;  %v1052_v36 = vsel %vm1002_vm2, %v1049_v61, %v1051_v12  ;;  %v1183_v45 = vsel %vm1179_vm4, %v2856_v19, %v3224_v22 }
  0xa3   : > { %1117 = vrot.lane.b32.xlu0 %v1047_v29, %s2685_s12  ;;  %v2658_v29 = vld [vmem:[%s4246_s4] ss:$0 sm:$0xff]  ;;  %v1054_v55 = vrot.slane %v3425_v59, 2 }
  0xa4   : > { %1253 = vrot.lane.b32.xlu2 %v3332_v47, %s2684_s11  ;;  %942 = vrot.lane.b32.xlu1 %v873_v11, %s2684_s11  ;;  %v570_v11 = vmul.f32 %v2658_v29, %v498_v41  ;;  %v571_v20 = vmul.f32 %v2658_v29, %v499_v1  ;;  %v572_v31 = vmul.f32 %v2658_v29, %v500_v17 }
  0xa5   : > { %v1136_v4 = vpop.permute.xlu0 %1135  ;;  %v573_v22 = vmul.f32 %v2658_v29, %v501_v0 }
  0xa6   : > { %v3352_v28 = vpop.permute.xlu2 %914  ;;  %v911_v37 = vpop.permute.xlu1 %910  ;;  %v3360_v38 = vsel %vm1212_vm5, %v1206_v25, %v1136_v4  ;;  %v3430_v25 = vsel %vm526_vm1, %v667_v27, 0.0  ;;  %v2659_v4 = vld [vmem:[%s4247_s5] ss:$0 sm:$0xff] }
  0xa7   : > { %2545 = vmatmul.msk.f32.gmra.mxu2 %vm1314_vm7, %v3360_v38  ;;  %v1182_v32 = vsel %vm1179_vm4, %v2861_v21, %v911_v37  ;;  %v621_v30 = vadd.f32 %v2659_v4, %v570_v11  ;;  %v622_v37 = vadd.f32 %v2659_v4, %v571_v20  ;;  %v876_v61 = vrot.slane %v3430_v25, 1 }
  0xa8   : > { %v1053_v14 = vrot.slane %v3430_v25, 2  ;;  %v623_v19 = vadd.f32 %v2659_v4, %v572_v31  ;;  %v1184_v29 = vsel %vm1179_vm4, %v2931_v26, %v3352_v28 }
  0xa9   : > { %v669_v1 = vmax.f32 %v621_v30, 0.0 }
  0xaa   : > { %v1055_v27 = vsel %vm1002_vm2, %v1053_v14, %v1054_v55 }
  0xab   : > { %1119 = vrot.lane.b32.xlu0 %v1050_v48, %s2685_s12  ;;  %v877_v48 = vrot.slane %v3425_v59, 1  ;;  %v723_v11 = vsel %vm531_vm3, %v669_v1, 0.0 }
  0xac   : > { %944 = vrot.lane.b32.xlu2 %v875_v57, %s2684_s11  ;;  %1264 = vrot.lane.b32.xlu1 %v3374_v50, %s2685_s12  ;;  %v1056_v20 = vrot.slane %v723_v11, 2 }
  0xad   : > { %v1088_v52 = vpop.permute.xlu0 %1087  ;;  %v878_v12 = vsel %vm825_vm0, %v876_v61, %v877_v48 }
  0xae   : > { %v1092_v8 = vpop.permute.xlu2 %1091  ;;  %v1138_v2 = vpop.permute.xlu1 %1137  ;;  %v3413_v21 = vsel %vm1212_vm5, %v1182_v32, %v1088_v52  ;;  %v3450_v32 = vsel %vm1212_vm5, %v1183_v45, %v3291_v58  ;;  %v670_v52 = vmax.f32 %v622_v37, 0.0  ;;  %v3463_v58 = vmax.f32 %v623_v19, 0.0 }
  0xaf   : > { %2521 = vmatmul.msk.f32.gmra.mxu0 %vm1314_vm7, %v3413_v21  ;;  %v3419_v51 = vsel %vm1212_vm5, %v1207_v15, %v1138_v2  ;;  %2553 = vmatmul.msk.f32.gmra.mxu1 %vm1314_vm7, %v3413_v21  ;;  %v624_v15 = vadd.f32 %v2659_v4, %v573_v22  ;;  %v3471_v17 = vsel %vm1212_vm5, %v1184_v29, %v1092_v8 }
  0xb0   : > { %2546 = vmatmul.msk.f32.gmra.mxu2 %vm1314_vm7, %v3419_v51  ;;  %v3467_v2 = vsel %vm526_vm1, %v670_v52, 0.0  ;;  %v882_v4 = vrot.slane %v3463_v58, 1 }
  0xb1   : > { %v881_v30 = vrot.slane %v3467_v2, 1  ;;  %v672_v5 = vmax.f32 %v624_v15, 0.0  ;;  %v1058_v13 = vrot.slane %v3467_v2, 2 }
  0xb3   : > { %1255 = vrot.lane.b32.xlu0 %v3332_v47, %s2684_s11  ;;  %v883_v61 = vsel %vm825_vm0, %v881_v30, %v882_v4  ;;  %v726_v14 = vsel %vm531_vm3, %v672_v5, 0.0 }
  0xb4   : > { %1266 = vrot.lane.b32.xlu2 %v3374_v50, %s2685_s12  ;;  %1121 = vrot.lane.b32.xlu1 %v1052_v36, %s2685_s12 }
  0xb5   : > { %v923_v57 = vpop.permute.xlu0 %922 }
  0xb6   : > { %v917_v41 = vpop.permute.xlu2 %916  ;;  %v963_v24 = vpop.permute.xlu1 %962  ;;  %v1188_v26 = vsel %vm1179_vm4, %v2903_v63, %v923_v57  ;;  %v1057_v63 = vsel %vm1002_vm2, %v1054_v55, %v1056_v20  ;;  %v884_v55 = vrot.slane %v726_v14, 1 }
  0xb7   : > { %2522 = vmatmul.msk.f32.gmra.mxu0 %vm1314_vm7, %v3450_v32  ;;  %2554 = vmatmul.msk.f32.gmra.mxu1 %vm1314_vm7, %v3450_v32  ;;  %v1208_v31 = vsel %vm1179_vm4, %v2910_v6, %v963_v24  ;;  %v879_v6 = vrot.slane %v723_v11, 1  ;;  %v1185_v45 = vsel %vm1179_vm4, %v2926_v23, %v917_v41  ;;  %v1059_v23 = vrot.slane %v3463_v58, 2 }
  0xb8   : > { %v1061_v41 = vrot.slane %v726_v14, 2 }
  0xb9   : > { %v880_v57 = vsel %vm825_vm0, %v877_v48, %v879_v6  ;;  %v885_v48 = vsel %vm825_vm0, %v882_v4, %v884_v55 }
  0xba   : > { %v1062_v52 = vsel %vm1002_vm2, %v1059_v23, %v1061_v41 }
  0xbb   : > { %946 = vrot.lane.b32.xlu0 %v878_v12, %s2684_s11  ;;  %v1060_v12 = vsel %vm1002_vm2, %v1058_v13, %v1059_v23 }
  0xbc   : > { %1123 = vrot.lane.b32.xlu1 %v1055_v27, %s2685_s12  ;;  %948 = vrot.lane.b32.xlu2 %v880_v57, %s2684_s11 }
  0xbd   : > { %v1100_v28 = vpop.permute.xlu0 %1099 }
  0xbe   : > { %v1094_v36 = vpop.permute.xlu2 %1093  ;;  %v1140_v37 = vpop.permute.xlu1 %1139  ;;  %v3481_v8 = vsel %vm1212_vm5, %v1188_v26, %v1100_v28 }
  0xbf   : > { %2523 = vmatmul.msk.f32.gmra.mxu0 %vm1314_vm7, %v3471_v17  ;;  %v3486_v0 = vsel %vm1212_vm5, %v1208_v31, %v1140_v37  ;;  %2589 = vmatmul.msk.f32.vlgmr.msra.gmra.mxu3 %vm1314_vm7, %v3481_v8  ;;  %v3504_v1 = vsel %vm1212_vm5, %v1185_v45, %v1094_v36 }
  0xc0   : > { %2547 = vmatmul.msk.f32.gmra.mxu2 %vm1314_vm7, %v3486_v0  ;;  %2555 = vmatmul.msk.f32.gmra.mxu1 %vm1314_vm7, %v3471_v17 }
  0xc3   : > { %1125 = vrot.lane.b32.xlu0 %v1057_v63, %s2685_s12 }
  0xc4   : > { %950 = vrot.lane.b32.xlu1 %v883_v61, %s2684_s11  ;;  %1127 = vrot.lane.b32.xlu2 %v1060_v12, %s2685_s12 }
  0xc5   : > { %v925_v19 = vpop.permute.xlu0 %924 }
  0xc6   : > { %v919_v22 = vpop.permute.xlu2 %918  ;;  %v965_v24 = vpop.permute.xlu1 %964  ;;  %v1189_v29 = vsel %vm1179_vm4, %v2897_v60, %v925_v19 }
  0xc7   : > { %2524 = vmatmul.msk.f32.gmra.mxu0 %vm1314_vm7, %v3504_v1  ;;  %v1186_v27 = vsel %vm1179_vm4, %v3018_v56, %v919_v22  ;;  %v1209_v20 = vsel %vm1179_vm4, %v2905_v3, %v965_v24 }
  0xc8   : > { %2556 = vmatmul.msk.f32.gmra.mxu1 %vm1314_vm7, %v3504_v1 }
  0xcb   : > { %952 = vrot.lane.b32.xlu0 %v885_v48, %s2684_s11 }
  0xcc   : > { %1129 = vrot.lane.b32.xlu1 %v1062_v52, %s2685_s12  ;;  %1282 = vrot.lane.b32.xlu2 %v3332_v47, %s2684_s11 }
  0xcd   : > { %v1102_v11 = vpop.permute.xlu0 %1101 }
  0xce   : > { %v1096_v15 = vpop.permute.xlu2 %1095  ;;  %v1142_v26 = vpop.permute.xlu1 %1141  ;;  %v1222_v56 = vsel %vm1212_vm5, %v1189_v29, %v1102_v11 }
  0xcf   : > { %v3526_v28 = vsel %vm1212_vm5, %v1186_v27, %v1096_v15  ;;  %v3532_v36 = vsel %vm1212_vm5, %v1209_v20, %v1142_v26  ;;  %2590 = vmatmul.msk.f32.gmra.mxu3 %vm1314_vm7, %v1222_v56 }
  0xd0   : > { %2525 = vmatmul.msk.f32.gmra.mxu0 %vm1314_vm7, %v3526_v28  ;;  %2548 = vmatmul.msk.f32.gmra.mxu2 %vm1314_vm7, %v3532_v36 }
  0xd1   : > { %2557 = vmatmul.msk.f32.gmra.mxu1 %vm1314_vm7, %v3526_v28 }
  0xd3   : > { %1293 = vrot.lane.b32.xlu0 %v3374_v50, %s2685_s12 }
  0xd4   : > { %1284 = vrot.lane.b32.xlu1 %v3332_v47, %s2684_s11  ;;  %1295 = vrot.lane.b32.xlu2 %v3374_v50, %s2685_s12 }
  0xd5   : > { %v927_v60 = vpop.permute.xlu0 %926 }
  0xd6   : > { %v967_v3 = vpop.permute.xlu1 %966  ;;  %v1190_v30 = vsel %vm1179_vm4, %v2990_v39, %v927_v60  ;;  %v921_v6 = vpop.permute.xlu2 %920 }
  0xd7   : > { %v1210_v5 = vsel %vm1179_vm4, %v2997_v42, %v967_v3 }
  0xdd   : > { %v1104_v4 = vpop.permute.xlu0 %1103 }
  0xde   : > { %v1144_v31 = vpop.permute.xlu1 %1143  ;;  %v1223_v37 = vsel %vm1212_vm5, %v1190_v30, %v1104_v4  ;;  %v1108_v55 = vpop.permute.xlu2 %1107 }
  0xdf   : > { %v3553_v63 = vsel %vm1212_vm5, %v1210_v5, %v1144_v31  ;;  %2591 = vmatmul.msk.f32.gmra.mxu3 %vm1314_vm7, %v1223_v37 }
  0xe0   : > { %2549 = vmatmul.msk.f32.gmra.mxu2 %vm1314_vm7, %v3553_v63 }
  0xe5   : > { %v929_v47 = vpop.permute.xlu0 %928 }
  0xe6   : > { %v969_v50 = vpop.permute.xlu1 %968  ;;  %v1191_v39 = vsel %vm1179_vm4, %v2984_v33, %v929_v47  ;;  %v1187_v33 = vsel %vm1179_vm4, %v3013_v54, %v921_v6  ;;  %v935_v54 = vpop.permute.xlu2 %934 }
  0xe7   : > { %v1211_v42 = vsel %vm1179_vm4, %v2992_v40, %v969_v50  ;;  %v1194_v52 = vsel %vm1179_vm4, %v3147_v7, %v935_v54 }
  0xed   : > { %v1106_v45 = vpop.permute.xlu0 %1105 }
  0xee   : > { %v1146_v61 = vpop.permute.xlu1 %1145  ;;  %v1224_v14 = vsel %vm1212_vm5, %v1191_v39, %v1106_v45 }
  0xef   : > { %v3564_v57 = vsel %vm1212_vm5, %v1211_v42, %v1146_v61  ;;  %2592 = vmatmul.msk.f32.gmra.mxu3 %vm1314_vm7, %v1224_v14 }
  0xf0   : > { %2550 = vmatmul.msk.f32.gmra.mxu2 %vm1314_vm7, %v3564_v57 }
  0xf5   : > { %v931_v19 = vpop.permute.xlu0 %930 }
  0xf6   : > { %v1192_v22 = vsel %vm1179_vm4, %v3111_v18, %v931_v19  ;;  %v1098_v40 = vpop.permute.xlu1 %1097 }
  0xf7   : > { %v3574_v23 = vsel %vm1212_vm5, %v1187_v33, %v1098_v40  ;;  %v1225_v41 = vsel %vm1212_vm5, %v1192_v22, %v1108_v55 }
  0xf8   : > { %2526 = vmatmul.msk.f32.gmra.mxu0 %vm1314_vm7, %v3574_v23  ;;  %2558 = vmatmul.msk.f32.gmra.mxu1 %vm1314_vm7, %v3574_v23 }
  0xf9   : > { %2575 = vmatmul.msk.f32.vlgmr.msrb.gmra.mxu2 %vm1314_vm7, %v3233_v9  ;;  %2593 = vmatmul.msk.f32.gmra.mxu3 %vm1314_vm7, %v1225_v41 }
  0xfa   : > { %1831 = vmatpush.msrb.mxu2 %v3249_v34 }
  0xfc   : > { %1832 = vmatpush.msrb.mxu2 %v3254_v44 }
  0xfd   : > { %v933_v18 = vpop.permute.xlu0 %932 }
  0xfe   : > { %v1193_v24 = vsel %vm1179_vm4, %v3102_v10, %v933_v18  ;;  %v1110_v13 = vpop.permute.xlu1 %1109  ;;  %1833 = vmatpush.msrb.mxu2 %v3311_v16  ;;  %v1114_v10 = vpop.permute.xlu2 %1113 }
  0xff   : > { %v1226_v48 = vsel %vm1212_vm5, %v1193_v24, %v1110_v13 }
 0x100   : > { %2527 = vmatmul.msk.f32.gmra.mxu0 %vm1314_vm7, %v3481_v8  ;;  %2559 = vmatmul.msk.f32.gmra.mxu1 %vm1314_vm7, %v3481_v8 }
 0x101   : > { %2576 = vmatmul.msk.f32.gmra.mxu2 %vm1314_vm7, %v3302_v46  ;;  %2594 = vmatmul.msk.f32.gmra.mxu3 %vm1314_vm7, %v1226_v48 }
 0x105   : > { %v1112_v12 = vpop.permute.xlu0 %1111 }
 0x106   : > { %v937_v27 = vpop.permute.xlu1 %936  ;;  %v1227_v29 = vsel %vm1212_vm5, %v1194_v52, %v1112_v12  ;;  %v941_v15 = vpop.permute.xlu2 %940 }
 0x107   : > { %v1195_v8 = vsel %vm1179_vm4, %v3137_v43, %v937_v27 }
 0x108   : > { %2528 = vmatmul.msk.f32.gmra.mxu0 %vm1314_vm7, %v1222_v56  ;;  %2560 = vmatmul.msk.f32.gmra.mxu1 %vm1314_vm7, %v1222_v56  ;;  %v3608_v20 = vsel %vm1212_vm5, %v1195_v8, %v1114_v10 }
 0x109   : > { %2577 = vmatmul.msk.f32.gmra.mxu2 %vm1314_vm7, %v3360_v38  ;;  %2595 = vmatmul.msk.f32.gmra.mxu3 %vm1314_vm7, %v1227_v29 }
 0x10d   : > { %v939_v11 = vpop.permute.xlu0 %938 }
 0x10e   : > { %v1428_v7 = vpop.f32.mrf.mxu0  ;;  %v1116_v26 = vpop.permute.xlu1 %1115  ;;  %v1196_v43 = vsel %vm1179_vm4, %v3200_v62, %v939_v11  ;;  %v1197_v62 = vsel %vm1179_vm4, %v3190_v35, %v941_v15 }
 0x10f   : > { %1524 = vst.msk [vmem:[#allocation2] sm:$0xff] %vm1179_vm4, %v1428_v7  ;;  %v3620_v60 = vsel %vm1212_vm5, %v1196_v43, %v1116_v26  ;;  %v1254_v30 = vpop.permute.xlu2 %1253 }
 0x110   : > { %2529 = vmatmul.msk.f32.gmra.mxu0 %vm1314_vm7, %v1223_v37  ;;  %2561 = vmatmul.msk.f32.gmra.mxu1 %vm1314_vm7, %v1223_v37  ;;  %v1270_v39 = vsel %vm1179_vm4, 0.0, %v1254_v30 }
 0x111   : > { %2578 = vmatmul.msk.f32.gmra.mxu2 %vm1314_vm7, %v3419_v51  ;;  %2596 = vmatmul.msk.f32.gmra.mxu3 %vm1314_vm7, %v3608_v20 }
 0x115   : > { %v1118_v56 = vpop.permute.xlu0 %1117 }
 0x116   : > { %v943_v3 = vpop.permute.xlu1 %942  ;;  %v3635_v37 = vsel %vm1212_vm5, %v1197_v62, %v1118_v56 }
 0x117   : > { %v945_v50 = vpop.permute.xlu2 %944  ;;  %v1198_v6 = vsel %vm1179_vm4, %v3271_v53, %v943_v3 }
 0x118   : > { %2530 = vmatmul.msk.f32.gmra.mxu0 %vm1314_vm7, %v1224_v14  ;;  %2562 = vmatmul.msk.f32.gmra.mxu1 %vm1314_vm7, %v1224_v14  ;;  %v1199_v22 = vsel %vm1179_vm4, %v3263_v49, %v945_v50 }
 0x119   : > { %2579 = vmatmul.msk.f32.gmra.mxu2 %vm1314_vm7, %v3486_v0  ;;  %2597 = vmatmul.msk.f32.gmra.mxu3 %vm1314_vm7, %v3620_v60 }
 0x11a   : > { %v1500_v4 = vpop.f32.mrf.mxu2 }
 0x11b   : > { %1548 = vst.msk [vmem:[#allocation2 + $0xc0] sm:$0xff] %vm1179_vm4, %v1500_v4 }
 0x11d   : > { %v1431_v5 = vpop.f32.mrf.mxu0  ;;  %v1120_v31 = vpop.permute.xlu0 %1119 }
 0x11e   : > { %1525 = vst.msk [vmem:[#allocation2 + $0x8] sm:$0xff] %vm1179_vm4, %v1431_v5  ;;  %v1265_v47 = vpop.permute.xlu1 %1264  ;;  %v3649_v61 = vsel %vm1212_vm5, %v1198_v6, %v1120_v31 }
 0x11f   : > { %v1272_v42 = vsel %vm1212_vm5, %v1270_v39, %v1265_v47  ;;  %v1267_v19 = vpop.permute.xlu2 %1266 }
 0x120   : > { %2531 = vmatmul.msk.f32.gmra.mxu0 %vm1314_vm7, %v1225_v41  ;;  %2563 = vmatmul.msk.f32.gmra.mxu1 %vm1314_vm7, %v1225_v41 }
 0x121   : > { %2580 = vmatmul.msk.f32.gmra.mxu2 %vm1314_vm7, %v3532_v36  ;;  %2598 = vmatmul.msk.f32.gmra.mxu3 %vm1314_vm7, %v3635_v37 }
 0x122   : > { %v1503_v35 = vpop.f32.mrf.mxu2 }
 0x123   : > { %1549 = vst.msk [vmem:[#allocation2 + $0xc8] sm:$0xff] %vm1179_vm4, %v1503_v35 }
 0x125   : > { %v1256_v45 = vpop.permute.xlu0 %1255 }
 0x126   : > { %v1122_v53 = vpop.permute.xlu1 %1121  ;;  %v1271_v55 = vsel %vm1179_vm4, 0.0, %v1256_v45 }
 0x127   : > { %v1273_v40 = vsel %vm1212_vm5, %v1271_v55, %v1267_v19 }
 0x128   : > { %2532 = vmatmul.msk.f32.gmra.mxu0 %vm1314_vm7, %v1226_v48  ;;  %2564 = vmatmul.msk.f32.gmra.mxu1 %vm1314_vm7, %v1226_v48 }
 0x129   : > { %2581 = vmatmul.msk.f32.vlgmr.msra.gmra.mxu2 %vm1314_vm7, %v1272_v42  ;;  %2599 = vmatmul.msk.f32.gmra.mxu3 %vm1314_vm7, %v3649_v61 }
 0x12a   : > { %v1506_v14 = vpop.f32.mrf.mxu2  ;;  %2006 = vmatpush.msra.mxu2 %v3249_v34  ;;  %v3666_v34 = vsel %vm1212_vm5, %v1199_v22, %v1122_v53 }
 0x12b   : > { %1550 = vst.msk [vmem:[#allocation2 + $0xd0] sm:$0xff] %vm1179_vm4, %v1506_v14 }
 0x12c   : > { %v1434_v33 = vpop.f32.mrf.mxu0  ;;  %2007 = vmatpush.msra.mxu2 %v3254_v44  ;;  %v1603_v44 = vpop.f32.mrf.mxu1 }
 0x12d   : > { %1526 = vst.msk [vmem:[#allocation2 + $0x10] sm:$0xff] %vm1179_vm4, %v1434_v33  ;;  %v947_v41 = vpop.permute.xlu0 %946 }
 0x12e   : > { %2008 = vmatpush.msra.mxu2 %v3311_v16  ;;  %v1200_v54 = vsel %vm1179_vm4, %v3430_v25, %v947_v41  ;;  %v1124_v18 = vpop.permute.xlu1 %1123  ;;  %v949_v25 = vpop.permute.xlu2 %948 }
 0x12f   : > { %v3676_v48 = vsel %vm1212_vm5, %v1200_v54, %v1124_v18  ;;  %v1201_v10 = vsel %vm1179_vm4, %v3425_v59, %v949_v25 }
 0x130   : > { %2533 = vmatmul.msk.f32.gmra.mxu0 %vm1314_vm7, %v1227_v29  ;;  %2565 = vmatmul.msk.f32.gmra.mxu1 %vm1314_vm7, %v1227_v29 }
 0x131   : > { %2582 = vmatmul.msk.f32.gmra.mxu2 %vm1314_vm7, %v1273_v40  ;;  %2600 = vmatmul.msk.f32.gmra.mxu3 %vm1314_vm7, %v3666_v34 }
 0x132   : > { %v1580_v41 = vld [vmem:[#allocation2 + $0xd0] sm:$0xff] }
 0x133   : > { %v1509_v49 = vpop.f32.mrf.mxu2 }
 0x134   : > { %v1556_v16 = vld [vmem:[#allocation2 + $0x10] sm:$0xff]  ;;  %1551 = vst.msk [vmem:[#allocation2 + $0xd8] sm:$0xff] %vm1179_vm4, %v1509_v49  ;;  %v1437_v24 = vpop.f32.mrf.mxu0  ;;  %v1606_v52 = vpop.f32.mrf.mxu1 }
 0x135   : > { %v1693_v13 = vadd.f32 %v1603_v44, %v1556_v16  ;;  %1527 = vst.msk [vmem:[#allocation2 + $0x18] sm:$0xff] %vm1179_vm4, %v1437_v24  ;;  %v1126_v12 = vpop.permute.xlu0 %1125 }
 0x136   : > { %v3691_v11 = vsel %vm1212_vm5, %v1201_v10, %v1126_v12 }
 0x137   : > { %1723 = vst.msk [vmem:[#allocation2 + $0x10] sm:$0xff] %vm1179_vm4, %v1693_v13 }
 0x138   : > { %2534 = vmatmul.msk.f32.gmra.mxu0 %vm1314_vm7, %v3608_v20  ;;  %2566 = vmatmul.msk.f32.gmra.mxu1 %vm1314_vm7, %v3608_v20  ;;  %v1128_v20 = vpop.permute.xlu2 %1127 }
 0x139   : > { %2583 = vmatmul.msk.f32.vlgmr.msrb.gmra.mxu2 %vm1314_vm7, %v3413_v21  ;;  %2601 = vmatmul.msk.f32.gmra.mxu3 %vm1314_vm7, %v3676_v48  ;;  %v951_v21 = vpop.permute.xlu1 %950 }
 0x13a   : > { %v1202_v7 = vsel %vm1179_vm4, %v3467_v2, %v951_v21 }
 0x13b   : > { %v1581_v13 = vld [vmem:[#allocation2 + $0xd8] sm:$0xff] }
 0x13c   : > { %v1557_v27 = vld [vmem:[#allocation2 + $0x18] sm:$0xff]  ;;  %v1440_v29 = vpop.f32.mrf.mxu0  ;;  %v1609_v59 = vpop.f32.mrf.mxu1 }
 0x13d   : > { %v1694_v8 = vadd.f32 %v1606_v52, %v1557_v27  ;;  %1528 = vst.msk [vmem:[#allocation2 + $0x20] sm:$0xff] %vm1179_vm4, %v1440_v29 }
 0x13f   : > { %1724 = vst.msk [vmem:[#allocation2 + $0x18] sm:$0xff] %vm1179_vm4, %v1694_v8 }
 0x140   : > { %2535 = vmatmul.msk.f32.gmra.mxu0 %vm1314_vm7, %v3620_v60  ;;  %2567 = vmatmul.msk.f32.gmra.mxu1 %vm1314_vm7, %v3620_v60  ;;  %v1235_v60 = vsel %vm1212_vm5, %v1202_v7, %v1128_v20  ;;  %v1283_v6 = vpop.permute.xlu2 %1282 }
 0x141   : > { %2584 = vmatmul.msk.f32.gmra.mxu2 %vm1314_vm7, %v3450_v32  ;;  %2602 = vmatmul.msk.f32.gmra.mxu3 %vm1314_vm7, %v3691_v11  ;;  %v953_v32 = vpop.permute.xlu0 %952  ;;  %v1130_v3 = vpop.permute.xlu1 %1129  ;;  %v1299_v39 = vsel %vm1179_vm4, 0.0, %v1283_v6 }
 0x142   : > { %v1203_v2 = vsel %vm1179_vm4, %v3463_v58, %v953_v32 }
 0x143   : > { %v1512_v15 = vpop.f32.mrf.mxu2  ;;  %v1236_v31 = vsel %vm1212_vm5, %v1203_v2, %v1130_v3 }
 0x144   : > { %v1558_v26 = vld [vmem:[#allocation2 + $0x20] sm:$0xff]  ;;  %1552 = vst.msk [vmem:[#allocation2 + $0xe0] sm:$0xff] %vm1179_vm4, %v1512_v15  ;;  %v1443_v43 = vpop.f32.mrf.mxu0  ;;  %v1612_v30 = vpop.f32.mrf.mxu1 }
 0x145   : > { %v1695_v56 = vadd.f32 %v1609_v59, %v1558_v26  ;;  %1529 = vst.msk [vmem:[#allocation2 + $0x28] sm:$0xff] %vm1179_vm4, %v1443_v43 }
 0x147   : > { %1725 = vst.msk [vmem:[#allocation2 + $0x20] sm:$0xff] %vm1179_vm4, %v1695_v56 }
 0x148   : > { %2536 = vmatmul.msk.f32.gmra.mxu0 %vm1314_vm7, %v3635_v37  ;;  %2568 = vmatmul.msk.f32.gmra.mxu1 %vm1314_vm7, %v3635_v37  ;;  %v1296_v55 = vpop.permute.xlu2 %1295 }
 0x149   : > { %2585 = vmatmul.msk.f32.gmra.mxu2 %vm1314_vm7, %v3471_v17  ;;  %2603 = vmatmul.msk.f32.gmra.mxu3 %vm1314_vm7, %v1235_v60  ;;  %v1294_v45 = vpop.permute.xlu0 %1293 }
 0x14c   : > { %v1559_v4 = vld [vmem:[#allocation2 + $0x28] sm:$0xff]  ;;  %v1615_v17 = vpop.f32.mrf.mxu1 }
 0x14d   : > { %v1446_v62 = vpop.f32.mrf.mxu0  ;;  %v1696_v5 = vadd.f32 %v1612_v30, %v1559_v4 }
 0x14e   : > { %1530 = vst.msk [vmem:[#allocation2 + $0x30] sm:$0xff] %vm1179_vm4, %v1446_v62 }
 0x14f   : > { %1726 = vst.msk [vmem:[#allocation2 + $0x28] sm:$0xff] %vm1179_vm4, %v1696_v5 }
 0x150   : > { %2537 = vmatmul.msk.f32.gmra.mxu0 %vm1314_vm7, %v3649_v61  ;;  %2569 = vmatmul.msk.f32.gmra.mxu1 %vm1314_vm7, %v3649_v61  ;;  %v1301_v61 = vsel %vm1212_vm5, %v1299_v39, %v1294_v45 }
 0x151   : > { %2586 = vmatmul.msk.f32.gmra.mxu2 %vm1314_vm7, %v3504_v1  ;;  %2604 = vmatmul.msk.f32.gmra.mxu3 %vm1314_vm7, %v1236_v31  ;;  %v1853_v1 = vpop.f32.mrf.mxu3 }
 0x153   : > { %v1515_v58 = vpop.f32.mrf.mxu2 }
 0x154   : > { %1553 = vst.msk [vmem:[#allocation2 + $0xe8] sm:$0xff] %vm1179_vm4, %v1515_v58  ;;  %v1618_v42 = vpop.f32.mrf.mxu1 }
 0x155   : > { %v1560_v37 = vld [vmem:[#allocation2 + $0x30] sm:$0xff] }
 0x156   : > { %v1697_v47 = vadd.f32 %v1615_v17, %v1560_v37 }
 0x158   : > { %1727 = vst.msk [vmem:[#allocation2 + $0x30] sm:$0xff] %vm1179_vm4, %v1697_v47  ;;  %2538 = vmatmul.msk.f32.gmra.mxu0 %vm1314_vm7, %v3666_v34  ;;  %2570 = vmatmul.msk.f32.gmra.mxu1 %vm1314_vm7, %v3666_v34 }
 0x159   : > { %2587 = vmatmul.msk.f32.gmra.mxu2 %vm1314_vm7, %v3526_v28  ;;  %2605 = vmatmul.msk.f32.gmra.mxu3 %vm1314_vm7, %v3233_v9  ;;  %v1856_v9 = vpop.f32.mrf.mxu3 }
 0x15c   : > { %v1621_v19 = vpop.f32.mrf.mxu1 }
 0x15f   : > { %v1794_v50 = vld [vmem:[#allocation2 + $0x30] sm:$0xff] }
 0x160   : > { %v1931_v35 = vadd.f32 %v1853_v1, %v1794_v50  ;;  %2539 = vmatmul.msk.f32.gmra.mxu0 %vm1314_vm7, %v3676_v48  ;;  %2571 = vmatmul.msk.f32.gmra.mxu1 %vm1314_vm7, %v3676_v48 }
 0x161   : > { %2588 = vmatmul.msk.f32.gmra.mxu2 %vm1314_vm7, %v3574_v23  ;;  %2606 = vmatmul.msk.f32.gmra.mxu3 %vm1314_vm7, %v3302_v46  ;;  %v1285_v23 = vpop.permute.xlu1 %1284 }
 0x162   : > { %1961 = vst.msk [vmem:[#allocation2 + $0x30] sm:$0xff] %vm1179_vm4, %v1931_v35  ;;  %v1859_v46 = vpop.f32.mrf.mxu3  ;;  %v1300_v53 = vsel %vm1179_vm4, 0.0, %v1285_v23 }
 0x163   : > { %v1518_v28 = vpop.f32.mrf.mxu2  ;;  %v1302_v33 = vsel %vm1212_vm5, %v1300_v53, %v1296_v55 }
 0x164   : > { %1554 = vst.msk [vmem:[#allocation2 + $0xf0] sm:$0xff] %vm1179_vm4, %v1518_v28 }
 0x168   : > { %2540 = vmatmul.msk.f32.gmra.mxu0 %vm1314_vm7, %v3691_v11  ;;  %2572 = vmatmul.msk.f32.gmra.mxu1 %vm1314_vm7, %v3691_v11 }
 0x169   : > { %v3749_v14 = vld [vmem:[#allocation2 + $0x30] sm:$0xff]  ;;  %2613 = vmatmul.msk.f32.vlgmr.msra.gmra.mxu2 %vm1314_vm7, %v1301_v61  ;;  %2607 = vmatmul.msk.f32.gmra.mxu3 %vm1314_vm7, %v3360_v38 }
 0x16a   : > { %2265 = vst.msk [vmem:[%s3172_s30 + $0x49] sm:$0xff] %vm1179_vm4, %v3749_v14 }
 0x16b   : > { %v1584_v17 = vld [vmem:[#allocation2 + $0xf0] sm:$0xff] }
 0x170   : > { %2541 = vmatmul.msk.f32.gmra.mxu0 %vm1314_vm7, %v1235_v60  ;;  %2573 = vmatmul.msk.f32.gmra.mxu1 %vm1314_vm7, %v1235_v60  ;;  %v1583_v60 = vld [vmem:[#allocation2 + $0xe8] sm:$0xff] }
 0x171   : > { %2614 = vmatmul.msk.f32.gmra.mxu2 %vm1314_vm7, %v1302_v33  ;;  %2608 = vmatmul.msk.f32.gmra.mxu3 %vm1314_vm7, %v3419_v51 }
 0x172   : > { %v3768_v22 = vpop.f32.mrf.mxu3 }
 0x173   : > { %v1521_v40 = vpop.f32.mrf.mxu2 }
 0x174   : > { %1555 = vst.msk [vmem:[#allocation2 + $0xf8] sm:$0xff] %vm1179_vm4, %v1521_v40 }
 0x175   : > { %v1449_v38 = vpop.f32.mrf.mxu0  ;;  %v1624_v34 = vpop.f32.mrf.mxu1 }
 0x176   : > { %1531 = vst.msk [vmem:[#allocation2 + $0x38] sm:$0xff] %vm1179_vm4, %v1449_v38 }
 0x178   : > { %2542 = vmatmul.msk.f32.gmra.mxu0 %vm1314_vm7, %v1236_v31  ;;  %2574 = vmatmul.msk.f32.gmra.mxu1 %vm1314_vm7, %v1236_v31 }
 0x179   : > { %2609 = vmatmul.msk.f32.gmra.mxu3 %vm1314_vm7, %v3486_v0 }
 0x17c   : > { %v1675_v44 = vpop.f32.mrf.mxu2  ;;  %v3776_v49 = vpop.f32.mrf.mxu3 }
 0x17d   : > { %v1561_v51 = vld [vmem:[#allocation2 + $0x38] sm:$0xff]  ;;  %v1717_v54 = vadd.f32 %v1675_v44, %v1580_v41  ;;  %v1452_v18 = vpop.f32.mrf.mxu0  ;;  %v1627_v16 = vpop.f32.mrf.mxu1 }
 0x17e   : > { %v1698_v24 = vadd.f32 %v1618_v42, %v1561_v51  ;;  %1532 = vst.msk [vmem:[#allocation2 + $0x40] sm:$0xff] %vm1179_vm4, %v1452_v18  ;;  %v1585_v42 = vld [vmem:[#allocation2 + $0xf8] sm:$0xff] }
 0x17f   : > { %1747 = vst.msk [vmem:[#allocation2 + $0xd0] sm:$0xff] %vm1179_vm4, %v1717_v54 }
 0x180   : > { %1728 = vst.msk [vmem:[#allocation2 + $0x38] sm:$0xff] %vm1179_vm4, %v1698_v24 }
 0x181   : > { %2610 = vmatmul.msk.f32.gmra.mxu3 %vm1314_vm7, %v3532_v36  ;;  %v1582_v36 = vld [vmem:[#allocation2 + $0xe0] sm:$0xff] }
 0x184   : > { %v1678_v0 = vpop.f32.mrf.mxu2  ;;  %v3783_v48 = vpop.f32.mrf.mxu3 }
 0x185   : > { %v1562_v25 = vld [vmem:[#allocation2 + $0x40] sm:$0xff]  ;;  %v1718_v52 = vadd.f32 %v1678_v0, %v1581_v13  ;;  %v1455_v10 = vpop.f32.mrf.mxu0  ;;  %v1630_v12 = vpop.f32.mrf.mxu1 }
 0x186   : > { %v1699_v27 = vadd.f32 %v1621_v19, %v1562_v25  ;;  %1533 = vst.msk [vmem:[#allocation2 + $0x48] sm:$0xff] %vm1179_vm4, %v1455_v10 }
 0x187   : > { %v1795_v29 = vld [vmem:[#allocation2 + $0x38] sm:$0xff]  ;;  %1748 = vst.msk [vmem:[#allocation2 + $0xd8] sm:$0xff] %vm1179_vm4, %v1718_v52 }
 0x188   : > { %v1932_v8 = vadd.f32 %v1856_v9, %v1795_v29  ;;  %1729 = vst.msk [vmem:[#allocation2 + $0x40] sm:$0xff] %vm1179_vm4, %v1699_v27 }
 0x189   : > { %2611 = vmatmul.msk.f32.gmra.mxu3 %vm1314_vm7, %v3553_v63 }
 0x18a   : > { %1962 = vst.msk [vmem:[#allocation2 + $0x38] sm:$0xff] %vm1179_vm4, %v1932_v8 }
 0x18c   : > { %v1681_v11 = vpop.f32.mrf.mxu2  ;;  %v3791_v21 = vpop.f32.mrf.mxu3 }
 0x18d   : > { %v1563_v59 = vld [vmem:[#allocation2 + $0x48] sm:$0xff]  ;;  %v1719_v15 = vadd.f32 %v1681_v11, %v1582_v36  ;;  %v1458_v7 = vpop.f32.mrf.mxu0  ;;  %v1633_v20 = vpop.f32.mrf.mxu1 }
 0x18e   : > { %v1700_v26 = vadd.f32 %v1624_v34, %v1563_v59  ;;  %1534 = vst.msk [vmem:[#allocation2 + $0x50] sm:$0xff] %vm1179_vm4, %v1458_v7  ;;  %v1753_v34 = vld [vmem:[#allocation2] sm:$0xff] }
 0x18f   : > { %v1796_v43 = vld [vmem:[#allocation2 + $0x40] sm:$0xff]  ;;  %1749 = vst.msk [vmem:[#allocation2 + $0xe0] sm:$0xff] %vm1179_vm4, %v1719_v15 }
 0x190   : > { %v1933_v56 = vadd.f32 %v1859_v46, %v1796_v43  ;;  %1730 = vst.msk [vmem:[#allocation2 + $0x48] sm:$0xff] %vm1179_vm4, %v1700_v26 }
 0x191   : > { %v3796_v63 = vld [vmem:[#allocation2 + $0x38] sm:$0xff]  ;;  %2612 = vmatmul.msk.f32.gmra.mxu3 %vm1314_vm7, %v3564_v57 }
 0x192   : > { %2266 = vst.msk [vmem:[%s3172_s30 + $0x51] sm:$0xff] %vm1179_vm4, %v3796_v63 }
 0x193   : > { %1963 = vst.msk [vmem:[#allocation2 + $0x40] sm:$0xff] %vm1179_vm4, %v1933_v56 }
 0x194   : > { %v1684_v32 = vpop.f32.mrf.mxu2  ;;  %v3804_v2 = vpop.f32.mrf.mxu3 }
 0x195   : > { %v1564_v3 = vld [vmem:[#allocation2 + $0x50] sm:$0xff]  ;;  %v1720_v30 = vadd.f32 %v1684_v32, %v1583_v60  ;;  %v1461_v4 = vpop.f32.mrf.mxu0  ;;  %v1636_v62 = vpop.f32.mrf.mxu1 }
 0x196   : > { %v1701_v5 = vadd.f32 %v1627_v16, %v1564_v3  ;;  %1535 = vst.msk [vmem:[#allocation2 + $0x58] sm:$0xff] %vm1179_vm4, %v1461_v4 }
 0x197   : > { %v1797_v31 = vld [vmem:[#allocation2 + $0x48] sm:$0xff]  ;;  %1750 = vst.msk [vmem:[#allocation2 + $0xe8] sm:$0xff] %vm1179_vm4, %v1720_v30 }
 0x198   : > { %v1934_v57 = vadd.f32 %v3768_v22, %v1797_v31  ;;  %1731 = vst.msk [vmem:[#allocation2 + $0x50] sm:$0xff] %vm1179_vm4, %v1701_v5 }
 0x19a   : > { %v3810_v58 = vld [vmem:[#allocation2 + $0x40] sm:$0xff]  ;;  %1964 = vst.msk [vmem:[#allocation2 + $0x48] sm:$0xff] %vm1179_vm4, %v1934_v57 }
 0x19b   : > { %2267 = vst.msk [vmem:[%s3172_s30 + $0x61] sm:$0xff] %vm1179_vm4, %v3810_v58 }
 0x19c   : > { %v1687_v37 = vpop.f32.mrf.mxu2  ;;  %v3816_v47 = vpop.f32.mrf.mxu3 }
 0x19d   : > { %v1565_v1 = vld [vmem:[#allocation2 + $0x58] sm:$0xff]  ;;  %v1721_v50 = vadd.f32 %v1687_v37, %v1584_v17  ;;  %v1464_v35 = vpop.f32.mrf.mxu0  ;;  %v1639_v6 = vpop.f32.mrf.mxu1 }
 0x19e   : > { %v1702_v9 = vadd.f32 %v1630_v12, %v1565_v1  ;;  %1536 = vst.msk [vmem:[#allocation2 + $0x60] sm:$0xff] %vm1179_vm4, %v1464_v35 }
 0x19f   : > { %v1798_v28 = vld [vmem:[#allocation2 + $0x50] sm:$0xff]  ;;  %1751 = vst.msk [vmem:[#allocation2 + $0xf0] sm:$0xff] %vm1179_vm4, %v1721_v50 }
 0x1a0   : > { %v1935_v39 = vadd.f32 %v3776_v49, %v1798_v28  ;;  %1732 = vst.msk [vmem:[#allocation2 + $0x58] sm:$0xff] %vm1179_vm4, %v1702_v9 }
 0x1a1   : > { %v3822_v45 = vld [vmem:[#allocation2 + $0x48] sm:$0xff] }
 0x1a2   : > { %2268 = vst.msk [vmem:[%s3172_s30 + $0x69] sm:$0xff] %vm1179_vm4, %v3822_v45 }
 0x1a3   : > { %1965 = vst.msk [vmem:[#allocation2 + $0x50] sm:$0xff] %vm1179_vm4, %v1935_v39 }
 0x1a4   : > { %v1690_v61 = vpop.f32.mrf.mxu2  ;;  %v3828_v23 = vpop.f32.mrf.mxu3 }
 0x1a5   : > { %v1566_v46 = vld [vmem:[#allocation2 + $0x60] sm:$0xff]  ;;  %v1722_v53 = vadd.f32 %v1690_v61, %v1585_v42  ;;  %v1467_v55 = vpop.f32.mrf.mxu0  ;;  %v1642_v19 = vpop.f32.mrf.mxu1 }
 0x1a6   : > { %v1703_v33 = vadd.f32 %v1633_v20, %v1566_v46  ;;  %1537 = vst.msk [vmem:[#allocation2 + $0x68] sm:$0xff] %vm1179_vm4, %v1467_v55 }
 0x1a7   : > { %v1799_v22 = vld [vmem:[#allocation2 + $0x58] sm:$0xff]  ;;  %1752 = vst.msk [vmem:[#allocation2 + $0xf8] sm:$0xff] %vm1179_vm4, %v1722_v53 }
 0x1a8   : > { %v1936_v40 = vadd.f32 %v3783_v48, %v1799_v22  ;;  %1733 = vst.msk [vmem:[#allocation2 + $0x60] sm:$0xff] %vm1179_vm4, %v1703_v33  ;;  %v1754_v48 = vld [vmem:[#allocation2 + $0x8] sm:$0xff]  ;;  %v1791_v22 = vld [vmem:[#allocation2 + $0x18] sm:$0xff] }
 0x1aa   : > { %v3834_v38 = vld [vmem:[#allocation2 + $0x50] sm:$0xff]  ;;  %1966 = vst.msk [vmem:[#allocation2 + $0x58] sm:$0xff] %vm1179_vm4, %v1936_v40 }
 0x1ab   : > { %2269 = vst.msk [vmem:[%s3172_s30 + $0x79] sm:$0xff] %vm1179_vm4, %v3834_v38 }
 0x1ac   : > { %v1778_v41 = vpop.f32.mrf.mxu2  ;;  %v3840_v44 = vpop.f32.mrf.mxu3 }
 0x1ad   : > { %v1567_v49 = vld [vmem:[#allocation2 + $0x68] sm:$0xff]  ;;  %v1784_v51 = vadd.f32 %v1778_v41, %v1753_v34  ;;  %v1470_v54 = vpop.f32.mrf.mxu0  ;;  %v1645_v18 = vpop.f32.mrf.mxu1 }
 0x1ae   : > { %v1704_v16 = vadd.f32 %v1636_v62, %v1567_v49  ;;  %1538 = vst.msk [vmem:[#allocation2 + $0x70] sm:$0xff] %vm1179_vm4, %v1470_v54 }
 0x1af   : > { %v1800_v24 = vld [vmem:[#allocation2 + $0x60] sm:$0xff]  ;;  %1786 = vst.msk [vmem:[#allocation2] sm:$0xff] %vm1179_vm4, %v1784_v51 }
 0x1b0   : > { %v1937_v13 = vadd.f32 %v3791_v21, %v1800_v24  ;;  %1734 = vst.msk [vmem:[#allocation2 + $0x68] sm:$0xff] %vm1179_vm4, %v1704_v16 }
 0x1b1   : > { %v3846_v0 = vld [vmem:[#allocation2 + $0x58] sm:$0xff] }
 0x1b2   : > { %2270 = vst.msk [vmem:[%s3172_s30 + $0x81] sm:$0xff] %vm1179_vm4, %v3846_v0 }
 0x1b3   : > { %1967 = vst.msk [vmem:[#allocation2 + $0x60] sm:$0xff] %vm1179_vm4, %v1937_v13 }
 0x1b4   : > { %v1781_v25 = vpop.f32.mrf.mxu2  ;;  %v3852_v52 = vpop.f32.mrf.mxu3 }
 0x1b5   : > { %v1568_v10 = vld [vmem:[#allocation2 + $0x70] sm:$0xff]  ;;  %v1785_v12 = vadd.f32 %v1781_v25, %v1754_v48  ;;  %v1473_v27 = vpop.f32.mrf.mxu0  ;;  %v1648_v29 = vpop.f32.mrf.mxu1  ;;  %v1792_v48 = vld [vmem:[#allocation2 + $0x20] sm:$0xff] }
 0x1b6   : > { %v1705_v8 = vadd.f32 %v1639_v6, %v1568_v10  ;;  %1539 = vst.msk [vmem:[#allocation2 + $0x78] sm:$0xff] %vm1179_vm4, %v1473_v27  ;;  %v1788_v59 = vld [vmem:[#allocation2] sm:$0xff]  ;;  %v1790_v6 = vld [vmem:[#allocation2 + $0x10] sm:$0xff] }
 0x1b7   : > { %v1801_v36 = vld [vmem:[#allocation2 + $0x68] sm:$0xff]  ;;  %1787 = vst.msk [vmem:[#allocation2 + $0x8] sm:$0xff] %vm1179_vm4, %v1785_v12 }
 0x1b8   : > { %v1938_v11 = vadd.f32 %v3804_v2, %v1801_v36  ;;  %1735 = vst.msk [vmem:[#allocation2 + $0x70] sm:$0xff] %vm1179_vm4, %v1705_v8 }
 0x1ba   : > { %v3858_v21 = vld [vmem:[#allocation2 + $0x60] sm:$0xff]  ;;  %1968 = vst.msk [vmem:[#allocation2 + $0x68] sm:$0xff] %vm1179_vm4, %v1938_v11 }
 0x1bb   : > { %2271 = vst.msk [vmem:[%s3172_s30 + $0x91] sm:$0xff] %vm1179_vm4, %v3858_v21 }
 0x1bc   : > { %v1835_v15 = vpop.f32.mrf.mxu2  ;;  %v3864_v7 = vpop.f32.mrf.mxu3 }
 0x1bd   : > { %v1569_v20 = vld [vmem:[#allocation2 + $0x78] sm:$0xff]  ;;  %v1925_v26 = vadd.f32 %v1835_v15, %v1788_v59  ;;  %v1476_v43 = vpop.f32.mrf.mxu0  ;;  %v1651_v56 = vpop.f32.mrf.mxu1 }
 0x1be   : > { %v1706_v60 = vadd.f32 %v1642_v19, %v1569_v20  ;;  %1540 = vst.msk [vmem:[#allocation2 + $0x80] sm:$0xff] %vm1179_vm4, %v1476_v43  ;;  %v1789_v30 = vld [vmem:[#allocation2 + $0x8] sm:$0xff] }
 0x1bf   : > { %v1802_v32 = vld [vmem:[#allocation2 + $0x70] sm:$0xff]  ;;  %1955 = vst.msk [vmem:[#allocation2] sm:$0xff] %vm1179_vm4, %v1925_v26  ;;  %v1793_v20 = vld [vmem:[#allocation2 + $0x28] sm:$0xff] }
 0x1c0   : > { %v1939_v2 = vadd.f32 %v3816_v47, %v1802_v32  ;;  %1736 = vst.msk [vmem:[#allocation2 + $0x78] sm:$0xff] %vm1179_vm4, %v1706_v60 }
 0x1c1   : > { %v3870_v3 = vld [vmem:[#allocation2 + $0x68] sm:$0xff] }
 0x1c2   : > { %2272 = vst.msk [vmem:[%s3172_s30 + $0x99] sm:$0xff] %vm1179_vm4, %v3870_v3 }
 0x1c3   : > { %1969 = vst.msk [vmem:[#allocation2 + $0x70] sm:$0xff] %vm1179_vm4, %v1939_v2 }
 0x1c4   : > { %v1838_v4 = vpop.f32.mrf.mxu2  ;;  %v3876_v62 = vpop.f32.mrf.mxu3 }
 0x1c5   : > { %v1570_v5 = vld [vmem:[#allocation2 + $0x80] sm:$0xff]  ;;  %v1926_v31 = vadd.f32 %v1838_v4, %v1789_v30  ;;  %v1479_v57 = vpop.f32.mrf.mxu0  ;;  %v1654_v17 = vpop.f32.mrf.mxu1 }
 0x1c6   : > { %v3878_v37 = vld [vmem:[#allocation2] sm:$0xff]  ;;  %v1707_v47 = vadd.f32 %v1645_v18, %v1570_v5  ;;  %1541 = vst.msk [vmem:[#allocation2 + $0x88] sm:$0xff] %vm1179_vm4, %v1479_v57 }
 0x1c7   : > { %v1803_v1 = vld [vmem:[#allocation2 + $0x78] sm:$0xff]  ;;  %2259 = vst.msk [vmem:[%s3172_s30 + $0x1] sm:$0xff] %vm1179_vm4, %v3878_v37  ;;  %v2052_v57 = vsel %vm1179_vm4, %v3878_v37, 0.0 }
 0x1c8   : > { %v1940_v50 = vadd.f32 %v3828_v23, %v1803_v1  ;;  %1737 = vst.msk [vmem:[#allocation2 + $0x80] sm:$0xff] %vm1179_vm4, %v1707_v47 }
 0x1c9   : > { %1956 = vst.msk [vmem:[#allocation2 + $0x8] sm:$0xff] %vm1179_vm4, %v1926_v31 }
 0x1ca   : > { %v3887_v35 = vld [vmem:[#allocation2 + $0x70] sm:$0xff]  ;;  %1970 = vst.msk [vmem:[#allocation2 + $0x78] sm:$0xff] %vm1179_vm4, %v1940_v50 }
 0x1cb   : > { %2273 = vst.msk [vmem:[%s3172_s30 + $0xa9] sm:$0xff] %vm1179_vm4, %v3887_v35 }
 0x1cc   : > { %v1841_v9 = vpop.f32.mrf.mxu2  ;;  %v3893_v28 = vpop.f32.mrf.mxu3 }
 0x1cd   : > { %v1571_v39 = vld [vmem:[#allocation2 + $0x88] sm:$0xff]  ;;  %v1927_v42 = vadd.f32 %v1841_v9, %v1790_v6  ;;  %v1482_v61 = vpop.f32.mrf.mxu0  ;;  %v1657_v23 = vpop.f32.mrf.mxu1  ;;  %v1985_v6 = vld [vmem:[#allocation2 + $0xf0] sm:$0xff] }
 0x1ce   : > { %v1708_v46 = vadd.f32 %v1648_v29, %v1571_v39  ;;  %1542 = vst.msk [vmem:[#allocation2 + $0x90] sm:$0xff] %vm1179_vm4, %v1482_v61 }
 0x1cf   : > { %v1804_v53 = vld [vmem:[#allocation2 + $0x80] sm:$0xff]  ;;  %1957 = vst.msk [vmem:[#allocation2 + $0x10] sm:$0xff] %vm1179_vm4, %v1927_v42 }
 0x1d0   : > { %v1941_v55 = vadd.f32 %v3840_v44, %v1804_v53  ;;  %v3898_v19 = vld [vmem:[#allocation2 + $0x8] sm:$0xff]  ;;  %1738 = vst.msk [vmem:[#allocation2 + $0x88] sm:$0xff] %vm1179_vm4, %v1708_v46 }
 0x1d1   : > { %v3901_v33 = vld [vmem:[#allocation2 + $0x78] sm:$0xff]  ;;  %2260 = vst.msk [vmem:[%s3172_s30 + $0x9] sm:$0xff] %vm1179_vm4, %v3898_v19  ;;  %v2053_v4 = vsel %vm1179_vm4, %v3898_v19, 0.0 }
 0x1d2   : > { %2274 = vst.msk [vmem:[%s3172_s30 + $0xb1] sm:$0xff] %vm1179_vm4, %v3901_v33  ;;  %v2054_v47 = vadd.f32 %v2053_v4, %v2052_v57 }
 0x1d3   : > { %1971 = vst.msk [vmem:[#allocation2 + $0x80] sm:$0xff] %vm1179_vm4, %v1941_v55 }
 0x1d4   : > { %v1844_v40 = vpop.f32.mrf.mxu2  ;;  %v3910_v34 = vpop.f32.mrf.mxu3 }
 0x1d5   : > { %v1572_v41 = vld [vmem:[#allocation2 + $0x90] sm:$0xff]  ;;  %v1928_v44 = vadd.f32 %v1844_v40, %v1791_v22  ;;  %v1485_v49 = vpop.f32.mrf.mxu0  ;;  %v3912_v51 = vpop.f32.mrf.mxu1 }
 0x1d6   : > { %v3914_v54 = vld [vmem:[#allocation2 + $0x10] sm:$0xff]  ;;  %v1709_v18 = vadd.f32 %v1651_v56, %v1572_v41  ;;  %1543 = vst.msk [vmem:[#allocation2 + $0x98] sm:$0xff] %vm1179_vm4, %v1485_v49  ;;  %v1578_v41 = vld [vmem:[#allocation2 + $0xc0] sm:$0xff] }
 0x1d7   : > { %v1805_v16 = vld [vmem:[#allocation2 + $0x88] sm:$0xff]  ;;  %2261 = vst.msk [vmem:[%s3172_s30 + $0x19] sm:$0xff] %vm1179_vm4, %v3914_v54 }
 0x1d8   : > { %v1942_v24 = vadd.f32 %v3852_v52, %v1805_v16  ;;  %1739 = vst.msk [vmem:[#allocation2 + $0x90] sm:$0xff] %vm1179_vm4, %v1709_v18 }
 0x1d9   : > { %1958 = vst.msk [vmem:[#allocation2 + $0x18] sm:$0xff] %vm1179_vm4, %v1928_v44 }
 0x1da   : > { %v3923_v13 = vld [vmem:[#allocation2 + $0x80] sm:$0xff]  ;;  %1972 = vst.msk [vmem:[#allocation2 + $0x88] sm:$0xff] %vm1179_vm4, %v1942_v24 }
 0x1db   : > { %2275 = vst.msk [vmem:[%s3172_s30 + $0xc1] sm:$0xff] %vm1179_vm4, %v3923_v13 }
 0x1dc   : > { %v1847_v25 = vpop.f32.mrf.mxu2  ;;  %v3929_v10 = vpop.f32.mrf.mxu3 }
 0x1dd   : > { %v1573_v12 = vld [vmem:[#allocation2 + $0x98] sm:$0xff]  ;;  %v1929_v27 = vadd.f32 %v1847_v25, %v1792_v48  ;;  %v1488_v52 = vpop.f32.mrf.mxu0  ;;  %v3931_v29 = vpop.f32.mrf.mxu1 }
 0x1de   : > { %v1710_v8 = vadd.f32 %v1654_v17, %v1573_v12  ;;  %1544 = vst.msk [vmem:[#allocation2 + $0xa0] sm:$0xff] %vm1179_vm4, %v1488_v52  ;;  %v2055_v17 = vsel %vm1179_vm4, %v3914_v54, 0.0  ;;  %v1986_v12 = vld [vmem:[#allocation2 + $0xf8] sm:$0xff] }
 0x1df   : > { %v1806_v36 = vld [vmem:[#allocation2 + $0x90] sm:$0xff]  ;;  %1959 = vst.msk [vmem:[#allocation2 + $0x20] sm:$0xff] %vm1179_vm4, %v1929_v27  ;;  %v2056_v50 = vadd.f32 %v2055_v17, %v2054_v47 }
 0x1e0   : > { %v1943_v11 = vadd.f32 %v3864_v7, %v1806_v36  ;;  %v3936_v59 = vld [vmem:[#allocation2 + $0x18] sm:$0xff]  ;;  %1740 = vst.msk [vmem:[#allocation2 + $0x98] sm:$0xff] %vm1179_vm4, %v1710_v8  ;;  %v2065_v8 = vsel %vm1179_vm4, %v3796_v63, 0.0 }
 0x1e1   : > { %v3939_v15 = vld [vmem:[#allocation2 + $0x88] sm:$0xff]  ;;  %2262 = vst.msk [vmem:[%s3172_s30 + $0x21] sm:$0xff] %vm1179_vm4, %v3936_v59 }
 0x1e2   : > { %2276 = vst.msk [vmem:[%s3172_s30 + $0xc9] sm:$0xff] %vm1179_vm4, %v3939_v15 }
 0x1e3   : > { %1973 = vst.msk [vmem:[#allocation2 + $0x90] sm:$0xff] %vm1179_vm4, %v1943_v11 }
 0x1e4   : > { %v1850_v26 = vpop.f32.mrf.mxu2  ;;  %v3948_v43 = vpop.f32.mrf.mxu3 }
 0x1e5   : > { %v1574_v7 = vld [vmem:[#allocation2 + $0xa0] sm:$0xff]  ;;  %v1930_v56 = vadd.f32 %v1850_v26, %v1793_v20  ;;  %v1491_v60 = vpop.f32.mrf.mxu0  ;;  %v3950_v32 = vpop.f32.mrf.mxu1 }
 0x1e6   : > { %v3952_v2 = vld [vmem:[#allocation2 + $0x20] sm:$0xff]  ;;  %v1711_v30 = vadd.f32 %v1657_v23, %v1574_v7  ;;  %1545 = vst.msk [vmem:[#allocation2 + $0xa8] sm:$0xff] %vm1179_vm4, %v1491_v60 }
 0x1e7   : > { %v1807_v5 = vld [vmem:[#allocation2 + $0x98] sm:$0xff]  ;;  %2263 = vst.msk [vmem:[%s3172_s30 + $0x31] sm:$0xff] %vm1179_vm4, %v3952_v2  ;;  %v2059_v42 = vsel %vm1179_vm4, %v3952_v2, 0.0 }
 0x1e8   : > { %v1944_v31 = vadd.f32 %v3876_v62, %v1807_v5  ;;  %1741 = vst.msk [vmem:[#allocation2 + $0xa0] sm:$0xff] %vm1179_vm4, %v1711_v30  ;;  %v2057_v62 = vsel %vm1179_vm4, %v3936_v59, 0.0  ;;  %v2067_v30 = vsel %vm1179_vm4, %v3810_v58, 0.0  ;;  %v1579_v5 = vld [vmem:[#allocation2 + $0xc8] sm:$0xff] }
 0x1e9   : > { %1960 = vst.msk [vmem:[#allocation2 + $0x28] sm:$0xff] %vm1179_vm4, %v1930_v56  ;;  %v2058_v55 = vadd.f32 %v2057_v62, %v2056_v50  ;;  %v2071_v50 = vsel %vm1179_vm4, %v3834_v38, 0.0 }
 0x1ea   : > { %v3967_v1 = vld [vmem:[#allocation2 + $0x90] sm:$0xff]  ;;  %1974 = vst.msk [vmem:[#allocation2 + $0x98] sm:$0xff] %vm1179_vm4, %v1944_v31 }
 0x1eb   : > { %2277 = vst.msk [vmem:[%s3172_s30 + $0xd9] sm:$0xff] %vm1179_vm4, %v3967_v1  ;;  %v2060_v44 = vadd.f32 %v2059_v42, %v2058_v55  ;;  %v1814_v42 = vld [vmem:[#allocation2 + $0xd0] sm:$0xff] }
 0x1ec   : > { %v2010_v9 = vpop.f32.mrf.mxu2  ;;  %v1907_v39 = vpop.f32.mrf.mxu3 }
 0x1ed   : > { %v1575_v61 = vld [vmem:[#allocation2 + $0xa8] sm:$0xff]  ;;  %v2016_v23 = vadd.f32 %v2010_v9, %v1985_v6  ;;  %v1494_v46 = vpop.f32.mrf.mxu0  ;;  %v1669_v53 = vpop.f32.mrf.mxu1 }
 0x1ee   : > { %v1712_v22 = vadd.f32 %v3912_v51, %v1575_v61  ;;  %1546 = vst.msk [vmem:[#allocation2 + $0xb0] sm:$0xff] %vm1179_vm4, %v1494_v46  ;;  %v1715_v16 = vadd.f32 %v1669_v53, %v1578_v41 }
 0x1ef   : > { %v1808_v40 = vld [vmem:[#allocation2 + $0xa0] sm:$0xff]  ;;  %2018 = vst.msk [vmem:[#allocation2 + $0xf0] sm:$0xff] %vm1179_vm4, %v2016_v23  ;;  %v2073_v23 = vsel %vm1179_vm4, %v3846_v0, 0.0 }
 0x1f0   : > { %v1945_v49 = vadd.f32 %v3893_v28, %v1808_v40  ;;  %v3981_v18 = vld [vmem:[#allocation2 + $0x28] sm:$0xff]  ;;  %1742 = vst.msk [vmem:[#allocation2 + $0xa8] sm:$0xff] %vm1179_vm4, %v1712_v22  ;;  %v2063_v28 = vsel %vm1179_vm4, %v3749_v14, 0.0  ;;  %v2075_v40 = vsel %vm1179_vm4, %v3858_v21, 0.0 }
 0x1f1   : > { %v3984_v24 = vld [vmem:[#allocation2 + $0x98] sm:$0xff]  ;;  %v2061_v48 = vsel %vm1179_vm4, %v3981_v18, 0.0  ;;  %2264 = vst.msk [vmem:[%s3172_s30 + $0x39] sm:$0xff] %vm1179_vm4, %v3981_v18 }
 0x1f2   : > { %2278 = vst.msk [vmem:[%s3172_s30 + $0xe1] sm:$0xff] %vm1179_vm4, %v3984_v24  ;;  %v2062_v51 = vadd.f32 %v2061_v48, %v2060_v44 }
 0x1f3   : > { %1975 = vst.msk [vmem:[#allocation2 + $0xa0] sm:$0xff] %vm1179_vm4, %v1945_v49 }
 0x1f4   : > { %v2064_v25 = vadd.f32 %v2063_v28, %v2062_v51  ;;  %1745 = vst.msk [vmem:[#allocation2 + $0xc0] sm:$0xff] %vm1179_vm4, %v1715_v16  ;;  %v2013_v27 = vpop.f32.mrf.mxu2  ;;  %v1910_v52 = vpop.f32.mrf.mxu3  ;;  %v2077_v16 = vsel %vm1179_vm4, %v3870_v3, 0.0 }
 0x1f5   : > { %v1576_v36 = vld [vmem:[#allocation2 + $0xb0] sm:$0xff]  ;;  %v2017_v11 = vadd.f32 %v2013_v27, %v1986_v12  ;;  %v1497_v20 = vpop.f32.mrf.mxu0  ;;  %v1672_v26 = vpop.f32.mrf.mxu1  ;;  %v1815_v12 = vld [vmem:[#allocation2 + $0xd8] sm:$0xff] }
 0x1f6   : > { %v2066_v7 = vadd.f32 %v2065_v8, %v2064_v25  ;;  %v4000_v56 = vld [vmem:[#allocation2 + $0xf0] sm:$0xff]  ;;  %v1713_v60 = vadd.f32 %v3931_v29, %v1576_v36  ;;  %1547 = vst.msk [vmem:[#allocation2 + $0xb8] sm:$0xff] %vm1179_vm4, %v1497_v20  ;;  %v1716_v17 = vadd.f32 %v1672_v26, %v1579_v5  ;;  %v2069_v29 = vsel %vm1179_vm4, %v3822_v45, 0.0 }
 0x1f7   : > { %v1809_v4 = vld [vmem:[#allocation2 + $0xa8] sm:$0xff]  ;;  %2289 = vst.msk [vmem:[%s3172_s30 + $0x169] sm:$0xff] %vm1179_vm4, %v4000_v56  ;;  %v2081_v8 = vsel %vm1179_vm4, %v3901_v33, 0.0 }
 0x1f8   : > { %v2068_v31 = vadd.f32 %v2067_v30, %v2066_v7  ;;  %v1946_v57 = vadd.f32 %v3910_v34, %v1809_v4  ;;  %1743 = vst.msk [vmem:[#allocation2 + $0xb0] sm:$0xff] %vm1179_vm4, %v1713_v60  ;;  %v2083_v7 = vsel %vm1179_vm4, %v3923_v13, 0.0  ;;  %v2085_v4 = vsel %vm1179_vm4, %v3939_v15, 0.0 }
 0x1f9   : > { %2019 = vst.msk [vmem:[#allocation2 + $0xf8] sm:$0xff] %vm1179_vm4, %v2017_v11 }
 0x1fa   : > { %v4014_v47 = vld [vmem:[#allocation2 + $0xa0] sm:$0xff]  ;;  %v2070_v62 = vadd.f32 %v2069_v29, %v2068_v31  ;;  %1976 = vst.msk [vmem:[#allocation2 + $0xa8] sm:$0xff] %vm1179_vm4, %v1946_v57  ;;  %v2087_v57 = vsel %vm1179_vm4, %v3967_v1, 0.0 }
 0x1fb   : > { %2279 = vst.msk [vmem:[%s3172_s30 + $0xf1] sm:$0xff] %vm1179_vm4, %v4014_v47  ;;  %v1812_v34 = vld [vmem:[#allocation2 + $0xc0] sm:$0xff] }
 0x1fc   : > { %v2072_v6 = vadd.f32 %v2071_v50, %v2070_v62  ;;  %v1949_v9 = vadd.f32 %v1907_v39, %v1812_v34  ;;  %1746 = vst.msk [vmem:[#allocation2 + $0xc8] sm:$0xff] %vm1179_vm4, %v1716_v17  ;;  %v1913_v61 = vpop.f32.mrf.mxu3  ;;  %v1816_v17 = vld [vmem:[#allocation2 + $0xe0] sm:$0xff]  ;;  %v2089_v62 = vsel %vm1179_vm4, %v3984_v24, 0.0 }
 0x1fd   : > { %v1577_v46 = vld [vmem:[#allocation2 + $0xb8] sm:$0xff]  ;;  %v1951_v53 = vadd.f32 %v1913_v61, %v1814_v42 }
 0x1fe   : > { %v2074_v55 = vadd.f32 %v2073_v23, %v2072_v6  ;;  %1979 = vst.msk [vmem:[#allocation2 + $0xc0] sm:$0xff] %vm1179_vm4, %v1949_v9  ;;  %v1714_v22 = vadd.f32 %v3950_v32, %v1577_v46  ;;  %v2091_v9 = vsel %vm1179_vm4, %v4014_v47, 0.0 }
 0x1ff   : > { %v1810_v39 = vld [vmem:[#allocation2 + $0xb0] sm:$0xff]  ;;  %1981 = vst.msk [vmem:[#allocation2 + $0xd0] sm:$0xff] %vm1179_vm4, %v1951_v53 }
 0x200   : > { %v2076_v41 = vadd.f32 %v2075_v40, %v2074_v55  ;;  %v1947_v44 = vadd.f32 %v3929_v10, %v1810_v39  ;;  %v4031_v49 = vld [vmem:[#allocation2 + $0xf8] sm:$0xff]  ;;  %1744 = vst.msk [vmem:[#allocation2 + $0xb8] sm:$0xff] %vm1179_vm4, %v1714_v22  ;;  %v2079_v10 = vsel %vm1179_vm4, %v3887_v35, 0.0  ;;  %v1817_v39 = vld [vmem:[#allocation2 + $0xe8] sm:$0xff] }
 0x201   : > { %v4036_v48 = vld [vmem:[#allocation2 + $0xa8] sm:$0xff]  ;;  %2290 = vst.msk [vmem:[%s3172_s30 + $0x171] sm:$0xff] %vm1179_vm4, %v4031_v49 }
 0x202   : > { %v2078_v32 = vadd.f32 %v2077_v16, %v2076_v41  ;;  %2280 = vst.msk [vmem:[%s3172_s30 + $0xf9] sm:$0xff] %vm1179_vm4, %v4036_v48  ;;  %v2093_v23 = vsel %vm1179_vm4, %v4036_v48, 0.0 }
 0x203   : > { %1977 = vst.msk [vmem:[#allocation2 + $0xb0] sm:$0xff] %vm1179_vm4, %v1947_v44  ;;  %v1813_v51 = vld [vmem:[#allocation2 + $0xc8] sm:$0xff] }
 0x204   : > { %v2080_v28 = vadd.f32 %v2079_v10, %v2078_v32  ;;  %v1950_v25 = vadd.f32 %v1910_v52, %v1813_v51  ;;  %v1916_v27 = vpop.f32.mrf.mxu3 }
 0x205   : > { %v4049_v36 = vld [vmem:[#allocation2 + $0xc0] sm:$0xff]  ;;  %v1952_v11 = vadd.f32 %v1916_v27, %v1815_v12 }
 0x206   : > { %v2082_v20 = vadd.f32 %v2081_v8, %v2080_v28  ;;  %2283 = vst.msk [vmem:[%s3172_s30 + $0x121] sm:$0xff] %vm1179_vm4, %v4049_v36  ;;  %v4054_v26 = vld [vmem:[#allocation2 + $0xd0] sm:$0xff]  ;;  %v2099_v32 = vsel %vm1179_vm4, %v4049_v36, 0.0 }
 0x207   : > { %v1811_v60 = vld [vmem:[#allocation2 + $0xb8] sm:$0xff]  ;;  %1980 = vst.msk [vmem:[#allocation2 + $0xc8] sm:$0xff] %vm1179_vm4, %v1950_v25  ;;  %v2103_v12 = vsel %vm1179_vm4, %v4054_v26, 0.0 }
 0x208   : > { %v2084_v52 = vadd.f32 %v2083_v7, %v2082_v20  ;;  %v1948_v30 = vadd.f32 %v3948_v43, %v1811_v60  ;;  %2285 = vst.msk [vmem:[%s3172_s30 + $0x139] sm:$0xff] %vm1179_vm4, %v4054_v26 }
 0x209   : > { %1982 = vst.msk [vmem:[#allocation2 + $0xd8] sm:$0xff] %vm1179_vm4, %v1952_v11 }
 0x20a   : > { %v2086_v5 = vadd.f32 %v2085_v4, %v2084_v52  ;;  %v4066_v31 = vld [vmem:[#allocation2 + $0xb0] sm:$0xff]  ;;  %1978 = vst.msk [vmem:[#allocation2 + $0xb8] sm:$0xff] %vm1179_vm4, %v1948_v30  ;;  %v2111_v4 = vsel %vm1179_vm4, %v4000_v56, 0.0 }
 0x20b   : > { %2281 = vst.msk [vmem:[%s3172_s30 + $0x109] sm:$0xff] %vm1179_vm4, %v4066_v31  ;;  %v2095_v55 = vsel %vm1179_vm4, %v4066_v31, 0.0 }
 0x20c   : > { %v2088_v43 = vadd.f32 %v2087_v57, %v2086_v5  ;;  %v1919_v29 = vpop.f32.mrf.mxu3  ;;  %v2113_v57 = vsel %vm1179_vm4, %v4031_v49, 0.0 }
 0x20d   : > { %v1953_v50 = vadd.f32 %v1919_v29, %v1816_v17 }
 0x20e   : > { %v2090_v34 = vadd.f32 %v2089_v62, %v2088_v43  ;;  %v4076_v6 = vld [vmem:[#allocation2 + $0xc8] sm:$0xff] }
 0x20f   : > { %2284 = vst.msk [vmem:[%s3172_s30 + $0x129] sm:$0xff] %vm1179_vm4, %v4076_v6  ;;  %v2101_v28 = vsel %vm1179_vm4, %v4076_v6, 0.0 }
 0x210   : > { %v2092_v42 = vadd.f32 %v2091_v9, %v2090_v34  ;;  %v4083_v61 = vld [vmem:[#allocation2 + $0xd8] sm:$0xff]  ;;  %1983 = vst.msk [vmem:[#allocation2 + $0xe0] sm:$0xff] %vm1179_vm4, %v1953_v50 }
 0x211   : > { %v4088_v46 = vld [vmem:[#allocation2 + $0xb8] sm:$0xff]  ;;  %2286 = vst.msk [vmem:[%s3172_s30 + $0x141] sm:$0xff] %vm1179_vm4, %v4083_v61  ;;  %v2105_v8 = vsel %vm1179_vm4, %v4083_v61, 0.0 }
 0x212   : > { %v2094_v53 = vadd.f32 %v2093_v23, %v2092_v42  ;;  %2282 = vst.msk [vmem:[%s3172_s30 + $0x111] sm:$0xff] %vm1179_vm4, %v4088_v46  ;;  %v2097_v22 = vsel %vm1179_vm4, %v4088_v46, 0.0 }
 0x214   : > { %v2096_v40 = vadd.f32 %v2095_v55, %v2094_v53  ;;  %v1922_v41 = vpop.f32.mrf.mxu3 }
 0x215   : > { %v1954_v44 = vadd.f32 %v1922_v41, %v1817_v39 }
 0x216   : > { %v2098_v16 = vadd.f32 %v2097_v22, %v2096_v40 }
 0x217   : > { %v4102_v10 = vld [vmem:[#allocation2 + $0xe0] sm:$0xff]  ;;  %1984 = vst.msk [vmem:[#allocation2 + $0xe8] sm:$0xff] %vm1179_vm4, %v1954_v44 }
 0x218   : > { %v2100_v51 = vadd.f32 %v2099_v32, %v2098_v16  ;;  %2287 = vst.msk [vmem:[%s3172_s30 + $0x151] sm:$0xff] %vm1179_vm4, %v4102_v10  ;;  %v2107_v7 = vsel %vm1179_vm4, %v4102_v10, 0.0 }
 0x21a   : > { %v2102_v25 = vadd.f32 %v2101_v28, %v2100_v51 }
 0x21c   : > { %v2104_v27 = vadd.f32 %v2103_v12, %v2102_v25 }
 0x21e   : > { %v2106_v11 = vadd.f32 %v2105_v8, %v2104_v27  ;;  %v4114_v20 = vld [vmem:[#allocation2 + $0xe8] sm:$0xff] }
 0x21f   : > { %v2109_v60 = vsel %vm1179_vm4, %v4114_v20, 0.0  ;;  %2288 = vst.msk [vmem:[%s3172_s30 + $0x159] sm:$0xff] %vm1179_vm4, %v4114_v20 }
 0x220   : > { %v2108_v52 = vadd.f32 %v2107_v7, %v2106_v11 }
 0x222   : > { %v2110_v30 = vadd.f32 %v2109_v60, %v2108_v52 }
 0x224   : > { %v2112_v5 = vadd.f32 %v2111_v4, %v2110_v30 }
 0x226   : > { %v2114_v43 = vadd.f32 %v2113_v57, %v2112_v5 }
 0x228   : > { %v2115_v17 = vrot.slane %v2114_v43, 4 }
 0x22a   : > { %v2116_v29 = vadd.f32 %v2115_v17, %v2114_v43 }
 0x22c   : > { %v2117_v62 = vrot.slane %v2116_v29, 2 }
 0x22e   : > { %v2118_v50 = vadd.f32 %v2117_v62, %v2116_v29 }
 0x230   : > { %v2119_v34 = vrot.slane %v2118_v50, 1 }
 0x232   : > { %v4127_v9 = vadd.f32 %v2119_v34, %v2118_v50 }
 0x234   : > { %v4130_v42 = vmul.f32 0.00390625, %v4127_v9 }
 0x236   : > { %v2122_v23 = vsub.f32 %v3878_v37, %v4130_v42  ;;  %v2123_v53 = vsub.f32 %v3898_v19, %v4130_v42  ;;  %v2124_v55 = vsub.f32 %v3914_v54, %v4130_v42  ;;  %v2125_v22 = vsub.f32 %v3936_v59, %v4130_v42 }
 0x237   : > { %v2126_v41 = vsub.f32 %v3952_v2, %v4130_v42  ;;  %v2127_v16 = vsub.f32 %v3981_v18, %v4130_v42  ;;  %v2128_v54 = vsub.f32 %v3749_v14, %v4130_v42  ;;  %v2129_v2 = vsub.f32 %v3796_v63, %v4130_v42 }
 0x238   : > { %v2154_v40 = vmul.f32 %v2122_v23, %v2122_v23  ;;  %v2155_v39 = vmul.f32 %v2123_v53, %v2123_v53  ;;  %v2156_v44 = vmul.f32 %v2124_v55, %v2124_v55  ;;  %v2157_v32 = vmul.f32 %v2125_v22, %v2125_v22 }
 0x239   : > { %v2158_v28 = vmul.f32 %v2126_v41, %v2126_v41  ;;  %v2159_v12 = vmul.f32 %v2127_v16, %v2127_v16  ;;  %v2130_v8 = vsub.f32 %v3810_v58, %v4130_v42  ;;  %v2160_v11 = vmul.f32 %v2128_v54, %v2128_v54 }
 0x23a   : > { %v2186_v37 = vsel %vm1179_vm4, %v2154_v40, 0.0  ;;  %v2187_v19 = vsel %vm1179_vm4, %v2155_v39, 0.0  ;;  %v2189_v59 = vsel %vm1179_vm4, %v2156_v44, 0.0  ;;  %v2191_v27 = vsel %vm1179_vm4, %v2157_v32, 0.0 }
 0x23b   : > { %v2188_v51 = vadd.f32 %v2187_v19, %v2186_v37  ;;  %v2193_v7 = vsel %vm1179_vm4, %v2158_v28, 0.0  ;;  %v2131_v14 = vsub.f32 %v3822_v45, %v4130_v42  ;;  %v2161_v52 = vmul.f32 %v2129_v2, %v2129_v2 }
 0x23c   : > { %v2195_v30 = vsel %vm1179_vm4, %v2159_v12, 0.0  ;;  %v2132_v63 = vsub.f32 %v3834_v38, %v4130_v42  ;;  %v2162_v5 = vmul.f32 %v2130_v8, %v2130_v8  ;;  %v2197_v57 = vsel %vm1179_vm4, %v2160_v11, 0.0 }
 0x23d   : > { %v2190_v25 = vadd.f32 %v2189_v59, %v2188_v51  ;;  %v2133_v58 = vsub.f32 %v3846_v0, %v4130_v42  ;;  %v2163_v17 = vmul.f32 %v2131_v14, %v2131_v14  ;;  %v2199_v29 = vsel %vm1179_vm4, %v2161_v52, 0.0 }
 0x23e   : > { %v2134_v45 = vsub.f32 %v3858_v21, %v4130_v42  ;;  %v2164_v50 = vmul.f32 %v2132_v63, %v2132_v63  ;;  %v2201_v34 = vsel %vm1179_vm4, %v2162_v5, 0.0  ;;  %v2135_v38 = vsub.f32 %v3870_v3, %v4130_v42 }
 0x23f   : > { %v2192_v18 = vadd.f32 %v2191_v27, %v2190_v25  ;;  %v2165_v53 = vmul.f32 %v2133_v58, %v2133_v58  ;;  %v2203_v55 = vsel %vm1179_vm4, %v2163_v17, 0.0  ;;  %v2136_v0 = vsub.f32 %v3887_v35, %v4130_v42 }
 0x240   : > { %v2166_v40 = vmul.f32 %v2134_v45, %v2134_v45  ;;  %v2205_v39 = vsel %vm1179_vm4, %v2164_v50, 0.0  ;;  %v2137_v21 = vsub.f32 %v3901_v33, %v4130_v42  ;;  %v2167_v44 = vmul.f32 %v2135_v38, %v2135_v38 }
 0x241   : > { %v2194_v60 = vadd.f32 %v2193_v7, %v2192_v18  ;;  %v2207_v16 = vsel %vm1179_vm4, %v2165_v53, 0.0  ;;  %v2138_v3 = vsub.f32 %v3923_v13, %v4130_v42  ;;  %v2168_v37 = vmul.f32 %v2136_v0, %v2136_v0 }
 0x242   : > { %v2209_v19 = vsel %vm1179_vm4, %v2166_v40, 0.0  ;;  %v2139_v35 = vsub.f32 %v3939_v15, %v4130_v42  ;;  %v2169_v54 = vmul.f32 %v2137_v21, %v2137_v21  ;;  %v2211_v28 = vsel %vm1179_vm4, %v2167_v44, 0.0 }
 0x243   : > { %v2196_v4 = vadd.f32 %v2195_v30, %v2194_v60  ;;  %v2140_v33 = vsub.f32 %v3967_v1, %v4130_v42  ;;  %v2170_v25 = vmul.f32 %v2138_v3, %v2138_v3  ;;  %v2213_v2 = vsel %vm1179_vm4, %v2168_v37, 0.0 }
 0x244   : > { %v2141_v13 = vsub.f32 %v3984_v24, %v4130_v42  ;;  %v2171_v27 = vmul.f32 %v2139_v35, %v2139_v35  ;;  %v2215_v18 = vsel %vm1179_vm4, %v2169_v54, 0.0  ;;  %v2142_v15 = vsub.f32 %v4014_v47, %v4130_v42 }
 0x245   : > { %v2198_v43 = vadd.f32 %v2197_v57, %v2196_v4  ;;  %v2172_v11 = vmul.f32 %v2140_v33, %v2140_v33  ;;  %v2217_v7 = vsel %vm1179_vm4, %v2170_v25, 0.0  ;;  %v2143_v1 = vsub.f32 %v4036_v48, %v4130_v42 }
 0x246   : > { %v2173_v14 = vmul.f32 %v2141_v13, %v2141_v13  ;;  %v2219_v52 = vsel %vm1179_vm4, %v2171_v27, 0.0  ;;  %v2144_v24 = vsub.f32 %v4066_v31, %v4130_v42  ;;  %v2174_v4 = vmul.f32 %v2142_v15, %v2142_v15 }
 0x247   : > { %v2200_v62 = vadd.f32 %v2199_v29, %v2198_v43  ;;  %v2221_v63 = vsel %vm1179_vm4, %v2172_v11, 0.0  ;;  %v2145_v47 = vsub.f32 %v4088_v46, %v4130_v42  ;;  %v2175_v57 = vmul.f32 %v2143_v1, %v2143_v1 }
 0x248   : > { %v2223_v43 = vsel %vm1179_vm4, %v2173_v14, 0.0  ;;  %v2146_v48 = vsub.f32 %v4049_v36, %v4130_v42  ;;  %v2176_v17 = vmul.f32 %v2144_v24, %v2144_v24  ;;  %v2225_v29 = vsel %vm1179_vm4, %v2174_v4, 0.0 }
 0x249   : > { %v2202_v23 = vadd.f32 %v2201_v34, %v2200_v62  ;;  %v2147_v31 = vsub.f32 %v4076_v6, %v4130_v42  ;;  %v2177_v45 = vmul.f32 %v2145_v47, %v2145_v47  ;;  %v2227_v50 = vsel %vm1179_vm4, %v2175_v57, 0.0 }
 0x24a   : > { %v2148_v46 = vsub.f32 %v4054_v26, %v4130_v42  ;;  %v2229_v38 = vsel %vm1179_vm4, %v2176_v17, 0.0  ;;  %v2149_v36 = vsub.f32 %v4083_v61, %v4130_v42  ;;  %v2150_v6 = vsub.f32 %v4102_v10, %v4130_v42 }
 0x24b   : > { %v2204_v22 = vadd.f32 %v2203_v55, %v2202_v23  ;;  %v2178_v23 = vmul.f32 %v2146_v48, %v2146_v48  ;;  %v2179_v55 = vmul.f32 %v2147_v31, %v2147_v31  ;;  %v2151_v26 = vsub.f32 %v4114_v20, %v4130_v42 }
 0x24c   : > { %v2180_v40 = vmul.f32 %v2148_v46, %v2148_v46  ;;  %v2181_v21 = vmul.f32 %v2149_v36, %v2149_v36  ;;  %v2152_v61 = vsub.f32 %v4000_v56, %v4130_v42  ;;  %v2153_v10 = vsub.f32 %v4031_v49, %v4130_v42 }
 0x24d   : > { %v2206_v41 = vadd.f32 %v2205_v39, %v2204_v22  ;;  %v2231_v22 = vsel %vm1179_vm4, %v2177_v45, 0.0  ;;  %v2233_v39 = vsel %vm1179_vm4, %v2178_v23, 0.0  ;;  %v2235_v44 = vsel %vm1179_vm4, %v2179_v55, 0.0 }
 0x24e   : > { %v2237_v3 = vsel %vm1179_vm4, %v2180_v40, 0.0  ;;  %v2184_v20 = vmul.f32 %v2152_v61, %v2152_v61 }
 0x24f   : > { %v2208_v32 = vadd.f32 %v2207_v16, %v2206_v41 }
 0x250   : > { %v2245_v25 = vsel %vm1179_vm4, %v2184_v20, 0.0 }
 0x251   : > { %v2210_v51 = vadd.f32 %v2209_v19, %v2208_v32  ;;  %v2182_v32 = vmul.f32 %v2150_v6, %v2150_v6  ;;  %v2183_v19 = vmul.f32 %v2151_v26, %v2151_v26 }
 0x253   : > { %v2212_v59 = vadd.f32 %v2211_v28, %v2210_v51  ;;  %v2239_v51 = vsel %vm1179_vm4, %v2181_v21, 0.0  ;;  %v2241_v54 = vsel %vm1179_vm4, %v2182_v32, 0.0  ;;  %v2243_v33 = vsel %vm1179_vm4, %v2183_v19, 0.0 }
 0x255   : > { %v2214_v12 = vadd.f32 %v2213_v2, %v2212_v59  ;;  %v2185_v59 = vmul.f32 %v2153_v10, %v2153_v10 }
 0x257   : > { %v2216_v8 = vadd.f32 %v2215_v18, %v2214_v12  ;;  %v2247_v12 = vsel %vm1179_vm4, %v2185_v59, 0.0 }
 0x259   : > { %v2218_v60 = vadd.f32 %v2217_v7, %v2216_v8 }
 0x25b   : > { %v2220_v30 = vadd.f32 %v2219_v52, %v2218_v60 }
 0x25d   : > { %v2222_v5 = vadd.f32 %v2221_v63, %v2220_v30 }
 0x25f   : > { %v2224_v58 = vadd.f32 %v2223_v43, %v2222_v5 }
 0x261   : > { %v2226_v62 = vadd.f32 %v2225_v29, %v2224_v58 }
 0x263   : > { %v2228_v34 = vadd.f32 %v2227_v50, %v2226_v62 }
 0x265   : > { %v2230_v53 = vadd.f32 %v2229_v38, %v2228_v34 }
 0x267   : > { %v2232_v0 = vadd.f32 %v2231_v22, %v2230_v53 }
 0x269   : > { %v2234_v41 = vadd.f32 %v2233_v39, %v2232_v0 }
 0x26b   : > { %v2236_v16 = vadd.f32 %v2235_v44, %v2234_v41 }
 0x26d   : > { %v2238_v37 = vadd.f32 %v2237_v3, %v2236_v16 }
 0x26f   : > { %v2240_v35 = vadd.f32 %v2239_v51, %v2238_v37 }
 0x271   : > { %v2242_v28 = vadd.f32 %v2241_v54, %v2240_v35 }
 0x273   : > { %v2244_v56 = vadd.f32 %v2243_v33, %v2242_v28 }
 0x275   : > { %v2246_v2 = vadd.f32 %v2245_v25, %v2244_v56 }
 0x277   : > { %v2248_v13 = vadd.f32 %v2247_v12, %v2246_v2 }
 0x279   : > { %v2249_v49 = vrot.slane %v2248_v13, 4 }
 0x27b   : > { %v2250_v42 = vadd.f32 %v2249_v49, %v2248_v13 }
 0x27d   : > { %v2251_v27 = vrot.slane %v2250_v42, 2 }
 0x27f   : > { %v2252_v18 = vadd.f32 %v2251_v27, %v2250_v42 }
 0x281   : > { %v2253_v8 = vrot.slane %v2252_v18, 1 }
 0x283   : > { %v2254_v15 = vadd.f32 %v2253_v8, %v2252_v18 }
 0x285   : > { %v2256_v11 = vsel %vm2255_vm8, %v4127_v9, %v2254_v15 }
 0x286   : > { %2258 = vst.msk [vmem:[%s465_s20] sm:$0x3] %vm2257_vm9, %v2256_v11 }
 0x287 PF: > { %s18_s2 = sadd.s32 1, %s2682_s2   ;;  %s4250_s24 = smov %s2678_s1 }
 0x288   : > { %p15_p5 = scmp.ge.s32.totalorder %s18_s2, 4   ;;  %s4251_s1 = smov %s4253_s25 }
 0x28a   :  { %17 = sbr.rel (!%p15_p5) target bundleno = 2 (0x2), region = 94 }

</bundles_post_ra>
